<compile_context>
chip_gen: v5e
topology: v5e:2x2
jax: 0.10.0
libtpu: 0.0.40
codegen_flags: <defaults>
</compile_context>

<pallas_src>
import jax
import jax.numpy as jnp
from jax.experimental import pallas as pl
from jax.experimental.pallas import tpu as pltpu


# ----------------------------------------------------------------------------
# Kernel
# ----------------------------------------------------------------------------
def _shift_pm1(a):
    """Return (a[..., l-1], a[..., l+1]) along the last (lane) axis, zero-padded."""
    zcol = jnp.zeros(a.shape[:-1] + (1,), a.dtype)
    prev = jnp.concatenate([zcol, a[..., :-1]], axis=-1)   # value at l-1
    nxt = jnp.concatenate([a[..., 1:], zcol], axis=-1)     # value at l+1
    return prev, nxt


def cnn_fused_kernel(x_ref, w1_ref, b1_ref, w2_ref, b2_ref,
                     wfc1_ref, bfc1_ref, wfc2_ref, bfc2_ref, o_ref):
    B, L = x_ref.shape
    C1 = w1_ref.shape[0]          # conv1 out-channels (32)
    C2 = w2_ref.shape[0]          # conv2 out-channels (64)
    K2 = w2_ref.shape[1]          # 3 * C1

    x = x_ref[...]                                              # (B, L) f32
    x_prev, x_next = _shift_pm1(x)

    # ---- conv1: Conv1d(1, C1, k=3, pad=1) + ReLU  (VPU broadcasts) --------
    w1 = w1_ref[...]                                            # (C1, 3) f32
    h1 = (w1[:, 0:1][None] * x_prev[:, None, :]
          + w1[:, 1:2][None] * x[:, None, :]
          + w1[:, 2:3][None] * x_next[:, None, :]
          + b1_ref[...][None])                                  # (B, C1, L) f32
    h1 = jnp.maximum(h1, 0.0).astype(jnp.bfloat16)

    # ---- conv2: Conv1d(C1, C2, k=3, pad=1) + ReLU as one im2col matmul ----
    h1_prev, h1_next = _shift_pm1(h1)
    im2col = jnp.concatenate([h1_prev, h1, h1_next], axis=1)    # (B, 3*C1, L) bf16
    w2 = jnp.broadcast_to(w2_ref[...][None], (B, C2, K2))       # (B, C2, 3*C1) bf16
    h2 = jnp.einsum('bok,bkl->bol', w2, im2col,
                    preferred_element_type=jnp.float32)         # (B, C2, L) f32
    h2 = jnp.maximum(h2 + b2_ref[...][None], 0.0).astype(jnp.bfloat16)

    # ---- channel-major flatten (== torch .view(B, C2*L)), in-kernel -------
    flat = jnp.concatenate([h2[:, c, :] for c in range(C2)], axis=-1)  # (B, C2*L) bf16

    # ---- fc1 + ReLU --------------------------------------------------------
    z1 = jnp.dot(flat, wfc1_ref[...],
                 preferred_element_type=jnp.float32) + bfc1_ref[...]   # (B, HID) f32
    z1 = jnp.maximum(z1, 0.0).astype(jnp.bfloat16)

    # ---- fc2 (no ReLU); output padded to a lane-dense width ---------------
    z2 = jnp.dot(z1, wfc2_ref[...],
                 preferred_element_type=jnp.float32) + bfc2_ref[...]   # (B, P) f32
    o_ref[...] = z2


# ----------------------------------------------------------------------------
# Wrapper
# ----------------------------------------------------------------------------
_VMEM = pl.BlockSpec(memory_space=pltpu.MemorySpace.VMEM)


def cnn_forward(x, packed, n_output):
    """x: (B, n_input) f32  ->  (B, n_output) f32."""
    B, _ = x.shape
    pad_out = packed["wfc2"].shape[-1]
    out = pl.pallas_call(
        cnn_fused_kernel,
        out_shape=jax.ShapeDtypeStruct((B, pad_out), jnp.float32),
        in_specs=[_VMEM] * 9,
        out_specs=_VMEM,
    )(x, packed["w1"], packed["b1"], packed["w2"], packed["b2"],
      packed["wfc1"], packed["bfc1"], packed["wfc2"], packed["bfc2"])
    return out[:, :n_output]


def pack_params(p):
    """PyTorch-layout parameters -> kernel operand layouts / dtypes."""
    c1 = p["conv1_w"].shape[0]
    c2 = p["conv2_w"].shape[0]
    hid = p["fc1_w"].shape[0]
    n_out = p["fc2_w"].shape[0]
    pad_out = max(128, -(-n_out // 128) * 128)        # lane-dense fc2 output width

    # conv2 weight: (C2, C1, 3) -> (C2, 3*C1), tap-major to match im2col order.
    w2p = jnp.transpose(p["conv2_w"], (0, 2, 1)).reshape(c2, 3 * c1)
    # fc2 weight/bias padded to the lane-dense width with zeros.
    wfc2 = jnp.zeros((hid, pad_out), jnp.float32).at[:, :n_out].set(p["fc2_w"].T)
    bfc2 = jnp.zeros((1, pad_out), jnp.float32).at[0, :n_out].set(p["fc2_b"])

    return dict(
        w1=p["conv1_w"].reshape(c1, 3),                  # f32 (VPU path)
        b1=p["conv1_b"].reshape(c1, 1),                  # f32
        w2=w2p.astype(jnp.bfloat16),                     # bf16 MXU operand
        b2=p["conv2_b"].reshape(c2, 1),                  # f32
        wfc1=p["fc1_w"].T.astype(jnp.bfloat16),          # (C2*L, HID) bf16
        bfc1=p["fc1_b"].reshape(1, hid),                 # f32
        wfc2=wfc2.astype(jnp.bfloat16),                  # (HID, pad_out) bf16
        bfc2=bfc2,                                       # f32
    )


# ----------------------------------------------------------------------------
# Synthetic PyTorch-layout parameters + pure-JAX reference
# ----------------------------------------------------------------------------
def init_params(key, n_input, n_output, c1=32, c2=64, hidden=128):
    ks = jax.random.split(key, 8)

    def w(k, shape, scale=0.05):
        return jax.random.normal(k, shape, jnp.float32) * scale

    return dict(
        conv1_w=w(ks[0], (c1, 1, 3)), conv1_b=w(ks[1], (c1,)),
        conv2_w=w(ks[2], (c2, c1, 3)), conv2_b=w(ks[3], (c2,)),
        fc1_w=w(ks[4], (hidden, c2 * n_input)), fc1_b=w(ks[5], (hidden,)),
        fc2_w=w(ks[6], (n_output, hidden)), fc2_b=w(ks[7], (n_output,)),
    )


def cnn_reference(x, p):
    """Pure-JAX f32 reference of the PyTorch forward."""
    def conv1d(h, w, b):
        y = jax.lax.conv_general_dilated(
            h, w, window_strides=(1,), padding=((1, 1),),
            dimension_numbers=("NCH", "OIH", "NCH"))
        return y + b[None, :, None]

    B = x.shape[0]
    h = x[:, None, :]
    h = jax.nn.relu(conv1d(h, p["conv1_w"], p["conv1_b"]))
    h = jax.nn.relu(conv1d(h, p["conv2_w"], p["conv2_b"]))
    h = h.reshape(B, -1)
    h = jax.nn.relu(h @ p["fc1_w"].T + p["fc1_b"])
    return h @ p["fc2_w"].T + p["fc2_b"]


# ----------------------------------------------------------------------------
if __name__ == "__main__":
    # Small, lane-friendly shapes consistent with the module:
    # batch=2, n_input=128 (spectral length), n_output=4, conv channels 32/64.
    B, N_INPUT, N_OUTPUT = 2, 128, 4

    key = jax.random.PRNGKey(0)
    k_param, k_x = jax.random.split(key)
    torch_params = init_params(k_param, N_INPUT, N_OUTPUT)
    packed = pack_params(torch_params)
    x = jax.random.normal(k_x, (B, N_INPUT), jnp.float32)

    out = cnn_forward(x, packed, N_OUTPUT)
    out = jax.block_until_ready(out)

    assert out.shape == (B, N_OUTPUT), out.shape
    assert bool(jnp.all(jnp.isfinite(out)))

    ref = cnn_reference(x, torch_params)
    err = float(jnp.max(jnp.abs(out - ref)))
    assert err < 3e-2, f"max abs err vs reference: {err}"   # bf16-matmul tolerance

    print("KERNEL_OK")
</pallas_src>

<mosaic_0001>
module attributes {stable_mosaic.version = 11 : i64} {
  func.func @cnn_fused_kernel(%arg0: memref<2x128xf32, #tpu.memory_space<vmem>>, %arg1: memref<32x3xf32, #tpu.memory_space<vmem>>, %arg2: memref<32x1xf32, #tpu.memory_space<vmem>>, %arg3: memref<64x96xbf16, #tpu.memory_space<vmem>>, %arg4: memref<64x1xf32, #tpu.memory_space<vmem>>, %arg5: memref<8192x128xbf16, #tpu.memory_space<vmem>>, %arg6: memref<1x128xf32, #tpu.memory_space<vmem>>, %arg7: memref<128x128xbf16, #tpu.memory_space<vmem>>, %arg8: memref<1x128xf32, #tpu.memory_space<vmem>>, %arg9: memref<2x128xf32, #tpu.memory_space<vmem>>) attributes {dimension_semantics = [], scalar_prefetch = 0 : i64, scratch_operands = 0 : i64, tpu.core_type = #tpu.core_type<tc>} {
    %c0 = arith.constant 0 : index
    %c0_0 = arith.constant 0 : index
    %0 = vector.load %arg0[%c0, %c0_0] : memref<2x128xf32, #tpu.memory_space<vmem>>, vector<2x128xf32>
    %cst = arith.constant 0.000000e+00 : f32
    %1 = vector.broadcast %cst : f32 to vector<2x1xf32>
    %2 = vector.extract_strided_slice %0 {offsets = [0, 0], sizes = [2, 127], strides = [1, 1]} : vector<2x128xf32> to vector<2x127xf32>
    %3 = tpu.concatenate %1, %2 in 1 : vector<2x1xf32>, vector<2x127xf32> -> vector<2x128xf32>
    %4 = vector.extract_strided_slice %0 {offsets = [0, 1], sizes = [2, 127], strides = [1, 1]} : vector<2x128xf32> to vector<2x127xf32>
    %5 = tpu.concatenate %4, %1 in 1 : vector<2x127xf32>, vector<2x1xf32> -> vector<2x128xf32>
    %c0_1 = arith.constant 0 : index
    %c0_2 = arith.constant 0 : index
    %6 = vector.load %arg1[%c0_1, %c0_2] : memref<32x3xf32, #tpu.memory_space<vmem>>, vector<32x3xf32>
    %7 = vector.extract_strided_slice %6 {offsets = [0, 0], sizes = [32, 1], strides = [1, 1]} : vector<32x3xf32> to vector<32x1xf32>
    %8 = vector.shape_cast %7 : vector<32x1xf32> to vector<1x32x1xf32>
    %9 = vector.shape_cast %3 : vector<2x128xf32> to vector<2x1x128xf32>
    %10 = vector.broadcast %8 : vector<1x32x1xf32> to vector<2x32x128xf32>
    %11 = vector.broadcast %9 : vector<2x1x128xf32> to vector<2x32x128xf32>
    %12 = arith.mulf %10, %11 : vector<2x32x128xf32>
    %13 = vector.extract_strided_slice %6 {offsets = [0, 1], sizes = [32, 1], strides = [1, 1]} : vector<32x3xf32> to vector<32x1xf32>
    %14 = vector.shape_cast %13 : vector<32x1xf32> to vector<1x32x1xf32>
    %15 = vector.shape_cast %0 : vector<2x128xf32> to vector<2x1x128xf32>
    %16 = vector.broadcast %14 : vector<1x32x1xf32> to vector<2x32x128xf32>
    %17 = vector.broadcast %15 : vector<2x1x128xf32> to vector<2x32x128xf32>
    %18 = arith.mulf %16, %17 : vector<2x32x128xf32>
    %19 = arith.addf %12, %18 : vector<2x32x128xf32>
    %20 = vector.extract_strided_slice %6 {offsets = [0, 2], sizes = [32, 1], strides = [1, 1]} : vector<32x3xf32> to vector<32x1xf32>
    %21 = vector.shape_cast %20 : vector<32x1xf32> to vector<1x32x1xf32>
    %22 = vector.shape_cast %5 : vector<2x128xf32> to vector<2x1x128xf32>
    %23 = vector.broadcast %21 : vector<1x32x1xf32> to vector<2x32x128xf32>
    %24 = vector.broadcast %22 : vector<2x1x128xf32> to vector<2x32x128xf32>
    %25 = arith.mulf %23, %24 : vector<2x32x128xf32>
    %26 = arith.addf %19, %25 : vector<2x32x128xf32>
    %c0_3 = arith.constant 0 : index
    %c0_4 = arith.constant 0 : index
    %27 = vector.load %arg2[%c0_3, %c0_4] : memref<32x1xf32, #tpu.memory_space<vmem>>, vector<32x1xf32>
    %28 = vector.shape_cast %27 : vector<32x1xf32> to vector<1x32x1xf32>
    %29 = vector.broadcast %28 : vector<1x32x1xf32> to vector<2x32x128xf32>
    %30 = arith.addf %26, %29 : vector<2x32x128xf32>
    %cst_5 = arith.constant 0.000000e+00 : f32
    %31 = vector.broadcast %cst_5 : f32 to vector<2x32x128xf32>
    %32 = arith.maximumf %30, %31 : vector<2x32x128xf32>
    %33 = arith.truncf %32 : vector<2x32x128xf32> to vector<2x32x128xbf16>
    %cst_6 = arith.constant 0.000000e+00 : bf16
    %34 = vector.broadcast %cst_6 : bf16 to vector<2x32x1xbf16>
    %35 = vector.extract_strided_slice %33 {offsets = [0, 0, 0], sizes = [2, 32, 127], strides = [1, 1, 1]} : vector<2x32x128xbf16> to vector<2x32x127xbf16>
    %36 = tpu.concatenate %34, %35 in 2 : vector<2x32x1xbf16>, vector<2x32x127xbf16> -> vector<2x32x128xbf16>
    %37 = vector.extract_strided_slice %33 {offsets = [0, 0, 1], sizes = [2, 32, 127], strides = [1, 1, 1]} : vector<2x32x128xbf16> to vector<2x32x127xbf16>
    %38 = tpu.concatenate %37, %34 in 2 : vector<2x32x127xbf16>, vector<2x32x1xbf16> -> vector<2x32x128xbf16>
    %39 = tpu.concatenate %36, %33, %38 in 1 : vector<2x32x128xbf16>, vector<2x32x128xbf16>, vector<2x32x128xbf16> -> vector<2x96x128xbf16>
    %c0_7 = arith.constant 0 : index
    %c0_8 = arith.constant 0 : index
    %40 = vector.load %arg3[%c0_7, %c0_8] : memref<64x96xbf16, #tpu.memory_space<vmem>>, vector<64x96xbf16>
    %41 = vector.shape_cast %40 : vector<64x96xbf16> to vector<1x64x96xbf16>
    %42 = vector.shape_cast %41 : vector<1x64x96xbf16> to vector<1x64x96xbf16>
    %43 = vector.broadcast %42 : vector<1x64x96xbf16> to vector<2x64x96xbf16>
    "tpu.trace_start"() <{level = 10 : i32, message = "bok,bkl->bol"}> : () -> ()
    %cst_9 = arith.constant dense<0.000000e+00> : vector<2x64x128xf32>
    %44 = tpu.matmul %43, %39, %cst_9 {dimension_numbers = #tpu.dot_dimension_numbers<[2], [1], [1], [2], [0, 0, 0, 1, 1, 2], [0], [0]>} : vector<2x64x96xbf16>, vector<2x96x128xbf16>, vector<2x64x128xf32> -> vector<2x64x128xf32>
    "tpu.trace_stop"() : () -> ()
    %c0_10 = arith.constant 0 : index
    %c0_11 = arith.constant 0 : index
    %45 = vector.load %arg4[%c0_10, %c0_11] : memref<64x1xf32, #tpu.memory_space<vmem>>, vector<64x1xf32>
    %46 = vector.shape_cast %45 : vector<64x1xf32> to vector<1x64x1xf32>
    %47 = vector.broadcast %46 : vector<1x64x1xf32> to vector<2x64x128xf32>
    %48 = arith.addf %44, %47 : vector<2x64x128xf32>
    %cst_12 = arith.constant 0.000000e+00 : f32
    %49 = vector.broadcast %cst_12 : f32 to vector<2x64x128xf32>
    %50 = arith.maximumf %48, %49 : vector<2x64x128xf32>
    %51 = arith.truncf %50 : vector<2x64x128xf32> to vector<2x64x128xbf16>
    %52 = vector.extract_strided_slice %51 {offsets = [0, 0, 0], sizes = [2, 1, 128], strides = [1, 1, 1]} : vector<2x64x128xbf16> to vector<2x1x128xbf16>
    %53 = vector.shape_cast %52 : vector<2x1x128xbf16> to vector<2x128xbf16>
    %54 = vector.extract_strided_slice %51 {offsets = [0, 1, 0], sizes = [2, 1, 128], strides = [1, 1, 1]} : vector<2x64x128xbf16> to vector<2x1x128xbf16>
    %55 = vector.shape_cast %54 : vector<2x1x128xbf16> to vector<2x128xbf16>
    %56 = vector.extract_strided_slice %51 {offsets = [0, 2, 0], sizes = [2, 1, 128], strides = [1, 1, 1]} : vector<2x64x128xbf16> to vector<2x1x128xbf16>
    %57 = vector.shape_cast %56 : vector<2x1x128xbf16> to vector<2x128xbf16>
    %58 = vector.extract_strided_slice %51 {offsets = [0, 3, 0], sizes = [2, 1, 128], strides = [1, 1, 1]} : vector<2x64x128xbf16> to vector<2x1x128xbf16>
    %59 = vector.shape_cast %58 : vector<2x1x128xbf16> to vector<2x128xbf16>
    %60 = vector.extract_strided_slice %51 {offsets = [0, 4, 0], sizes = [2, 1, 128], strides = [1, 1, 1]} : vector<2x64x128xbf16> to vector<2x1x128xbf16>
    %61 = vector.shape_cast %60 : vector<2x1x128xbf16> to vector<2x128xbf16>
    %62 = vector.extract_strided_slice %51 {offsets = [0, 5, 0], sizes = [2, 1, 128], strides = [1, 1, 1]} : vector<2x64x128xbf16> to vector<2x1x128xbf16>
    %63 = vector.shape_cast %62 : vector<2x1x128xbf16> to vector<2x128xbf16>
    %64 = vector.extract_strided_slice %51 {offsets = [0, 6, 0], sizes = [2, 1, 128], strides = [1, 1, 1]} : vector<2x64x128xbf16> to vector<2x1x128xbf16>
    %65 = vector.shape_cast %64 : vector<2x1x128xbf16> to vector<2x128xbf16>
    %66 = vector.extract_strided_slice %51 {offsets = [0, 7, 0], sizes = [2, 1, 128], strides = [1, 1, 1]} : vector<2x64x128xbf16> to vector<2x1x128xbf16>
    %67 = vector.shape_cast %66 : vector<2x1x128xbf16> to vector<2x128xbf16>
    %68 = vector.extract_strided_slice %51 {offsets = [0, 8, 0], sizes = [2, 1, 128], strides = [1, 1, 1]} : vector<2x64x128xbf16> to vector<2x1x128xbf16>
    %69 = vector.shape_cast %68 : vector<2x1x128xbf16> to vector<2x128xbf16>
    %70 = vector.extract_strided_slice %51 {offsets = [0, 9, 0], sizes = [2, 1, 128], strides = [1, 1, 1]} : vector<2x64x128xbf16> to vector<2x1x128xbf16>
    %71 = vector.shape_cast %70 : vector<2x1x128xbf16> to vector<2x128xbf16>
    %72 = vector.extract_strided_slice %51 {offsets = [0, 10, 0], sizes = [2, 1, 128], strides = [1, 1, 1]} : vector<2x64x128xbf16> to vector<2x1x128xbf16>
    %73 = vector.shape_cast %72 : vector<2x1x128xbf16> to vector<2x128xbf16>
    %74 = vector.extract_strided_slice %51 {offsets = [0, 11, 0], sizes = [2, 1, 128], strides = [1, 1, 1]} : vector<2x64x128xbf16> to vector<2x1x128xbf16>
    %75 = vector.shape_cast %74 : vector<2x1x128xbf16> to vector<2x128xbf16>
    %76 = vector.extract_strided_slice %51 {offsets = [0, 12, 0], sizes = [2, 1, 128], strides = [1, 1, 1]} : vector<2x64x128xbf16> to vector<2x1x128xbf16>
    %77 = vector.shape_cast %76 : vector<2x1x128xbf16> to vector<2x128xbf16>
    %78 = vector.extract_strided_slice %51 {offsets = [0, 13, 0], sizes = [2, 1, 128], strides = [1, 1, 1]} : vector<2x64x128xbf16> to vector<2x1x128xbf16>
    %79 = vector.shape_cast %78 : vector<2x1x128xbf16> to vector<2x128xbf16>
    %80 = vector.extract_strided_slice %51 {offsets = [0, 14, 0], sizes = [2, 1, 128], strides = [1, 1, 1]} : vector<2x64x128xbf16> to vector<2x1x128xbf16>
    %81 = vector.shape_cast %80 : vector<2x1x128xbf16> to vector<2x128xbf16>
    %82 = vector.extract_strided_slice %51 {offsets = [0, 15, 0], sizes = [2, 1, 128], strides = [1, 1, 1]} : vector<2x64x128xbf16> to vector<2x1x128xbf16>
    %83 = vector.shape_cast %82 : vector<2x1x128xbf16> to vector<2x128xbf16>
    %84 = vector.extract_strided_slice %51 {offsets = [0, 16, 0], sizes = [2, 1, 128], strides = [1, 1, 1]} : vector<2x64x128xbf16> to vector<2x1x128xbf16>
    %85 = vector.shape_cast %84 : vector<2x1x128xbf16> to vector<2x128xbf16>
    %86 = vector.extract_strided_slice %51 {offsets = [0, 17, 0], sizes = [2, 1, 128], strides = [1, 1, 1]} : vector<2x64x128xbf16> to vector<2x1x128xbf16>
    %87 = vector.shape_cast %86 : vector<2x1x128xbf16> to vector<2x128xbf16>
    %88 = vector.extract_strided_slice %51 {offsets = [0, 18, 0], sizes = [2, 1, 128], strides = [1, 1, 1]} : vector<2x64x128xbf16> to vector<2x1x128xbf16>
    %89 = vector.shape_cast %88 : vector<2x1x128xbf16> to vector<2x128xbf16>
    %90 = vector.extract_strided_slice %51 {offsets = [0, 19, 0], sizes = [2, 1, 128], strides = [1, 1, 1]} : vector<2x64x128xbf16> to vector<2x1x128xbf16>
    %91 = vector.shape_cast %90 : vector<2x1x128xbf16> to vector<2x128xbf16>
    %92 = vector.extract_strided_slice %51 {offsets = [0, 20, 0], sizes = [2, 1, 128], strides = [1, 1, 1]} : vector<2x64x128xbf16> to vector<2x1x128xbf16>
    %93 = vector.shape_cast %92 : vector<2x1x128xbf16> to vector<2x128xbf16>
    %94 = vector.extract_strided_slice %51 {offsets = [0, 21, 0], sizes = [2, 1, 128], strides = [1, 1, 1]} : vector<2x64x128xbf16> to vector<2x1x128xbf16>
    %95 = vector.shape_cast %94 : vector<2x1x128xbf16> to vector<2x128xbf16>
    %96 = vector.extract_strided_slice %51 {offsets = [0, 22, 0], sizes = [2, 1, 128], strides = [1, 1, 1]} : vector<2x64x128xbf16> to vector<2x1x128xbf16>
    %97 = vector.shape_cast %96 : vector<2x1x128xbf16> to vector<2x128xbf16>
    %98 = vector.extract_strided_slice %51 {offsets = [0, 23, 0], sizes = [2, 1, 128], strides = [1, 1, 1]} : vector<2x64x128xbf16> to vector<2x1x128xbf16>
    %99 = vector.shape_cast %98 : vector<2x1x128xbf16> to vector<2x128xbf16>
    %100 = vector.extract_strided_slice %51 {offsets = [0, 24, 0], sizes = [2, 1, 128], strides = [1, 1, 1]} : vector<2x64x128xbf16> to vector<2x1x128xbf16>
    %101 = vector.shape_cast %100 : vector<2x1x128xbf16> to vector<2x128xbf16>
    %102 = vector.extract_strided_slice %51 {offsets = [0, 25, 0], sizes = [2, 1, 128], strides = [1, 1, 1]} : vector<2x64x128xbf16> to vector<2x1x128xbf16>
    %103 = vector.shape_cast %102 : vector<2x1x128xbf16> to vector<2x128xbf16>
    %104 = vector.extract_strided_slice %51 {offsets = [0, 26, 0], sizes = [2, 1, 128], strides = [1, 1, 1]} : vector<2x64x128xbf16> to vector<2x1x128xbf16>
    %105 = vector.shape_cast %104 : vector<2x1x128xbf16> to vector<2x128xbf16>
    %106 = vector.extract_strided_slice %51 {offsets = [0, 27, 0], sizes = [2, 1, 128], strides = [1, 1, 1]} : vector<2x64x128xbf16> to vector<2x1x128xbf16>
    %107 = vector.shape_cast %106 : vector<2x1x128xbf16> to vector<2x128xbf16>
    %108 = vector.extract_strided_slice %51 {offsets = [0, 28, 0], sizes = [2, 1, 128], strides = [1, 1, 1]} : vector<2x64x128xbf16> to vector<2x1x128xbf16>
    %109 = vector.shape_cast %108 : vector<2x1x128xbf16> to vector<2x128xbf16>
    %110 = vector.extract_strided_slice %51 {offsets = [0, 29, 0], sizes = [2, 1, 128], strides = [1, 1, 1]} : vector<2x64x128xbf16> to vector<2x1x128xbf16>
    %111 = vector.shape_cast %110 : vector<2x1x128xbf16> to vector<2x128xbf16>
    %112 = vector.extract_strided_slice %51 {offsets = [0, 30, 0], sizes = [2, 1, 128], strides = [1, 1, 1]} : vector<2x64x128xbf16> to vector<2x1x128xbf16>
    %113 = vector.shape_cast %112 : vector<2x1x128xbf16> to vector<2x128xbf16>
    %114 = vector.extract_strided_slice %51 {offsets = [0, 31, 0], sizes = [2, 1, 128], strides = [1, 1, 1]} : vector<2x64x128xbf16> to vector<2x1x128xbf16>
    %115 = vector.shape_cast %114 : vector<2x1x128xbf16> to vector<2x128xbf16>
    %116 = vector.extract_strided_slice %51 {offsets = [0, 32, 0], sizes = [2, 1, 128], strides = [1, 1, 1]} : vector<2x64x128xbf16> to vector<2x1x128xbf16>
    %117 = vector.shape_cast %116 : vector<2x1x128xbf16> to vector<2x128xbf16>
    %118 = vector.extract_strided_slice %51 {offsets = [0, 33, 0], sizes = [2, 1, 128], strides = [1, 1, 1]} : vector<2x64x128xbf16> to vector<2x1x128xbf16>
    %119 = vector.shape_cast %118 : vector<2x1x128xbf16> to vector<2x128xbf16>
    %120 = vector.extract_strided_slice %51 {offsets = [0, 34, 0], sizes = [2, 1, 128], strides = [1, 1, 1]} : vector<2x64x128xbf16> to vector<2x1x128xbf16>
    %121 = vector.shape_cast %120 : vector<2x1x128xbf16> to vector<2x128xbf16>
    %122 = vector.extract_strided_slice %51 {offsets = [0, 35, 0], sizes = [2, 1, 128], strides = [1, 1, 1]} : vector<2x64x128xbf16> to vector<2x1x128xbf16>
    %123 = vector.shape_cast %122 : vector<2x1x128xbf16> to vector<2x128xbf16>
    %124 = vector.extract_strided_slice %51 {offsets = [0, 36, 0], sizes = [2, 1, 128], strides = [1, 1, 1]} : vector<2x64x128xbf16> to vector<2x1x128xbf16>
    %125 = vector.shape_cast %124 : vector<2x1x128xbf16> to vector<2x128xbf16>
    %126 = vector.extract_strided_slice %51 {offsets = [0, 37, 0], sizes = [2, 1, 128], strides = [1, 1, 1]} : vector<2x64x128xbf16> to vector<2x1x128xbf16>
    %127 = vector.shape_cast %126 : vector<2x1x128xbf16> to vector<2x128xbf16>
    %128 = vector.extract_strided_slice %51 {offsets = [0, 38, 0], sizes = [2, 1, 128], strides = [1, 1, 1]} : vector<2x64x128xbf16> to vector<2x1x128xbf16>
    %129 = vector.shape_cast %128 : vector<2x1x128xbf16> to vector<2x128xbf16>
    %130 = vector.extract_strided_slice %51 {offsets = [0, 39, 0], sizes = [2, 1, 128], strides = [1, 1, 1]} : vector<2x64x128xbf16> to vector<2x1x128xbf16>
    %131 = vector.shape_cast %130 : vector<2x1x128xbf16> to vector<2x128xbf16>
    %132 = vector.extract_strided_slice %51 {offsets = [0, 40, 0], sizes = [2, 1, 128], strides = [1, 1, 1]} : vector<2x64x128xbf16> to vector<2x1x128xbf16>
    %133 = vector.shape_cast %132 : vector<2x1x128xbf16> to vector<2x128xbf16>
    %134 = vector.extract_strided_slice %51 {offsets = [0, 41, 0], sizes = [2, 1, 128], strides = [1, 1, 1]} : vector<2x64x128xbf16> to vector<2x1x128xbf16>
    %135 = vector.shape_cast %134 : vector<2x1x128xbf16> to vector<2x128xbf16>
    %136 = vector.extract_strided_slice %51 {offsets = [0, 42, 0], sizes = [2, 1, 128], strides = [1, 1, 1]} : vector<2x64x128xbf16> to vector<2x1x128xbf16>
    %137 = vector.shape_cast %136 : vector<2x1x128xbf16> to vector<2x128xbf16>
    %138 = vector.extract_strided_slice %51 {offsets = [0, 43, 0], sizes = [2, 1, 128], strides = [1, 1, 1]} : vector<2x64x128xbf16> to vector<2x1x128xbf16>
    %139 = vector.shape_cast %138 : vector<2x1x128xbf16> to vector<2x128xbf16>
    %140 = vector.extract_strided_slice %51 {offsets = [0, 44, 0], sizes = [2, 1, 128], strides = [1, 1, 1]} : vector<2x64x128xbf16> to vector<2x1x128xbf16>
    %141 = vector.shape_cast %140 : vector<2x1x128xbf16> to vector<2x128xbf16>
    %142 = vector.extract_strided_slice %51 {offsets = [0, 45, 0], sizes = [2, 1, 128], strides = [1, 1, 1]} : vector<2x64x128xbf16> to vector<2x1x128xbf16>
    %143 = vector.shape_cast %142 : vector<2x1x128xbf16> to vector<2x128xbf16>
    %144 = vector.extract_strided_slice %51 {offsets = [0, 46, 0], sizes = [2, 1, 128], strides = [1, 1, 1]} : vector<2x64x128xbf16> to vector<2x1x128xbf16>
    %145 = vector.shape_cast %144 : vector<2x1x128xbf16> to vector<2x128xbf16>
    %146 = vector.extract_strided_slice %51 {offsets = [0, 47, 0], sizes = [2, 1, 128], strides = [1, 1, 1]} : vector<2x64x128xbf16> to vector<2x1x128xbf16>
    %147 = vector.shape_cast %146 : vector<2x1x128xbf16> to vector<2x128xbf16>
    %148 = vector.extract_strided_slice %51 {offsets = [0, 48, 0], sizes = [2, 1, 128], strides = [1, 1, 1]} : vector<2x64x128xbf16> to vector<2x1x128xbf16>
    %149 = vector.shape_cast %148 : vector<2x1x128xbf16> to vector<2x128xbf16>
    %150 = vector.extract_strided_slice %51 {offsets = [0, 49, 0], sizes = [2, 1, 128], strides = [1, 1, 1]} : vector<2x64x128xbf16> to vector<2x1x128xbf16>
    %151 = vector.shape_cast %150 : vector<2x1x128xbf16> to vector<2x128xbf16>
    %152 = vector.extract_strided_slice %51 {offsets = [0, 50, 0], sizes = [2, 1, 128], strides = [1, 1, 1]} : vector<2x64x128xbf16> to vector<2x1x128xbf16>
    %153 = vector.shape_cast %152 : vector<2x1x128xbf16> to vector<2x128xbf16>
    %154 = vector.extract_strided_slice %51 {offsets = [0, 51, 0], sizes = [2, 1, 128], strides = [1, 1, 1]} : vector<2x64x128xbf16> to vector<2x1x128xbf16>
    %155 = vector.shape_cast %154 : vector<2x1x128xbf16> to vector<2x128xbf16>
    %156 = vector.extract_strided_slice %51 {offsets = [0, 52, 0], sizes = [2, 1, 128], strides = [1, 1, 1]} : vector<2x64x128xbf16> to vector<2x1x128xbf16>
    %157 = vector.shape_cast %156 : vector<2x1x128xbf16> to vector<2x128xbf16>
    %158 = vector.extract_strided_slice %51 {offsets = [0, 53, 0], sizes = [2, 1, 128], strides = [1, 1, 1]} : vector<2x64x128xbf16> to vector<2x1x128xbf16>
    %159 = vector.shape_cast %158 : vector<2x1x128xbf16> to vector<2x128xbf16>
    %160 = vector.extract_strided_slice %51 {offsets = [0, 54, 0], sizes = [2, 1, 128], strides = [1, 1, 1]} : vector<2x64x128xbf16> to vector<2x1x128xbf16>
    %161 = vector.shape_cast %160 : vector<2x1x128xbf16> to vector<2x128xbf16>
    %162 = vector.extract_strided_slice %51 {offsets = [0, 55, 0], sizes = [2, 1, 128], strides = [1, 1, 1]} : vector<2x64x128xbf16> to vector<2x1x128xbf16>
    %163 = vector.shape_cast %162 : vector<2x1x128xbf16> to vector<2x128xbf16>
    %164 = vector.extract_strided_slice %51 {offsets = [0, 56, 0], sizes = [2, 1, 128], strides = [1, 1, 1]} : vector<2x64x128xbf16> to vector<2x1x128xbf16>
    %165 = vector.shape_cast %164 : vector<2x1x128xbf16> to vector<2x128xbf16>
    %166 = vector.extract_strided_slice %51 {offsets = [0, 57, 0], sizes = [2, 1, 128], strides = [1, 1, 1]} : vector<2x64x128xbf16> to vector<2x1x128xbf16>
    %167 = vector.shape_cast %166 : vector<2x1x128xbf16> to vector<2x128xbf16>
    %168 = vector.extract_strided_slice %51 {offsets = [0, 58, 0], sizes = [2, 1, 128], strides = [1, 1, 1]} : vector<2x64x128xbf16> to vector<2x1x128xbf16>
    %169 = vector.shape_cast %168 : vector<2x1x128xbf16> to vector<2x128xbf16>
    %170 = vector.extract_strided_slice %51 {offsets = [0, 59, 0], sizes = [2, 1, 128], strides = [1, 1, 1]} : vector<2x64x128xbf16> to vector<2x1x128xbf16>
    %171 = vector.shape_cast %170 : vector<2x1x128xbf16> to vector<2x128xbf16>
    %172 = vector.extract_strided_slice %51 {offsets = [0, 60, 0], sizes = [2, 1, 128], strides = [1, 1, 1]} : vector<2x64x128xbf16> to vector<2x1x128xbf16>
    %173 = vector.shape_cast %172 : vector<2x1x128xbf16> to vector<2x128xbf16>
    %174 = vector.extract_strided_slice %51 {offsets = [0, 61, 0], sizes = [2, 1, 128], strides = [1, 1, 1]} : vector<2x64x128xbf16> to vector<2x1x128xbf16>
    %175 = vector.shape_cast %174 : vector<2x1x128xbf16> to vector<2x128xbf16>
    %176 = vector.extract_strided_slice %51 {offsets = [0, 62, 0], sizes = [2, 1, 128], strides = [1, 1, 1]} : vector<2x64x128xbf16> to vector<2x1x128xbf16>
    %177 = vector.shape_cast %176 : vector<2x1x128xbf16> to vector<2x128xbf16>
    %178 = vector.extract_strided_slice %51 {offsets = [0, 63, 0], sizes = [2, 1, 128], strides = [1, 1, 1]} : vector<2x64x128xbf16> to vector<2x1x128xbf16>
    %179 = vector.shape_cast %178 : vector<2x1x128xbf16> to vector<2x128xbf16>
    %180 = tpu.concatenate %53, %55, %57, %59, %61, %63, %65, %67, %69, %71, %73, %75, %77, %79, %81, %83 in 1 : vector<2x128xbf16>, vector<2x128xbf16>, vector<2x128xbf16>, vector<2x128xbf16>, vector<2x128xbf16>, vector<2x128xbf16>, vector<2x128xbf16>, vector<2x128xbf16>, vector<2x128xbf16>, vector<2x128xbf16>, vector<2x128xbf16>, vector<2x128xbf16>, vector<2x128xbf16>, vector<2x128xbf16>, vector<2x128xbf16>, vector<2x128xbf16> -> vector<2x2048xbf16>
    %181 = tpu.concatenate %85, %87, %89, %91, %93, %95, %97, %99, %101, %103, %105, %107, %109, %111, %113, %115 in 1 : vector<2x128xbf16>, vector<2x128xbf16>, vector<2x128xbf16>, vector<2x128xbf16>, vector<2x128xbf16>, vector<2x128xbf16>, vector<2x128xbf16>, vector<2x128xbf16>, vector<2x128xbf16>, vector<2x128xbf16>, vector<2x128xbf16>, vector<2x128xbf16>, vector<2x128xbf16>, vector<2x128xbf16>, vector<2x128xbf16>, vector<2x128xbf16> -> vector<2x2048xbf16>
    %182 = tpu.concatenate %117, %119, %121, %123, %125, %127, %129, %131, %133, %135, %137, %139, %141, %143, %145, %147 in 1 : vector<2x128xbf16>, vector<2x128xbf16>, vector<2x128xbf16>, vector<2x128xbf16>, vector<2x128xbf16>, vector<2x128xbf16>, vector<2x128xbf16>, vector<2x128xbf16>, vector<2x128xbf16>, vector<2x128xbf16>, vector<2x128xbf16>, vector<2x128xbf16>, vector<2x128xbf16>, vector<2x128xbf16>, vector<2x128xbf16>, vector<2x128xbf16> -> vector<2x2048xbf16>
    %183 = tpu.concatenate %149, %151, %153, %155, %157, %159, %161, %163, %165, %167, %169, %171, %173, %175, %177, %179 in 1 : vector<2x128xbf16>, vector<2x128xbf16>, vector<2x128xbf16>, vector<2x128xbf16>, vector<2x128xbf16>, vector<2x128xbf16>, vector<2x128xbf16>, vector<2x128xbf16>, vector<2x128xbf16>, vector<2x128xbf16>, vector<2x128xbf16>, vector<2x128xbf16>, vector<2x128xbf16>, vector<2x128xbf16>, vector<2x128xbf16>, vector<2x128xbf16> -> vector<2x2048xbf16>
    %184 = tpu.concatenate %180, %181, %182, %183 in 1 : vector<2x2048xbf16>, vector<2x2048xbf16>, vector<2x2048xbf16>, vector<2x2048xbf16> -> vector<2x8192xbf16>
    %c0_13 = arith.constant 0 : index
    %c0_14 = arith.constant 0 : index
    %185 = vector.load %arg5[%c0_13, %c0_14] : memref<8192x128xbf16, #tpu.memory_space<vmem>>, vector<8192x128xbf16>
    %cst_15 = arith.constant dense<0.000000e+00> : vector<2x128xf32>
    %186 = tpu.matmul %184, %185, %cst_15 {dimension_numbers = #tpu.dot_dimension_numbers<[1], [0], [0], [1], [0, 0, 1, 1], [], []>} : vector<2x8192xbf16>, vector<8192x128xbf16>, vector<2x128xf32> -> vector<2x128xf32>
    %c0_16 = arith.constant 0 : index
    %c0_17 = arith.constant 0 : index
    %187 = vector.load %arg6[%c0_16, %c0_17] : memref<1x128xf32, #tpu.memory_space<vmem>>, vector<1x128xf32>
    %188 = vector.broadcast %187 : vector<1x128xf32> to vector<2x128xf32>
    %189 = arith.addf %186, %188 : vector<2x128xf32>
    %cst_18 = arith.constant 0.000000e+00 : f32
    %190 = vector.broadcast %cst_18 : f32 to vector<2x128xf32>
    %191 = arith.maximumf %189, %190 : vector<2x128xf32>
    %192 = arith.truncf %191 : vector<2x128xf32> to vector<2x128xbf16>
    %c0_19 = arith.constant 0 : index
    %c0_20 = arith.constant 0 : index
    %193 = vector.load %arg7[%c0_19, %c0_20] : memref<128x128xbf16, #tpu.memory_space<vmem>>, vector<128x128xbf16>
    %cst_21 = arith.constant dense<0.000000e+00> : vector<2x128xf32>
    %194 = tpu.matmul %192, %193, %cst_21 {dimension_numbers = #tpu.dot_dimension_numbers<[1], [0], [0], [1], [0, 0, 1, 1], [], []>} : vector<2x128xbf16>, vector<128x128xbf16>, vector<2x128xf32> -> vector<2x128xf32>
    %c0_22 = arith.constant 0 : index
    %c0_23 = arith.constant 0 : index
    %195 = vector.load %arg8[%c0_22, %c0_23] : memref<1x128xf32, #tpu.memory_space<vmem>>, vector<1x128xf32>
    %196 = vector.broadcast %195 : vector<1x128xf32> to vector<2x128xf32>
    %197 = arith.addf %194, %196 : vector<2x128xf32>
    %c0_24 = arith.constant 0 : index
    %c0_25 = arith.constant 0 : index
    %198 = vector.load %arg9[%c0_24, %c0_25] : memref<2x128xf32, #tpu.memory_space<vmem>>, vector<2x128xf32>
    tpu.vector_store %arg9[%c0_24, %c0_25], %197 {strides = array<i32>} : memref<2x128xf32, #tpu.memory_space<vmem>>, vector<2x128xf32>,
    return
  }
}

</mosaic_0001>

<bundles_post_ra>
// kernel: tpu_custom_call.1
= control target key start
LH: loop header
LB: loop body
LE: loop exit
PB: predicated region body
PF: predicated region fallthrough
CT: control target
= control target key end

     0   :  { %14 = vsyncpa [#allocation3], 0  ;;  %s9403_s0 = inlined_call_operand.hbm [shape: f32[2,128], index: 0, kind: input, shape index: {}]   ;;  %s9404_s1 = inlined_call_operand.vmem [shape: f32[32,3], index: 1, kind: input, shape index: {}]   ;;  %s9405_s2 = inlined_call_operand.vmem [shape: f32[32,1], index: 2, kind: input, shape index: {}]   ;;  %s9406_s3 = inlined_call_operand.hbm [shape: bf16[64,96], index: 3, kind: input, shape index: {}]   ;;  %s9407_s4 = inlined_call_operand.vmem [shape: f32[64,1], index: 4, kind: input, shape index: {}]   ;;  %s9408_s5 = inlined_call_operand.hbm [shape: bf16[8192,128], index: 5, kind: input, shape index: {}]   ;;  %s9409_s6 = inlined_call_operand.hbm [shape: f32[1,128], index: 6, kind: input, shape index: {}]   ;;  %s9410_s7 = inlined_call_operand.hbm [shape: bf16[128,128], index: 7, kind: input, shape index: {}]   ;;  %s9411_s8 = inlined_call_operand.hbm [shape: f32[1,128], index: 8, kind: input, shape index: {}]   ;;  %s9412_s9 = inlined_call_operand.hbm [shape: f32[2,128], index: 9, kind: output, shape index: {}]  }
   0x1   :  { %15 = vsyncpa [#allocation6], 0 }
   0x2   :  { %16 = vsyncpa [#allocation9], 0 }
   0x3   :  { %17 = vsyncpa [#allocation12], 0  ;;  %s38_s11 = sshll.u32 %s9406_s3, 4  ;;  %s39_s11 = int_to_ptr.hbm [resolvable:$true] %s38_s11 }
   0x4   :  { %18 = vsyncpa [#allocation4], 0  ;;  %s8803_s12 = smov [#allocation5]   ;;  %s67_s16 = sshll.u32 %s9409_s6, 4  ;;  %s68_s16 = int_to_ptr.hbm [resolvable:$true] %s67_s16 }
   0x5   :  { %s40_s13 = sshll.u32 %s8803_s12, 4  ;;  %s8804_s17 = smov 64   ;;  %s41_s13 = int_to_ptr.vmem [resolvable:$true] %s40_s13 }
   0x6   :  { %s8805_s18 = smov 4   ;;  %s8806_s19 = smov [#allocation8]  }
   0x7   :  { %46 = dma.hbm_to_vmem [thread:$0]  %s39_s11, 512, %s41_s13, [#allocation6], %s8804_s17, %s8804_s17, %s8805_s18  }
   0x8   :  { %s69_s20 = sshll.u32 %s8806_s19, 4  ;;  %s24_s22 = sshll.u32 %s9403_s0, 4  ;;  %s70_s20 = int_to_ptr.vmem [resolvable:$true] %s69_s20  ;;  %s25_s22 = int_to_ptr.hbm [resolvable:$true] %s24_s22 }
   0x9   :  { %72 = dma.hbm_to_vmem [thread:$0]  %s68_s16, 16, %s70_s20, [#allocation9]  }
   0xa   :  { %s53_s6 = sshll.u32 %s9408_s5, 4  ;;  %s8807_s25 = smov [#allocation2]   ;;  %s54_s6 = int_to_ptr.hbm [resolvable:$true] %s53_s6 }
   0xb   :  { %s26_s26 = sshll.u32 %s8807_s25, 4  ;;  %s8808_s27 = smov [#allocation7]   ;;  %s27_s26 = int_to_ptr.vmem [resolvable:$true] %s26_s26 }
   0xc   :  { %29 = dma.hbm_to_vmem [thread:$0]  %s25_s22, 32, %s27_s26, [#allocation3]  }
   0xd   :  { %s55_s28 = sshll.u32 %s8808_s27, 4  ;;  %s77_s10 = sshll.u32 %s9410_s7, 4  ;;  %s56_s28 = int_to_ptr.vmem [resolvable:$true] %s55_s28  ;;  %s78_s10 = int_to_ptr.hbm [resolvable:$true] %s77_s10 }
   0xe   :  { %61 = dma.hbm_to_vmem [thread:$0]  %s54_s6, 65536, %s56_s28, [#allocation6], %s8804_s17, %s8804_s17, %s8805_s18  }
   0xf   :  { %s91_s5 = sshll.u32 %s9411_s8, 4  ;;  %s8809_s12 = smov [#allocation10]   ;;  %s92_s5 = int_to_ptr.hbm [resolvable:$true] %s91_s5 }
  0x10   :  { %s79_s13 = sshll.u32 %s8809_s12, 4  ;;  %s8810_s14 = smov [#allocation11]   ;;  %s80_s13 = int_to_ptr.vmem [resolvable:$true] %s79_s13 }
  0x11   :  { %85 = dma.hbm_to_vmem [thread:$0]  %s78_s10, 1024, %s80_s13, [#allocation9], %s8804_s17, %s8804_s17, %s8805_s18  }
  0x12   :  { %s93_s7 = sshll.u32 %s8810_s14, 4  ;;  %s94_s7 = int_to_ptr.vmem [resolvable:$true] %s93_s7 }
  0x13   :  { %96 = dma.hbm_to_vmem [thread:$0]  %s92_s5, 16, %s94_s7, [#allocation12]  }
  0x14   :  { %8793 = dma.done.wait [#allocation3], 32  }
  0x15   :  { %8794 = vsyncadd [#allocation3], 4294967264 }
  0x16   :  { %8795 = dma.done.wait [#allocation6], 66048  }
  0x17   :  { %8796 = vsyncadd [#allocation6], 4294901248 }
  0x18   :  { %8797 = dma.done.wait [#allocation9], 1040  }
  0x19   :  { %8798 = vsyncadd [#allocation9], 4294966256 }
  0x1a   :  { %8799 = dma.done.wait [#allocation12], 16  }
  0x1b   :  { %8800 = vsyncadd [#allocation12], 4294967280  ;;  %v8811_v0 = vmov 0   ;;  %v8812_v1 = vmov 1   ;;  %v8813_v2 = vmov 2   ;;  %v136_v3 = vld [vmem:[%s9404_s1 + $0x10] sm:$0xff] }
  0x1c   :  { %8610 = vset.pattern.permute.xlu1 %v8811_v0  ;;  %8611 = vset.pattern.permute.xlu2 %v8812_v1  ;;  %v122_v4 = vld [vmem:[#allocation2] sm:$0x3]  ;;  %s8814_s16 = smov 1   ;;  %v137_v5 = vld [vmem:[%s9404_s1 + $0x18] sm:$0xff]  ;;  %s8815_s19 = smov 127   ;;  %v135_v7 = vld [vmem:[%s9404_s1 + $0x8] sm:$0xff] }
  0x1d   :  { %8612 = vset.pattern.permute.xlu0 %v8813_v2  ;;  %152 = vperm.xlu1 %8610, %v136_v3   ;;  %v134_v6 = vld [vmem:[%s9404_s1] sm:$0xff]  ;;  %v249_v9 = vld [vmem:[%s9405_s2 + $0x10] sm:$0xff]  ;;  %v250_v10 = vld [vmem:[%s9405_s2 + $0x18] sm:$0xff]  ;;  %vm127_vm0 = vcmask 7168   ;;  %vm132_vm1 = vcmask 1039360   ;;  %v172_v23 = vrot.slane %v122_v4, 1 }
  0x1e   :  { %124 = vrot.lane.b32.xlu0 %v122_v4, %s8814_s16  ;;  %182 = vperm.xlu2 %8611, %v136_v3   ;;  %v247_v8 = vld [vmem:[%s9405_s2] sm:$0xff]  ;;  %v248_v11 = vld [vmem:[%s9405_s2 + $0x8] sm:$0xff]  ;;  %v189_v26 = vperm.slane %v122_v4, 0  ;;  %vm8958_vm2 = vmneg %vm127_vm0  ;;  %vm436_vm3 = vcmask 785408   ;;  %vm548_vm4 = vcmask 1041409   ;;  %s5931_s3 = sshll.u32 %s9412_s9, 4  ;;  %s5932_s3 = int_to_ptr.hbm [resolvable:$true] %s5931_s3 }
  0x1f   :  { %v190_v27 = vperm.slane %v172_v23, 0 }
  0x25   :  { %157 = vperm.xlu1 %8610, %v137_v5  }
  0x26   :  { %129 = vrot.lane.b32.xlu0 %v122_v4, %s8815_s19  ;;  %186 = vperm.xlu2 %8611, %v137_v5  }
  0x2d   :  { %8613 = vset.pattern.permute.xlu1 %v8813_v2 }
  0x2e   :  { %220 = vperm.xlu0 %8612, %v136_v3   ;;  %8614 = vset.pattern.permute.xlu2 %v8811_v0 }
  0x2f   :  { %224 = vperm.xlu1 %8613, %v137_v5   ;;  %142 = vperm.xlu2 %8614, %v134_v6  }
  0x36   :  { %8617 = vset.pattern.permute.xlu0 %v8812_v1 }
  0x37   :  { %8615 = vset.pattern.permute.xlu1 %v8811_v0  ;;  %178 = vperm.xlu0 %8617, %v135_v7  }
  0x38   :  { %147 = vperm.xlu1 %8615, %v135_v7   ;;  %8616 = vset.pattern.permute.xlu2 %v8812_v1 }
  0x39   :  { %174 = vperm.xlu2 %8616, %v134_v6  }
  0x3f   :  { %8622 = vset.pattern.permute.xlu0 %v8811_v0 }
  0x40   :  { %8618 = vset.pattern.permute.xlu1 %v8813_v2  ;;  %253 = vperm.xlu0 %8622, %v247_v8  }
  0x41   :  { %212 = vperm.xlu1 %8618, %v134_v6   ;;  %8619 = vset.pattern.permute.xlu2 %v8813_v2 }
  0x42   :  { %216 = vperm.xlu2 %8619, %v135_v7  }
  0x49   :  { %8620 = vset.pattern.permute.xlu1 %v8811_v0 }
  0x4a   :  { %263 = vperm.xlu1 %8620, %v249_v9   ;;  %8621 = vset.pattern.permute.xlu2 %v8811_v0 }
  0x4b   :  { %268 = vperm.xlu2 %8621, %v250_v10  }
  0x52   :  { %258 = vperm.xlu1 %8620, %v248_v11  }
  0x78   :  { %v183_v12 = vpop.permute.xlu2 %182 }
  0x79   :  { %v195_v46 = vmul.f32 %v189_v26, %v183_v12  ;;  %v199_v47 = vmul.f32 %v190_v27, %v183_v12 }
  0x80   :  { %v187_v13 = vpop.permute.xlu2 %186 }
  0x81   :  { %v196_v37 = vmul.f32 %v189_v26, %v187_v13  ;;  %v200_v38 = vmul.f32 %v190_v27, %v187_v13 }
  0x89   :  { %v143_v15 = vpop.permute.xlu2 %142 }
  0x8f   :  { %v153_v14 = vpop.permute.xlu1 %152 }
  0x90   :  { %v125_v16 = vpop.permute.xlu0 %124 }
  0x91   :  { %v128_v21 = vsel %vm127_vm0, 0.0, %v125_v16 }
  0x92   :  { %v139_v24 = vrot.slane %v128_v21, 1  ;;  %v160_v29 = vperm.slane %v128_v21, 0 }
  0x93   :  { %v175_v18 = vpop.permute.xlu2 %174 }
  0x94   :  { %v161_v30 = vperm.slane %v139_v24, 0  ;;  %v164_v49 = vmul.f32 %v160_v29, %v143_v15  ;;  %v193_v50 = vmul.f32 %v189_v26, %v175_v18  ;;  %v197_v51 = vmul.f32 %v190_v27, %v175_v18 }
  0x95   :  { %v166_v53 = vmul.f32 %v160_v29, %v153_v14 }
  0x96   :  { %v168_v54 = vmul.f32 %v161_v30, %v143_v15  ;;  %v170_v57 = vmul.f32 %v161_v30, %v153_v14  ;;  %v201_v62 = vadd.f32 %v193_v50, %v164_v49 }
  0x97   :  { %v158_v17 = vpop.permute.xlu1 %157  ;;  %v203_v63 = vadd.f32 %v195_v46, %v166_v53  ;;  %v370_v53 = vld [vmem:[%s9407_s4 + $0x10] sm:$0xff] }
  0x98   :  { %v130_v19 = vpop.permute.xlu0 %129  ;;  %v167_v34 = vmul.f32 %v160_v29, %v158_v17  ;;  %v171_v35 = vmul.f32 %v161_v30, %v158_v17  ;;  %v205_v0 = vadd.f32 %v197_v51, %v168_v54  ;;  %v207_v3 = vadd.f32 %v199_v47, %v170_v57  ;;  %v369_v54 = vld [vmem:[%s9407_s4 + $0x8] sm:$0xff]  ;;  %v372_v57 = vld [vmem:[%s9407_s4 + $0x20] sm:$0xff] }
  0x99   :  { %v133_v22 = vsel %vm132_vm1, %v130_v19, 0.0 }
  0x9a   :  { %v210_v25 = vrot.slane %v133_v22, 1  ;;  %v227_v31 = vperm.slane %v133_v22, 0  ;;  %v204_v41 = vadd.f32 %v196_v37, %v167_v34  ;;  %v208_v42 = vadd.f32 %v200_v38, %v171_v35 }
  0x9c   :  { %v217_v28 = vpop.permute.xlu2 %216  ;;  %v228_v32 = vperm.slane %v210_v25, 0 }
  0x9d   :  { %v232_v14 = vmul.f32 %v227_v31, %v217_v28 }
  0x9e   :  { %v236_v15 = vmul.f32 %v228_v32, %v217_v28 }
  0xa0   :  { %v221_v36 = vpop.permute.xlu0 %220 }
  0xa1   :  { %v225_v20 = vpop.permute.xlu1 %224  ;;  %v233_v58 = vmul.f32 %v227_v31, %v221_v36  ;;  %v237_v59 = vmul.f32 %v228_v32, %v221_v36 }
  0xa2   :  { %v234_v39 = vmul.f32 %v227_v31, %v225_v20  ;;  %v238_v40 = vmul.f32 %v228_v32, %v225_v20 }
  0xa3   :  { %v241_v10 = vadd.f32 %v233_v58, %v203_v63  ;;  %v245_v11 = vadd.f32 %v237_v59, %v207_v3  ;;  %v371_v58 = vld [vmem:[%s9407_s4 + $0x18] sm:$0xff] }
  0xa4   :  { %v242_v43 = vadd.f32 %v234_v39, %v204_v41  ;;  %v246_v44 = vadd.f32 %v238_v40, %v208_v42  ;;  %v375_v59 = vld [vmem:[%s9407_s4 + $0x38] sm:$0xff] }
  0xa5   :  { %v269_v45 = vpop.permute.xlu2 %268  ;;  %v8102_v3 = vld [vmem:[#allocation7 + $0xd0] sm:$0xff] }
  0xa6   :  { %v274_v55 = vadd.f32 %v269_v45, %v242_v43  ;;  %v278_v56 = vadd.f32 %v269_v45, %v246_v44 }
  0xa8   :  { %v282_v1 = vmax.f32 %v274_v55, 0.0  ;;  %v286_v2 = vmax.f32 %v278_v56, 0.0  ;;  %v368_v55 = vld [vmem:[%s9407_s4] sm:$0xff]  ;;  %v373_v56 = vld [vmem:[%s9407_s4 + $0x28] sm:$0xff] }
  0xa9   :  { %v179_v52 = vpop.permute.xlu0 %178 }
  0xaa   :  { %v148_v33 = vpop.permute.xlu1 %147  ;;  %v194_v6 = vmul.f32 %v189_v26, %v179_v52  ;;  %v198_v7 = vmul.f32 %v190_v27, %v179_v52  ;;  %v290_v18 = vpack.c.bf16 %v282_v1, %v282_v1  ;;  %v294_v19 = vpack.c.bf16 %v286_v2, %v286_v2 }
  0xab   :  { %v165_v4 = vmul.f32 %v160_v29, %v148_v33  ;;  %v169_v5 = vmul.f32 %v161_v30, %v148_v33 }
  0xac   :  { %v306_v29 = vunpack.c.l.b16 %v290_v18  ;;  %v310_v30 = vunpack.c.l.b16 %v294_v19  ;;  %v8074_v18 = vld [vmem:[#allocation5 + $0x10] sm:$0xff] }
  0xad   :  { %v202_v20 = vadd.f32 %v194_v6, %v165_v4  ;;  %v206_v21 = vadd.f32 %v198_v7, %v169_v5  ;;  %v8114_v19 = vld [vmem:[#allocation7 + $0x130] sm:$0xff] }
  0xaf   :  { %v240_v33 = vadd.f32 %v232_v14, %v202_v20  ;;  %v244_v34 = vadd.f32 %v236_v15, %v206_v21  ;;  %v8115_v14 = vld [vmem:[#allocation7 + $0x138] sm:$0xff]  ;;  %v8122_v20 = vld [vmem:[#allocation7 + $0x170] sm:$0xff]  ;;  %v8081_v21 = vld [vmem:[#allocation7 + $0x28] sm:$0xff] }
  0xb0   :  { %v8123_v15 = vld [vmem:[#allocation7 + $0x178] sm:$0xff] }
  0xb2   :  { %v254_v12 = vpop.permute.xlu0 %253 }
  0xb3   :  { %v213_v48 = vpop.permute.xlu1 %212 }
  0xb4   :  { %v231_v60 = vmul.f32 %v227_v31, %v213_v48  ;;  %v235_v61 = vmul.f32 %v228_v32, %v213_v48 }
  0xb6   :  { %v239_v8 = vadd.f32 %v231_v60, %v201_v62  ;;  %v243_v9 = vadd.f32 %v235_v61, %v205_v0  ;;  %v374_v60 = vld [vmem:[%s9407_s4 + $0x30] sm:$0xff]  ;;  %s8816_s4 = smov [#allocation13]  }
  0xb8   :  { %v271_v22 = vadd.f32 %v254_v12, %v239_v8  ;;  %v275_v23 = vadd.f32 %v254_v12, %v243_v9  ;;  %v8072_v8 = vld [vmem:[#allocation5] sm:$0xff]  ;;  %v8083_v12 = vld [vmem:[#allocation7 + $0x38] sm:$0xff] }
  0xb9   :  { %5008 = vmatpush.bf16.msra.mxu2 %v8083_v12  ;;  %v8140_v12 = vld [vmem:[#allocation7 + $0x200] sm:$0xff] }
  0xba   :  { %v279_v35 = vmax.f32 %v271_v22, 0.0  ;;  %v283_v36 = vmax.f32 %v275_v23, 0.0  ;;  %v8089_v22 = vld [vmem:[#allocation7 + $0x68] sm:$0xff] }
  0xbb   :  { %v8113_v23 = vld [vmem:[#allocation7 + $0x128] sm:$0xff] }
  0xbc   :  { %v264_v13 = vpop.permute.xlu1 %263  ;;  %v287_v41 = vpack.c.bf16 %v279_v35, %v279_v35  ;;  %v291_v42 = vpack.c.bf16 %v283_v36, %v283_v36  ;;  %v8119_v35 = vld [vmem:[#allocation7 + $0x158] sm:$0xff]  ;;  %v8078_v36 = vld [vmem:[#allocation7 + $0x10] sm:$0xff] }
  0xbd   :  { %v273_v16 = vadd.f32 %v264_v13, %v241_v10  ;;  %v277_v17 = vadd.f32 %v264_v13, %v245_v11  ;;  %v8073_v11 = vld [vmem:[#allocation5 + $0x8] sm:$0xff]  ;;  %v8091_v13 = vld [vmem:[#allocation7 + $0x78] sm:$0xff] }
  0xbe   :  { %v303_v47 = vunpack.c.l.b16 %v287_v41  ;;  %v307_v48 = vunpack.c.l.b16 %v291_v42  ;;  %5021 = vmatpush.bf16.msra.mxu3 %v8091_v13  ;;  %v8117_v41 = vld [vmem:[#allocation7 + $0x148] sm:$0xff]  ;;  %v8076_v42 = vld [vmem:[#allocation7] sm:$0xff] }
  0xbf   :  { %v281_v24 = vmax.f32 %v273_v16, 0.0  ;;  %v285_v25 = vmax.f32 %v277_v17, 0.0  ;;  %v8082_v16 = vld [vmem:[#allocation7 + $0x30] sm:$0xff]  ;;  %v8148_v13 = vld [vmem:[#allocation7 + $0x240] sm:$0xff] }
  0xc0   :  { %v8090_v17 = vld [vmem:[#allocation7 + $0x70] sm:$0xff]  ;;  %5009 = vmatpush.bf16.msra.mxu2 %v8082_v16 }
  0xc1   :  { %v289_v26 = vpack.c.bf16 %v281_v24, %v281_v24  ;;  %v293_v27 = vpack.c.bf16 %v285_v25, %v285_v25  ;;  %v8121_v24 = vld [vmem:[#allocation7 + $0x168] sm:$0xff]  ;;  %v8080_v25 = vld [vmem:[#allocation7 + $0x20] sm:$0xff] }
  0xc2   :  { %5022 = vmatpush.bf16.msra.mxu3 %v8090_v17 }
  0xc3   :  { %v305_v31 = vunpack.c.l.b16 %v289_v26  ;;  %v309_v28 = vunpack.c.l.b16 %v293_v27  ;;  %v8088_v26 = vld [vmem:[#allocation7 + $0x60] sm:$0xff] }
  0xc4   :  { %v259_v32 = vpop.permute.xlu1 %258  ;;  %5010 = vmatpush.bf16.msra.mxu2 %v8081_v21  ;;  %v8112_v27 = vld [vmem:[#allocation7 + $0x120] sm:$0xff] }
  0xc5   :  { %v272_v37 = vadd.f32 %v259_v32, %v240_v33  ;;  %v276_v38 = vadd.f32 %v259_v32, %v244_v34  ;;  %v312_v39 = vpack.c.b16 %v306_v29, %v305_v31  ;;  %v314_v40 = vpack.c.b16 %v310_v30, %v309_v28  ;;  %v8120_v29 = vld [vmem:[#allocation7 + $0x160] sm:$0xff]  ;;  %v8079_v30 = vld [vmem:[#allocation7 + $0x18] sm:$0xff]  ;;  %v8086_v31 = vld [vmem:[#allocation7 + $0x50] sm:$0xff] }
  0xc6   :  { %5023 = vmatpush.bf16.msra.mxu3 %v8089_v22  ;;  %v8087_v33 = vld [vmem:[#allocation7 + $0x58] sm:$0xff]  ;;  %v8110_v32 = vld [vmem:[#allocation7 + $0x110] sm:$0xff] }
  0xc7   :  { %v280_v43 = vmax.f32 %v272_v37, 0.0  ;;  %v284_v44 = vmax.f32 %v276_v38, 0.0  ;;  %338 = vrot.lane.b32.xlu1 %v312_v39, %s8815_s19  ;;  %342 = vrot.lane.b32.xlu2 %v314_v40, %s8815_s19  ;;  %v8111_v34 = vld [vmem:[#allocation7 + $0x118] sm:$0xff]  ;;  %v8118_v37 = vld [vmem:[#allocation7 + $0x150] sm:$0xff]  ;;  %v8077_v38 = vld [vmem:[#allocation7 + $0x8] sm:$0xff] }
  0xc8   :  { %5011 = vmatpush.bf16.msra.mxu2 %v8080_v25  ;;  %v8075_v28 = vld [vmem:[#allocation5 + $0x18] sm:$0xff] }
  0xc9   :  { %v288_v45 = vpack.c.bf16 %v280_v43, %v280_v43  ;;  %v292_v46 = vpack.c.bf16 %v284_v44, %v284_v44  ;;  %v8084_v43 = vld [vmem:[#allocation7 + $0x40] sm:$0xff]  ;;  %v8099_v44 = vld [vmem:[#allocation7 + $0xb8] sm:$0xff] }
  0xca   :  { %5024 = vmatpush.bf16.msra.mxu3 %v8088_v26 }
  0xcb   :  { %v304_v49 = vunpack.c.l.b16 %v288_v45  ;;  %v308_v50 = vunpack.c.l.b16 %v292_v46  ;;  %v8108_v45 = vld [vmem:[#allocation7 + $0x100] sm:$0xff] }
  0xcc   :  { %5012 = vmatpush.bf16.msra.mxu2 %v8079_v30  ;;  %v8116_v46 = vld [vmem:[#allocation7 + $0x140] sm:$0xff] }
  0xcd   :  { %v311_v51 = vpack.c.b16 %v304_v49, %v303_v47  ;;  %v313_v52 = vpack.c.b16 %v308_v50, %v307_v48  ;;  %v8107_v47 = vld [vmem:[#allocation7 + $0xf8] sm:$0xff]  ;;  %v8098_v50 = vld [vmem:[#allocation7 + $0xb0] sm:$0xff] }
  0xce   :  { %5025 = vmatpush.bf16.msra.mxu3 %v8087_v33  ;;  %v8147_v48 = vld [vmem:[#allocation7 + $0x238] sm:$0xff] }
  0xcf   :  { %336 = vrot.lane.b32.xlu0 %v311_v51, %s8815_s19  ;;  %321 = vrot.lane.b32.xlu1 %v314_v40, %s8814_s16  ;;  %v8155_v49 = vld [vmem:[#allocation7 + $0x278] sm:$0xff] }
  0xd0   :  { %340 = vrot.lane.b32.xlu2 %v313_v52, %s8815_s19  ;;  %5013 = vmatpush.bf16.msra.mxu2 %v8078_v36  ;;  %s5929_s19 = sshll.u32 %s8816_s4, 4  ;;  %s5930_s19 = int_to_ptr.vmem [resolvable:$true] %s5929_s19 }
  0xd2   :  { %5026 = vmatpush.bf16.msra.mxu3 %v8086_v31 }
  0xd4   :  { %5014 = vmatpush.bf16.msra.mxu2 %v8077_v38  ;;  %v8131_v38 = vld [vmem:[#allocation7 + $0x1b8] sm:$0xff] }
  0xd7   :  { %315 = vrot.lane.b32.xlu1 %v311_v51, %s8814_s16  ;;  %319 = vrot.lane.b32.xlu0 %v313_v52, %s8814_s16 }
  0xd8   :  { %317 = vrot.lane.b32.xlu2 %v312_v39, %s8814_s16  ;;  %5015 = vmatpush.bf16.msra.mxu2 %v8076_v42 }
  0xdc   :  { %5034 = vmatpush.bf16.msrb.mxu2 %v8099_v44 }
  0xdf   :  { %388 = vperm.xlu1 %8620, %v370_v53   ;;  %383 = vperm.xlu0 %8622, %v369_v54   ;;  %v8154_v53 = vld [vmem:[#allocation7 + $0x270] sm:$0xff]  ;;  %v8097_v54 = vld [vmem:[#allocation7 + $0xa8] sm:$0xff] }
  0xe0   :  { %378 = vperm.xlu2 %8621, %v368_v55   ;;  %5035 = vmatpush.bf16.msrb.mxu2 %v8098_v50  ;;  %v8105_v55 = vld [vmem:[#allocation7 + $0xe8] sm:$0xff] }
  0xe4   :  { %5036 = vmatpush.bf16.msrb.mxu2 %v8097_v54 }
  0xe7   :  { %403 = vperm.xlu1 %8620, %v373_v56   ;;  %398 = vperm.xlu0 %8622, %v372_v57   ;;  %v8145_v56 = vld [vmem:[#allocation7 + $0x228] sm:$0xff] }
  0xe8   :  { %393 = vperm.xlu2 %8621, %v371_v58   ;;  %v8153_v57 = vld [vmem:[#allocation7 + $0x268] sm:$0xff]  ;;  %v8096_v58 = vld [vmem:[#allocation7 + $0xa0] sm:$0xff] }
  0xe9   :  { %5037 = vmatpush.bf16.msrb.mxu2 %v8096_v58 }
  0xef   :  { %413 = vperm.xlu0 %8622, %v375_v59   ;;  %v8104_v59 = vld [vmem:[#allocation7 + $0xe0] sm:$0xff] }
  0xf0   :  { %408 = vperm.xlu2 %8621, %v374_v60   ;;  %v8144_v60 = vld [vmem:[#allocation7 + $0x220] sm:$0xff] }
 0x121   :  { %v343_v61 = vpop.permute.xlu2 %342 }
 0x122   :  { %v354_v62 = vsel %vm132_vm1, %v343_v61, 0  ;;  %v8152_v61 = vld [vmem:[#allocation7 + $0x260] sm:$0xff] }
 0x123   :  { %480 = vmatpush.bf16.msra.mxu1 %v354_v62  ;;  %v8095_v62 = vld [vmem:[#allocation7 + $0x98] sm:$0xff] }
 0x124   :  { %5038 = vmatpush.bf16.msrb.mxu2 %v8095_v62 }
 0x12a   :  { %v341_v63 = vpop.permute.xlu2 %340 }
 0x12b   :  { %v351_v0 = vsel %vm132_vm1, %v341_v63, 0  ;;  %v8103_v63 = vld [vmem:[#allocation7 + $0xd8] sm:$0xff] }
 0x12c   :  { %481 = vmatpush.bf16.msra.mxu1 %v351_v0  ;;  %v8143_v0 = vld [vmem:[#allocation7 + $0x218] sm:$0xff] }
 0x130   :  { %482 = vmatpush.bf16.msra.mxu1 %v314_v40  ;;  %v8109_v40 = vld [vmem:[#allocation7 + $0x108] sm:$0xff] }
 0x132   :  { %v318_v9 = vpop.permute.xlu2 %317 }
 0x134   :  { %483 = vmatpush.bf16.msra.mxu1 %v313_v52  ;;  %v8146_v52 = vld [vmem:[#allocation7 + $0x230] sm:$0xff] }
 0x139   :  { %v339_v1 = vpop.permute.xlu1 %338 }
 0x13a   :  { %v348_v2 = vsel %vm132_vm1, %v339_v1, 0  ;;  %v8151_v1 = vld [vmem:[#allocation7 + $0x258] sm:$0xff] }
 0x13b   :  { %451 = vmatpush.bf16.msra.mxu0 %v348_v2  ;;  %v8094_v2 = vld [vmem:[#allocation7 + $0x90] sm:$0xff] }
 0x13c   :  { %5039 = vmatpush.bf16.msrb.mxu2 %v8094_v2  ;;  %v8129_v2 = vld [vmem:[#allocation7 + $0x1a8] sm:$0xff] }
 0x141   :  { %v337_v4 = vpop.permute.xlu0 %336  ;;  %v322_v5 = vpop.permute.xlu1 %321 }
 0x142   :  { %5969 = vmatpush.bf16.msk.msra.mxu1 %vm8958_vm2, %v322_v5  ;;  %v345_v6 = vsel %vm132_vm1, %v337_v4, 0  ;;  %v8142_v4 = vld [vmem:[#allocation7 + $0x210] sm:$0xff] }
 0x143   :  { %452 = vmatpush.bf16.msra.mxu0 %v345_v6  ;;  %v8150_v5 = vld [vmem:[#allocation7 + $0x250] sm:$0xff]  ;;  %v8093_v6 = vld [vmem:[#allocation7 + $0x88] sm:$0xff] }
 0x144   :  { %5040 = vmatpush.bf16.msrb.mxu2 %v8093_v6 }
 0x147   :  { %453 = vmatpush.bf16.msra.mxu0 %v312_v39  ;;  %v8085_v39 = vld [vmem:[#allocation7 + $0x48] sm:$0xff] }
 0x148   :  { %5027 = vmatpush.bf16.msra.mxu3 %v8085_v39 }
 0x149   :  { %v320_v7 = vpop.permute.xlu0 %319  ;;  %v316_v10 = vpop.permute.xlu1 %315 }
 0x14a   :  { %5971 = vmatpush.bf16.msk.msra.mxu1 %vm8958_vm2, %v320_v7  ;;  %v8101_v7 = vld [vmem:[#allocation7 + $0xc8] sm:$0xff] }
 0x14b   :  { %454 = vmatpush.bf16.msra.mxu0 %v311_v51  ;;  %v8106_v51 = vld [vmem:[#allocation7 + $0xf0] sm:$0xff] }
 0x14c   :  { %5028 = vmatpush.bf16.msra.mxu3 %v8084_v43 }
 0x14d   :  { %5972 = vmatmul.msk.bf16.vlgmr.msra.gmra.mxu1 %vm436_vm3, %v8072_v8 }
 0x14e   :  { %5073 = vmatpush.bf16.msrb.mxu1 %v8123_v15 }
 0x14f   :  { %5961 = vmatpush.bf16.msk.msra.mxu0 %vm8958_vm2, %v318_v9  ;;  %v8149_v9 = vld [vmem:[#allocation7 + $0x248] sm:$0xff] }
 0x150   :  { %5047 = vmatpush.bf16.msrb.mxu3 %v8107_v47  ;;  %v8139_v47 = vld [vmem:[#allocation7 + $0x1f8] sm:$0xff] }
 0x152   :  { %5074 = vmatpush.bf16.msrb.mxu1 %v8122_v20 }
 0x153   :  { %5963 = vmatpush.bf16.msk.msra.mxu0 %vm8958_vm2, %v316_v10  ;;  %v8092_v10 = vld [vmem:[#allocation7 + $0x80] sm:$0xff] }
 0x154   :  { %5048 = vmatpush.bf16.msrb.mxu3 %v8106_v51  ;;  %5041 = vmatpush.bf16.msrb.mxu2 %v8092_v10 }
 0x156   :  { %5964 = vmatmul.msk.bf16.vlgmr.msra.gmra.mxu0 %vm436_vm3, %v8072_v8  ;;  %5075 = vmatpush.bf16.msrb.mxu1 %v8121_v24  ;;  %v8141_v8 = vld [vmem:[#allocation7 + $0x208] sm:$0xff]  ;;  %v384_v24 = vpop.permute.xlu0 %383 }
 0x157   :  { %5060 = vmatpush.bf16.msrb.mxu0 %v8115_v14  ;;  %v379_v14 = vpop.permute.xlu2 %378 }
 0x158   :  { %5049 = vmatpush.bf16.msrb.mxu3 %v8105_v55 }
 0x15a   :  { %5076 = vmatpush.bf16.msrb.mxu1 %v8120_v29 }
 0x15b   :  { %5061 = vmatpush.bf16.msrb.mxu0 %v8114_v19 }
 0x15c   :  { %5050 = vmatpush.bf16.msrb.mxu3 %v8104_v59 }
 0x15d   :  { %5973 = vmatmul.msk.bf16.gmra.mxu1 %vm436_vm3, %v8073_v11 }
 0x15e   :  { %5077 = vmatpush.bf16.msrb.mxu1 %v8119_v35 }
 0x15f   :  { %5062 = vmatpush.bf16.msrb.mxu0 %v8113_v23 }
 0x160   :  { %5051 = vmatpush.bf16.msrb.mxu3 %v8103_v63  ;;  %v8178_v63 = vld [vmem:[#allocation7 + $0x330] sm:$0xff] }
 0x162   :  { %5078 = vmatpush.bf16.msrb.mxu1 %v8118_v37 }
 0x163   :  { %5063 = vmatpush.bf16.msrb.mxu0 %v8112_v27 }
 0x164   :  { %5052 = vmatpush.bf16.msrb.mxu3 %v8102_v3 }
 0x166   :  { %5965 = vmatmul.msk.bf16.gmra.mxu0 %vm436_vm3, %v8073_v11  ;;  %5079 = vmatpush.bf16.msrb.mxu1 %v8117_v41  ;;  %v8100_v11 = vld [vmem:[#allocation7 + $0xc0] sm:$0xff] }
 0x167   :  { %5064 = vmatpush.bf16.msrb.mxu0 %v8111_v34 }
 0x168   :  { %5053 = vmatpush.bf16.msrb.mxu3 %v8101_v7  ;;  %v8177_v7 = vld [vmem:[#allocation7 + $0x328] sm:$0xff] }
 0x16a   :  { %5080 = vmatpush.bf16.msrb.mxu1 %v8116_v46 }
 0x16b   :  { %5065 = vmatpush.bf16.msrb.mxu0 %v8110_v32 }
 0x16c   :  { %5054 = vmatpush.bf16.msrb.mxu3 %v8100_v11 }
 0x16d   :  { %5974 = vmatmul.msk.bf16.gmra.mxu1 %vm436_vm3, %v8074_v18 }
 0x16e   :  { %5125 = vmatpush.bf16.msra.mxu1 %v8155_v49 }
 0x16f   :  { %5066 = vmatpush.bf16.msrb.mxu0 %v8109_v40 }
 0x172   :  { %5126 = vmatpush.bf16.msra.mxu1 %v8154_v53  ;;  %v8187_v53 = vld [vmem:[#allocation7 + $0x378] sm:$0xff] }
 0x173   :  { %5067 = vmatpush.bf16.msrb.mxu0 %v8108_v45 }
 0x176   :  { %5966 = vmatmul.msk.bf16.gmra.mxu0 %vm436_vm3, %v8074_v18  ;;  %5127 = vmatpush.bf16.msra.mxu1 %v8153_v57  ;;  %v389_v57 = vpop.permute.xlu1 %388 }
 0x177   :  { %5112 = vmatpush.bf16.msra.mxu0 %v8147_v48 }
 0x17a   :  { %5128 = vmatpush.bf16.msra.mxu1 %v8152_v61  ;;  %v8138_v61 = vld [vmem:[#allocation7 + $0x1f0] sm:$0xff] }
 0x17b   :  { %5113 = vmatpush.bf16.msra.mxu0 %v8146_v52  ;;  %v8179_v52 = vld [vmem:[#allocation7 + $0x338] sm:$0xff] }
 0x17d   :  { %5975 = vmatmul.msk.bf16.gmra.mxu1 %vm436_vm3, %v8075_v28 }
 0x17e   :  { %5129 = vmatpush.bf16.msra.mxu1 %v8151_v1 }
 0x17f   :  { %5114 = vmatpush.bf16.msra.mxu0 %v8145_v56  ;;  %v8130_v56 = vld [vmem:[#allocation7 + $0x1b0] sm:$0xff] }
 0x182   :  { %5130 = vmatpush.bf16.msra.mxu1 %v8150_v5  ;;  %v8137_v5 = vld [vmem:[#allocation7 + $0x1e8] sm:$0xff] }
 0x183   :  { %5115 = vmatpush.bf16.msra.mxu0 %v8144_v60 }
 0x186   :  { %5967 = vmatmul.msk.bf16.gmra.mxu0 %vm436_vm3, %v8075_v28  ;;  %5131 = vmatpush.bf16.msra.mxu1 %v8149_v9 }
 0x187   :  { %5116 = vmatpush.bf16.msra.mxu0 %v8143_v0  ;;  %v8186_v0 = vld [vmem:[#allocation7 + $0x370] sm:$0xff] }
 0x18a   :  { %5132 = vmatpush.bf16.msra.mxu1 %v8148_v13 }
 0x18b   :  { %5117 = vmatpush.bf16.msra.mxu0 %v8142_v4 }
 0x18f   :  { %5118 = vmatpush.bf16.msra.mxu0 %v8141_v8  ;;  %v8185_v8 = vld [vmem:[#allocation7 + $0x368] sm:$0xff] }
 0x193   :  { %5119 = vmatpush.bf16.msra.mxu0 %v8140_v12  ;;  %v8128_v12 = vld [vmem:[#allocation7 + $0x1a0] sm:$0xff] }
 0x1ca   :  { %v487_v15 = vpop.f32.mrf.mxu1 }
 0x1cb   :  { %v488_v16 = vadd.f32 %v487_v15, %v379_v14 }
 0x1cd   :  { %v515_v17 = vmax.f32 %v488_v16, 0.0 }
 0x1cf   :  { %v531_v18 = vpack.c.bf16 %v515_v17, %v515_v17  ;;  %v399_v17 = vpop.permute.xlu0 %398 }
 0x1d1   :  { %v542_v21 = vunpack.c.l.b16 %v531_v18 }
 0x1d2   :  { %v489_v19 = vpop.f32.mrf.mxu1 }
 0x1d3   :  { %v458_v20 = vpop.f32.mrf.mxu0  ;;  %v8979_v25 = vunpack.i.l.s16 %v542_v21  ;;  %v490_v27 = vadd.f32 %v489_v19, %v384_v24  ;;  %v8136_v19 = vld [vmem:[#allocation7 + $0x1e0] sm:$0xff] }
 0x1d4   :  { %v459_v22 = vadd.f32 %v458_v20, %v379_v14 }
 0x1d5   :  { %v547_v36 = vrot.slane %v8979_v25, 7  ;;  %v516_v31 = vmax.f32 %v490_v27, 0.0  ;;  %v567_v28 = vrot.slane %v8979_v25, 3  ;;  %v572_v43 = vrot.slane %v8979_v25, 4 }
 0x1d6   :  { %v507_v23 = vmax.f32 %v459_v22, 0.0  ;;  %v557_v15 = vrot.slane %v8979_v25, 1  ;;  %v562_v20 = vrot.slane %v8979_v25, 2 }
 0x1d7   :  { %v532_v48 = vpack.c.bf16 %v516_v31, %v516_v31 }
 0x1d8   :  { %v523_v26 = vpack.c.bf16 %v507_v23, %v507_v23  ;;  %v8176_v23 = vld [vmem:[#allocation7 + $0x320] sm:$0xff] }
 0x1d9   :  { %v589_v62 = vunpack.c.l.b16 %v532_v48 }
 0x1da   :  { %v541_v29 = vunpack.c.l.b16 %v523_v26  ;;  %v492_v30 = vpop.f32.mrf.mxu1 }
 0x1db   :  { %v460_v33 = vpop.f32.mrf.mxu0  ;;  %v493_v1 = vadd.f32 %v492_v30, %v389_v57  ;;  %v8999_v6 = vunpack.i.l.s16 %v589_v62 }
 0x1dc   :  { %v8981_v34 = vunpack.i.l.s16 %v541_v29  ;;  %v461_v35 = vadd.f32 %v460_v33, %v384_v24  ;;  %v8184_v24 = vld [vmem:[#allocation7 + $0x360] sm:$0xff] }
 0x1dd   :  { %v517_v10 = vmax.f32 %v493_v1, 0.0  ;;  %v594_v27 = vrot.slane %v8999_v6, 7  ;;  %v623_v29 = vrot.slane %v8999_v6, 5  ;;  %v8125_v1 = vld [vmem:[#allocation7 + $0x188] sm:$0xff] }
 0x1de   :  { %v508_v32 = vmax.f32 %v461_v35, 0.0  ;;  %v549_v37 = vsel %vm548_vm4, %v547_v36, %v8981_v34  ;;  %v552_v39 = vrot.slane %v8981_v34, 1  ;;  %v566_v40 = vrot.slane %v8981_v34, 4  ;;  %v8127_v35 = vld [vmem:[#allocation7 + $0x198] sm:$0xff] }
 0x1df   :  { %v550_v41 = vpack.c.b16 %v549_v37, %v549_v37  ;;  %v571_v42 = vrot.slane %v8981_v34, 5  ;;  %v556_v9 = vrot.slane %v8981_v34, 2  ;;  %v561_v13 = vrot.slane %v8981_v34, 3 }
 0x1e0   :  { %v524_v44 = vpack.c.bf16 %v508_v32, %v508_v32  ;;  %v553_v45 = vsel %vm548_vm4, %v8979_v25, %v552_v39  ;;  %v568_v46 = vsel %vm548_vm4, %v567_v28, %v566_v40  ;;  %v533_v30 = vpack.c.bf16 %v517_v10, %v517_v10  ;;  %v394_v32 = vpop.permute.xlu2 %393  ;;  %v8135_v39 = vld [vmem:[#allocation7 + $0x1d8] sm:$0xff] }
 0x1e1   :  { %5016 = vmatmul.bf16.vlgmr.msra.gmra.mxu2 %v550_v41  ;;  %v554_v49 = vpack.c.b16 %v553_v45, %v553_v45  ;;  %v569_v50 = vpack.c.b16 %v568_v46, %v568_v46  ;;  %v573_v51 = vsel %vm548_vm4, %v572_v43, %v571_v42  ;;  %v558_v26 = vsel %vm548_vm4, %v557_v15, %v556_v9  ;;  %v8175_v46 = vld [vmem:[#allocation7 + $0x318] sm:$0xff] }
 0x1e2   :  { %5086 = vmatpush.bf16.msra.mxu2 %v8131_v38  ;;  %v8995_v54 = vpop.f32.mrf.mxu1  ;;  %v574_v55 = vpack.c.b16 %v573_v51, %v573_v51  ;;  %v588_v58 = vunpack.c.l.b16 %v524_v44  ;;  %v563_v33 = vsel %vm548_vm4, %v562_v20, %v561_v13  ;;  %v559_v38 = vpack.c.b16 %v558_v26, %v558_v26  ;;  %v8181_v13 = vld [vmem:[#allocation7 + $0x348] sm:$0xff] }
 0x1e3   :  { %v463_v59 = vpop.f32.mrf.mxu0  ;;  %5029 = vmatmul.bf16.vlgmr.msra.gmra.mxu3 %v554_v49  ;;  %5068 = vmatmul.bf16.vlgmr.msrb.gmra.mxu0 %v569_v50  ;;  %v628_v41 = vrot.slane %v8999_v6, 6  ;;  %v495_v42 = vadd.f32 %v8995_v54, %v394_v32  ;;  %v564_v45 = vpack.c.b16 %v563_v33, %v563_v33  ;;  %v8183_v49 = vld [vmem:[#allocation7 + $0x358] sm:$0xff]  ;;  %v8126_v54 = vld [vmem:[#allocation7 + $0x190] sm:$0xff]  ;;  %v582_v20 = vrot.slane %v8979_v25, 6 }
 0x1e4   :  { %v464_v60 = vadd.f32 %v463_v59, %v389_v57  ;;  %5081 = vmatmul.bf16.vlgmr.msrb.gmra.mxu1 %v574_v55  ;;  %5099 = vmatpush.bf16.msra.mxu3 %v8139_v47  ;;  %v8997_v3 = vunpack.i.l.s16 %v588_v58  ;;  %v635_v47 = vunpack.c.l.b16 %v533_v30  ;;  %v8134_v57 = vld [vmem:[#allocation7 + $0x1d0] sm:$0xff] }
 0x1e5   :  { %5164 = vmatpush.bf16.msrb.mxu0 %v8179_v52  ;;  %5177 = vmatpush.bf16.msrb.mxu1 %v8187_v53  ;;  %v518_v58 = vmax.f32 %v495_v42, 0.0  ;;  %v8219_v42 = vld [vmem:[#allocation7 + $0x478] sm:$0xff] }
 0x1e6   :  { %5087 = vmatpush.bf16.msra.mxu2 %v8130_v56  ;;  %v509_v4 = vmax.f32 %v464_v60, 0.0  ;;  %v622_v16 = vrot.slane %v8997_v3, 6  ;;  %v598_v21 = vrot.slane %v8997_v3, 1  ;;  %v595_v36 = vsel %vm548_vm4, %v594_v27, %v8997_v3 }
 0x1e7   :  { %v627_v28 = vrot.slane %v8997_v3, 7  ;;  %v596_v48 = vpack.c.b16 %v595_v36, %v595_v36  ;;  %v9028_v62 = vunpack.i.l.s16 %v635_v47  ;;  %v613_v27 = vrot.slane %v8999_v6, 3  ;;  %v8172_v36 = vld [vmem:[#allocation7 + $0x300] sm:$0xff] }
 0x1e8   :  { %5100 = vmatpush.bf16.msra.mxu3 %v8138_v61  ;;  %v525_v18 = vpack.c.bf16 %v509_v4, %v509_v4  ;;  %v9014_v31 = vsel %vm548_vm4, %v623_v29, %v622_v16  ;;  %v599_v40 = vsel %vm548_vm4, %v8999_v6, %v598_v21  ;;  %v8174_v61 = vld [vmem:[#allocation7 + $0x310] sm:$0xff]  ;;  %v8133_v4 = vld [vmem:[#allocation7 + $0x1c8] sm:$0xff]  ;;  %v612_v21 = vrot.slane %v8997_v3, 4 }
 0x1e9   :  { %5165 = vmatpush.bf16.msrb.mxu0 %v8178_v63  ;;  %5178 = vmatpush.bf16.msrb.mxu1 %v8186_v0  ;;  %v9022_v50 = vsel %vm548_vm4, %v628_v41, %v627_v28  ;;  %v600_v53 = vpack.c.b16 %v599_v40, %v599_v40  ;;  %v8182_v0 = vld [vmem:[#allocation7 + $0x350] sm:$0xff]  ;;  %v669_v15 = vrot.slane %v9028_v62, 5  ;;  %v617_v29 = vrot.slane %v8997_v3, 5  ;;  %v8171_v28 = vld [vmem:[#allocation7 + $0x2f8] sm:$0xff]  ;;  %v409_v41 = vpop.permute.xlu2 %408 }
 0x1ea   :  { %5088 = vmatpush.bf16.msra.mxu2 %v8129_v2  ;;  %v497_v11 = vpop.f32.mrf.mxu1  ;;  %v634_v37 = vunpack.c.l.b16 %v525_v18  ;;  %v8124_v18 = vld [vmem:[#allocation7 + $0x180] sm:$0xff]  ;;  %v618_v40 = vrot.slane %v8999_v6, 4 }
 0x1eb   :  { %v465_v14 = vpop.f32.mrf.mxu0  ;;  %v498_v22 = vadd.f32 %v497_v11, %v399_v17  ;;  %v8173_v11 = vld [vmem:[#allocation7 + $0x308] sm:$0xff] }
 0x1ec   :  { %5101 = vmatpush.bf16.msra.mxu3 %v8137_v5  ;;  %v466_v44 = vadd.f32 %v465_v14, %v394_v32  ;;  %v9026_v55 = vunpack.i.l.s16 %v634_v37  ;;  %v576_v5 = vrot.slane %v8981_v34, 6  ;;  %v577_v14 = vrot.slane %v8979_v25, 5 }
 0x1ed   :  { %5166 = vmatpush.bf16.msrb.mxu0 %v8177_v7  ;;  %5179 = vmatpush.bf16.msrb.mxu1 %v8185_v8  ;;  %v519_v43 = vmax.f32 %v498_v22, 0.0  ;;  %v534_v8 = vpack.c.bf16 %v518_v58, %v518_v58  ;;  %v674_v22 = vrot.slane %v9028_v62, 6 }
 0x1ee   :  { %5089 = vmatpush.bf16.msra.mxu2 %v8128_v12  ;;  %v510_v60 = vmax.f32 %v466_v44, 0.0  ;;  %v668_v7 = vrot.slane %v9026_v55, 6  ;;  %v673_v16 = vrot.slane %v9026_v55, 7  ;;  %v578_v26 = vsel %vm548_vm4, %v577_v14, %v576_v5  ;;  %v8209_v14 = vld [vmem:[#allocation7 + $0x428] sm:$0xff] }
 0x1ef   :  { %v535_v59 = vpack.c.bf16 %v519_v43, %v519_v43  ;;  %v681_v33 = vunpack.c.l.b16 %v534_v8  ;;  %v614_v44 = vsel %vm548_vm4, %v613_v27, %v612_v21  ;;  %v579_v47 = vpack.c.b16 %v578_v26, %v578_v26  ;;  %v8161_v8 = vld [vmem:[#allocation7 + $0x2a8] sm:$0xff] }
 0x1f0   :  { %5102 = vmatpush.bf16.msra.mxu3 %v8136_v19  ;;  %v526_v10 = vpack.c.bf16 %v510_v60, %v510_v60  ;;  %v581_v19 = vrot.slane %v8981_v34, 7  ;;  %v9043_v30 = vsel %vm548_vm4, %v669_v15, %v668_v7  ;;  %v9048_v32 = vsel %vm548_vm4, %v674_v22, %v673_v16  ;;  %v8210_v60 = vld [vmem:[#allocation7 + $0x430] sm:$0xff] }
 0x1f1   :  { %5167 = vmatpush.bf16.msrb.mxu0 %v8176_v23  ;;  %5180 = vmatpush.bf16.msrb.mxu1 %v8184_v24  ;;  %v727_v9 = vunpack.c.l.b16 %v535_v59  ;;  %v8163_v23 = vld [vmem:[#allocation7 + $0x2b8] sm:$0xff]  ;;  %v8132_v24 = vld [vmem:[#allocation7 + $0x1c0] sm:$0xff]  ;;  %v615_v58 = vpack.c.b16 %v614_v44, %v614_v44  ;;  %v8170_v59 = vld [vmem:[#allocation7 + $0x2f0] sm:$0xff] }
 0x1f2   :  { %5042 = vmatmul.bf16.vlgmr.msrb.gmra.mxu2 %v559_v38  ;;  %v9024_v51 = vpop.f32.mrf.mxu1  ;;  %v680_v25 = vunpack.c.l.b16 %v526_v10  ;;  %v8180_v38 = vld [vmem:[#allocation7 + $0x340] sm:$0xff]  ;;  %v583_v43 = vsel %vm548_vm4, %v582_v20, %v581_v19  ;;  %v8217_v19 = vld [vmem:[#allocation7 + $0x468] sm:$0xff] }
 0x1f3   :  { %5090 = vmatpush.bf16.msra.mxu2 %v8127_v35  ;;  %v468_v52 = vpop.f32.mrf.mxu0  ;;  %5055 = vmatmul.bf16.vlgmr.msrb.gmra.mxu3 %v564_v45  ;;  %v9045_v34 = vunpack.i.l.s16 %v727_v9  ;;  %v404_v45 = vpop.permute.xlu1 %403 }
 0x1f4   :  { %v469_v56 = vadd.f32 %v468_v52, %v399_v17  ;;  %5103 = vmatpush.bf16.msra.mxu3 %v8135_v39  ;;  %5120 = vmatmul.bf16.vlgmr.msra.gmra.mxu0 %v596_v48  ;;  %v8211_v39 = vld [vmem:[#allocation7 + $0x438] sm:$0xff]  ;;  %v8162_v48 = vld [vmem:[#allocation7 + $0x2b0] sm:$0xff]  ;;  %v9056_v52 = vunpack.i.l.s16 %v681_v33 }
 0x1f5   :  { %5133 = vmatmul.bf16.vlgmr.msra.gmra.mxu1 %v600_v53  ;;  %5168 = vmatpush.bf16.msrb.mxu0 %v8175_v46  ;;  %v9058_v53 = vunpack.i.l.s16 %v680_v25  ;;  %v751_v21 = vrot.slane %v9045_v34, 3  ;;  %v756_v27 = vrot.slane %v9045_v34, 4 }
 0x1f6   :  { %v511_v63 = vmax.f32 %v469_v56, 0.0  ;;  %5181 = vmatpush.bf16.msrb.mxu1 %v8183_v49  ;;  %v619_v49 = vsel %vm548_vm4, %v618_v40, %v617_v29  ;;  %v732_v56 = vrot.slane %v9045_v34, 7  ;;  %v720_v16 = vrot.slane %v9056_v52, 6 }
 0x1f7   :  { %5091 = vmatpush.bf16.msra.mxu2 %v8126_v54  ;;  %v719_v15 = vrot.slane %v9058_v53, 7 }
 0x1f8   :  { %v527_v2 = vpack.c.bf16 %v511_v63, %v511_v63  ;;  %5104 = vmatpush.bf16.msra.mxu3 %v8134_v57  ;;  %v584_v57 = vpack.c.b16 %v583_v43, %v583_v43  ;;  %v500_v63 = vadd.f32 %v9024_v51, %v404_v45  ;;  %v714_v51 = vrot.slane %v9058_v53, 6 }
 0x1f9   :  { %5169 = vmatpush.bf16.msrb.mxu0 %v8174_v61  ;;  %v9082_v26 = vsel %vm548_vm4, %v720_v16, %v719_v15  ;;  %v746_v43 = vrot.slane %v9045_v34, 2  ;;  %v8214_v16 = vld [vmem:[#allocation7 + $0x450] sm:$0xff] }
 0x1fa   :  { %v726_v12 = vunpack.c.l.b16 %v527_v2  ;;  %5182 = vmatpush.bf16.msrb.mxu1 %v8182_v0  ;;  %v502_v35 = vpop.f32.mrf.mxu1  ;;  %v8218_v2 = vld [vmem:[#allocation7 + $0x470] sm:$0xff] }
 0x1fb   :  { %5092 = vmatpush.bf16.msra.mxu2 %v8125_v1  ;;  %v470_v17 = vpop.f32.mrf.mxu0  ;;  %v503_v46 = vadd.f32 %v502_v35, %v409_v41  ;;  %v620_v1 = vpack.c.b16 %v619_v49, %v619_v49 }
 0x1fc   :  { %5105 = vmatpush.bf16.msra.mxu3 %v8133_v4  ;;  %v9050_v37 = vunpack.i.l.s16 %v726_v12  ;;  %v471_v54 = vadd.f32 %v470_v17, %v404_v45 }
 0x1fd   :  { %5170 = vmatpush.bf16.msrb.mxu0 %v8173_v11  ;;  %v521_v5 = vmax.f32 %v503_v46, 0.0  ;;  %v715_v11 = vrot.slane %v9056_v52, 5  ;;  %v8159_v46 = vld [vmem:[#allocation7 + $0x298] sm:$0xff] }
 0x1fe   :  { %5183 = vmatpush.bf16.msrb.mxu1 %v8181_v13  ;;  %v736_v61 = vrot.slane %v9050_v37, 1  ;;  %v9065_v4 = vsel %vm548_vm4, %v732_v56, %v9050_v37  ;;  %v512_v10 = vmax.f32 %v471_v54, 0.0  ;;  %v8169_v13 = vld [vmem:[#allocation7 + $0x2e8] sm:$0xff]  ;;  %v750_v17 = vrot.slane %v9050_v37, 4 }
 0x1ff   :  { %5093 = vmatpush.bf16.msra.mxu2 %v8124_v18  ;;  %v520_v18 = vmax.f32 %v500_v63, 0.0  ;;  %v9077_v20 = vsel %vm548_vm4, %v715_v11, %v714_v51  ;;  %v755_v22 = vrot.slane %v9050_v37, 5  ;;  %v740_v25 = vrot.slane %v9050_v37, 2 }
 0x200   :  { %5106 = vmatpush.bf16.msra.mxu3 %v8132_v24  ;;  %v9069_v9 = vsel %vm548_vm4, %v9045_v34, %v736_v61  ;;  %v8160_v24 = vld [vmem:[#allocation7 + $0x2a0] sm:$0xff]  ;;  %v9086_v33 = vsel %vm548_vm4, %v751_v21, %v750_v17  ;;  %v528_v35 = vpack.c.bf16 %v512_v10, %v512_v10  ;;  %v760_v56 = vrot.slane %v9050_v37, 6  ;;  %v8158_v10 = vld [vmem:[#allocation7 + $0x290] sm:$0xff] }
 0x201   :  { %5171 = vmatpush.bf16.msrb.mxu0 %v8172_v36  ;;  %v8168_v36 = vld [vmem:[#allocation7 + $0x2e0] sm:$0xff]  ;;  %v536_v40 = vpack.c.bf16 %v520_v18, %v520_v18  ;;  %v761_v61 = vrot.slane %v9045_v34, 5  ;;  %v8157_v18 = vld [vmem:[#allocation7 + $0x288] sm:$0xff]  ;;  %v602_v21 = vrot.slane %v8997_v3, 2 }
 0x202   :  { %5184 = vmatpush.bf16.msrb.mxu1 %v8180_v38  ;;  %5094 = vmatmul.bf16.vlgmr.msra.gmra.mxu2 %v579_v47  ;;  %v9090_v38 = vsel %vm548_vm4, %v756_v27, %v755_v22  ;;  %v603_v22 = vrot.slane %v8999_v6, 1  ;;  %v8165_v27 = vld [vmem:[#allocation7 + $0x2c8] sm:$0xff] }
 0x203   :  { %5138 = vmatpush.bf16.msrb.mxu2 %v8163_v23  ;;  %v473_v0 = vpop.f32.mrf.mxu0  ;;  %5107 = vmatmul.bf16.vlgmr.msra.gmra.mxu3 %v584_v57  ;;  %v537_v23 = vpack.c.bf16 %v521_v5, %v521_v5  ;;  %v414_v57 = vpop.permute.xlu0 %413  ;;  %v773_v63 = vunpack.c.l.b16 %v536_v40  ;;  %v766_v5 = vrot.slane %v9045_v34, 6  ;;  %v9108_v51 = vsel %vm548_vm4, %v761_v61, %v760_v56  ;;  %v8213_v40 = vld [vmem:[#allocation7 + $0x448] sm:$0xff] }
 0x204   :  { %5151 = vmatpush.bf16.msrb.mxu3 %v8171_v28  ;;  %v474_v7 = vadd.f32 %v473_v0, %v409_v41  ;;  %5172 = vmatmul.bf16.vlgmr.msrb.gmra.mxu0 %v615_v58  ;;  %v8208_v28 = vld [vmem:[#allocation7 + $0x420] sm:$0xff]  ;;  %v772_v58 = vunpack.c.l.b16 %v528_v35  ;;  %v644_v35 = vrot.slane %v9026_v55, 1  ;;  %v604_v61 = vsel %vm548_vm4, %v603_v22, %v602_v21  ;;  %v8251_v22 = vld [vmem:[#allocation7 + $0x578] sm:$0xff] }
 0x205   :  { %5216 = vmatpush.bf16.msra.mxu0 %v8211_v39  ;;  %5185 = vmatmul.bf16.vlgmr.msrb.gmra.mxu1 %v620_v1  ;;  %v741_v39 = vrot.slane %v9045_v34, 1  ;;  %v8216_v41 = vld [vmem:[#allocation7 + $0x460] sm:$0xff]  ;;  %v819_v44 = vunpack.c.l.b16 %v537_v23  ;;  %v8215_v1 = vld [vmem:[#allocation7 + $0x458] sm:$0xff]  ;;  %v9117_v34 = vunpack.i.l.s16 %v773_v63  ;;  %v608_v23 = vrot.slane %v8999_v6, 2 }
 0x206   :  { %5229 = vmatpush.bf16.msra.mxu1 %v8219_v42  ;;  %v513_v12 = vmax.f32 %v474_v7, 0.0  ;;  %v745_v42 = vrot.slane %v9050_v37, 3  ;;  %v605_v21 = vpack.c.b16 %v604_v61, %v604_v61  ;;  %v8249_v61 = vld [vmem:[#allocation7 + $0x568] sm:$0xff] }
 0x207   :  { %5139 = vmatpush.bf16.msrb.mxu2 %v8162_v48  ;;  %v9096_v47 = vsel %vm548_vm4, %v741_v39, %v740_v25  ;;  %v504_v48 = vpop.f32.mrf.mxu1  ;;  %v9105_v7 = vunpack.i.l.s16 %v819_v44  ;;  %v607_v25 = vrot.slane %v8997_v3, 3  ;;  %v812_v44 = vrot.slane %v9117_v34, 6 }
 0x208   :  { %5152 = vmatpush.bf16.msrb.mxu3 %v8170_v59  ;;  %v529_v29 = vpack.c.bf16 %v513_v12, %v513_v12  ;;  %v9099_v54 = vsel %vm548_vm4, %v746_v43, %v745_v42  ;;  %v8167_v59 = vld [vmem:[#allocation7 + $0x2d8] sm:$0xff]  ;;  %v8156_v43 = vld [vmem:[#allocation7 + $0x280] sm:$0xff] }
 0x209   :  { %5217 = vmatpush.bf16.msra.mxu0 %v8210_v60  ;;  %v8207_v60 = vld [vmem:[#allocation7 + $0x418] sm:$0xff] }
 0x20a   :  { %5230 = vmatpush.bf16.msra.mxu1 %v8218_v2  ;;  %v818_v49 = vunpack.c.l.b16 %v529_v29  ;;  %v765_v2 = vrot.slane %v9050_v37, 7  ;;  %v8166_v37 = vld [vmem:[#allocation7 + $0x2d0] sm:$0xff]  ;;  %v8205_v29 = vld [vmem:[#allocation7 + $0x408] sm:$0xff] }
 0x20b   :  { %5140 = vmatpush.bf16.msrb.mxu2 %v8161_v8  ;;  %v475_v45 = vpop.f32.mrf.mxu0  ;;  %v505_v8 = vadd.f32 %v504_v48, %v414_v57  ;;  %v8195_v48 = vld [vmem:[#allocation7 + $0x3b8] sm:$0xff] }
 0x20c   :  { %5153 = vmatpush.bf16.msrb.mxu3 %v8169_v13  ;;  %v476_v0 = vadd.f32 %v475_v45, %v414_v57  ;;  %v9110_v11 = vunpack.i.l.s16 %v818_v49  ;;  %v9113_v12 = vsel %vm548_vm4, %v766_v5, %v765_v2  ;;  %v9115_v13 = vunpack.i.l.s16 %v772_v58  ;;  %v8212_v5 = vld [vmem:[#allocation7 + $0x440] sm:$0xff] }
 0x20d   :  { %5218 = vmatpush.bf16.msra.mxu0 %v8209_v14  ;;  %v8206_v14 = vld [vmem:[#allocation7 + $0x410] sm:$0xff]  ;;  %v522_v17 = vmax.f32 %v505_v8, 0.0  ;;  %v848_v57 = vrot.slane %v9105_v7, 4  ;;  %v640_v8 = vrot.slane %v9028_v62, 7 }
 0x20e   :  { %5231 = vmatpush.bf16.msra.mxu1 %v8217_v19  ;;  %v514_v15 = vmax.f32 %v476_v0, 0.0  ;;  %v824_v19 = vrot.slane %v9105_v7, 7  ;;  %v811_v42 = vrot.slane %v9115_v13, 7  ;;  %v842_v45 = vrot.slane %v9110_v11, 4 }
 0x20f   :  { %5141 = vmatpush.bf16.msrb.mxu2 %v8160_v24  ;;  %v828_v24 = vrot.slane %v9110_v11, 1  ;;  %v538_v3 = vpack.c.bf16 %v522_v17, %v522_v17  ;;  %v847_v56 = vrot.slane %v9110_v11, 5  ;;  %v832_v58 = vrot.slane %v9110_v11, 2 }
 0x210   :  { %5154 = vmatpush.bf16.msrb.mxu3 %v8168_v36  ;;  %v9128_v36 = vsel %vm548_vm4, %v824_v19, %v9110_v11  ;;  %v530_v39 = vpack.c.bf16 %v514_v15, %v514_v15  ;;  %v9148_v63 = vsel %vm548_vm4, %v812_v44, %v811_v42  ;;  %v8203_v15 = vld [vmem:[#allocation7 + $0x3f8] sm:$0xff]  ;;  %v609_v17 = vsel %vm548_vm4, %v608_v23, %v607_v25  ;;  %v8242_v44 = vld [vmem:[#allocation7 + $0x530] sm:$0xff] }
 0x211   :  { %5219 = vmatpush.bf16.msra.mxu0 %v8208_v28  ;;  %v806_v28 = vrot.slane %v9115_v13, 6  ;;  %v9133_v6 = vsel %vm548_vm4, %v9105_v7, %v828_v24  ;;  %v838_v19 = vrot.slane %v9105_v7, 2  ;;  %v641_v24 = vsel %vm548_vm4, %v640_v8, %v9026_v55 }
 0x212   :  { %5232 = vmatpush.bf16.msra.mxu1 %v8216_v41  ;;  %v807_v41 = vrot.slane %v9117_v34, 5  ;;  %v864_v2 = vunpack.c.l.b16 %v530_v39  ;;  %v853_v25 = vrot.slane %v9105_v7, 5  ;;  %v857_v39 = vrot.slane %v9110_v11, 7 }
 0x213   :  { %5142 = vmatpush.bf16.msrb.mxu2 %v8159_v46  ;;  %v843_v46 = vrot.slane %v9105_v7, 3  ;;  %v610_v42 = vpack.c.b16 %v609_v17, %v609_v17  ;;  %v8199_v17 = vld [vmem:[#allocation7 + $0x3d8] sm:$0xff] }
 0x214   :  { %5155 = vmatpush.bf16.msrb.mxu3 %v8167_v59  ;;  %v9141_v49 = vsel %vm548_vm4, %v807_v41, %v806_v28  ;;  %v8164_v59 = vld [vmem:[#allocation7 + $0x2c0] sm:$0xff]  ;;  %v8194_v28 = vld [vmem:[#allocation7 + $0x3b0] sm:$0xff]  ;;  %v9175_v41 = vunpack.i.l.s16 %v864_v2 }
 0x215   :  { %5220 = vmatpush.bf16.msra.mxu0 %v8207_v60  ;;  %v8204_v60 = vld [vmem:[#allocation7 + $0x400] sm:$0xff]  ;;  %v9151_v0 = vsel %vm548_vm4, %v843_v46, %v842_v45 }
 0x216   :  { %5233 = vmatpush.bf16.msra.mxu1 %v8215_v1  ;;  %v833_v1 = vrot.slane %v9105_v7, 1  ;;  %v8192_v2 = vld [vmem:[#allocation7 + $0x3a0] sm:$0xff] }
 0x217   :  { %5143 = vmatpush.bf16.msrb.mxu2 %v8158_v10  ;;  %v9156_v10 = vsel %vm548_vm4, %v848_v57, %v847_v56  ;;  %v898_v56 = vrot.slane %v9175_v41, 6  ;;  %v8201_v57 = vld [vmem:[#allocation7 + $0x3e8] sm:$0xff] }
 0x218   :  { %5156 = vmatpush.bf16.msrb.mxu3 %v8166_v37  ;;  %v837_v37 = vrot.slane %v9110_v11, 3 }
 0x219   :  { %5221 = vmatpush.bf16.msra.mxu0 %v8206_v14  ;;  %v865_v14 = vunpack.c.l.b16 %v538_v3  ;;  %v642_v3 = vpack.c.b16 %v641_v24, %v641_v24  ;;  %v8198_v24 = vld [vmem:[#allocation7 + $0x3d0] sm:$0xff] }
 0x21a   :  { %5234 = vmatpush.bf16.msra.mxu1 %v8214_v16  ;;  %v8243_v16 = vld [vmem:[#allocation7 + $0x538] sm:$0xff]  ;;  %v9170_v23 = vsel %vm548_vm4, %v838_v19, %v837_v37  ;;  %v8200_v37 = vld [vmem:[#allocation7 + $0x3e0] sm:$0xff] }
 0x21b   :  { %5144 = vmatpush.bf16.msrb.mxu2 %v8157_v18  ;;  %v9161_v18 = vsel %vm548_vm4, %v833_v1, %v832_v58  ;;  %v8241_v58 = vld [vmem:[#allocation7 + $0x528] sm:$0xff]  ;;  %v8239_v19 = vld [vmem:[#allocation7 + $0x518] sm:$0xff] }
 0x21c   :  { %5157 = vmatpush.bf16.msrb.mxu3 %v8165_v27  ;;  %v645_v27 = vsel %vm548_vm4, %v9028_v62, %v644_v35  ;;  %v9177_v35 = vunpack.i.l.s16 %v865_v14  ;;  %v8240_v14 = vld [vmem:[#allocation7 + $0x520] sm:$0xff] }
 0x21d   :  { %5222 = vmatpush.bf16.msra.mxu0 %v8205_v29  ;;  %v852_v29 = vrot.slane %v9110_v11, 6  ;;  %v8250_v11 = vld [vmem:[#allocation7 + $0x570] sm:$0xff] }
 0x21e   :  { %5235 = vmatpush.bf16.msra.mxu1 %v8213_v40  ;;  %v858_v40 = vrot.slane %v9105_v7, 6  ;;  %v646_v7 = vpack.c.b16 %v645_v27, %v645_v27  ;;  %v904_v1 = vrot.slane %v9177_v35, 6  ;;  %v8238_v27 = vld [vmem:[#allocation7 + $0x510] sm:$0xff] }
 0x21f   :  { %5145 = vmatpush.bf16.msrb.mxu2 %v8156_v43  ;;  %v8202_v43 = vld [vmem:[#allocation7 + $0x3f0] sm:$0xff]  ;;  %v9180_v45 = vsel %vm548_vm4, %v853_v25, %v852_v29  ;;  %v8197_v25 = vld [vmem:[#allocation7 + $0x3c8] sm:$0xff] }
 0x220   :  { %5158 = vmatpush.bf16.msrb.mxu3 %v8164_v59  ;;  %v9183_v46 = vsel %vm548_vm4, %v858_v40, %v857_v39  ;;  %v899_v59 = vrot.slane %v9177_v35, 5  ;;  %v8246_v29 = vld [vmem:[#allocation7 + $0x550] sm:$0xff]  ;;  %v8237_v39 = vld [vmem:[#allocation7 + $0x508] sm:$0xff] }
 0x221   :  { %5223 = vmatpush.bf16.msra.mxu0 %v8204_v60  ;;  %v903_v60 = vrot.slane %v9175_v41, 7  ;;  %v8245_v40 = vld [vmem:[#allocation7 + $0x548] sm:$0xff] }
 0x222   :  { %5236 = vmatpush.bf16.msra.mxu1 %v8212_v5  ;;  %5146 = vmatmul.bf16.vlgmr.msrb.gmra.mxu2 %v605_v21  ;;  %v9190_v5 = vsel %vm548_vm4, %v899_v59, %v898_v56  ;;  %v8247_v21 = vld [vmem:[#allocation7 + $0x558] sm:$0xff]  ;;  %v659_v56 = vrot.slane %v9028_v62, 3  ;;  %v664_v59 = vrot.slane %v9028_v62, 4 }
 0x223   :  { %5190 = vmatpush.bf16.msra.mxu2 %v8195_v48  ;;  %5159 = vmatmul.bf16.vlgmr.msrb.gmra.mxu3 %v610_v42  ;;  %v8193_v48 = vld [vmem:[#allocation7 + $0x3a8] sm:$0xff]  ;;  %v9193_v8 = vsel %vm548_vm4, %v904_v1, %v903_v60  ;;  %v8188_v42 = vld [vmem:[#allocation7 + $0x380] sm:$0xff]  ;;  %v625_v60 = vpack.c.b16 %v9014_v31, %v9014_v31 }
 0x224   :  { %5203 = vmatpush.bf16.msra.mxu3 %v8203_v15  ;;  %5224 = vmatmul.bf16.vlgmr.msra.gmra.mxu0 %v642_v3  ;;  %v8248_v15 = vld [vmem:[#allocation7 + $0x560] sm:$0xff]  ;;  %v8227_v3 = vld [vmem:[#allocation7 + $0x4b8] sm:$0xff] }
 0x225   :  { %5268 = vmatpush.bf16.msrb.mxu0 %v8243_v16  ;;  %5237 = vmatmul.bf16.vlgmr.msra.gmra.mxu1 %v646_v7  ;;  %v8191_v16 = vld [vmem:[#allocation7 + $0x398] sm:$0xff]  ;;  %v8236_v7 = vld [vmem:[#allocation7 + $0x500] sm:$0xff] }
 0x226   :  { %5281 = vmatpush.bf16.msrb.mxu1 %v8251_v22  ;;  %v8190_v22 = vld [vmem:[#allocation7 + $0x390] sm:$0xff] }
 0x227   :  { %5191 = vmatpush.bf16.msra.mxu2 %v8194_v28  ;;  %v8189_v28 = vld [vmem:[#allocation7 + $0x388] sm:$0xff] }
 0x228   :  { %5204 = vmatpush.bf16.msra.mxu3 %v8202_v43  ;;  %v658_v43 = vrot.slane %v9026_v55, 4 }
 0x229   :  { %5269 = vmatpush.bf16.msrb.mxu0 %v8242_v44  ;;  %v8196_v44 = vld [vmem:[#allocation7 + $0x3c0] sm:$0xff] }
 0x22a   :  { %5282 = vmatpush.bf16.msrb.mxu1 %v8250_v11  ;;  %v663_v11 = vrot.slane %v9026_v55, 5  ;;  %v660_v1 = vsel %vm548_vm4, %v659_v56, %v658_v43  ;;  %v8222_v43 = vld [vmem:[#allocation7 + $0x490] sm:$0xff]  ;;  %v8229_v56 = vld [vmem:[#allocation7 + $0x4c8] sm:$0xff] }
 0x22b   :  { %5192 = vmatpush.bf16.msra.mxu2 %v8193_v48  ;;  %v8244_v48 = vld [vmem:[#allocation7 + $0x540] sm:$0xff] }
 0x22c   :  { %5205 = vmatpush.bf16.msra.mxu3 %v8201_v57  ;;  %v8235_v57 = vld [vmem:[#allocation7 + $0x4f8] sm:$0xff] }
 0x22d   :  { %5270 = vmatpush.bf16.msrb.mxu0 %v8241_v58  ;;  %v8275_v58 = vld [vmem:[#allocation7 + $0x638] sm:$0xff] }
 0x22e   :  { %5283 = vmatpush.bf16.msrb.mxu1 %v8249_v61  ;;  %v8283_v61 = vld [vmem:[#allocation7 + $0x678] sm:$0xff] }
 0x22f   :  { %5193 = vmatpush.bf16.msra.mxu2 %v8192_v2  ;;  %v8226_v2 = vld [vmem:[#allocation7 + $0x4b0] sm:$0xff] }
 0x230   :  { %5206 = vmatpush.bf16.msra.mxu3 %v8200_v37  ;;  %v665_v37 = vsel %vm548_vm4, %v664_v59, %v663_v11  ;;  %v8278_v11 = vld [vmem:[#allocation7 + $0x650] sm:$0xff]  ;;  %v8277_v59 = vld [vmem:[#allocation7 + $0x648] sm:$0xff] }
 0x231   :  { %5271 = vmatpush.bf16.msrb.mxu0 %v8240_v14  ;;  %v630_v14 = vpack.c.b16 %v9022_v50, %v9022_v50  ;;  %v666_v31 = vpack.c.b16 %v665_v37, %v665_v37  ;;  %v8224_v50 = vld [vmem:[#allocation7 + $0x4a0] sm:$0xff] }
 0x232   :  { %5284 = vmatpush.bf16.msrb.mxu1 %v8248_v15  ;;  %v661_v15 = vpack.c.b16 %v660_v1, %v660_v1  ;;  %v653_v1 = vrot.slane %v9026_v55, 3  ;;  %v8228_v37 = vld [vmem:[#allocation7 + $0x4c0] sm:$0xff] }
 0x233   :  { %5194 = vmatpush.bf16.msra.mxu2 %v8191_v16  ;;  %v8234_v16 = vld [vmem:[#allocation7 + $0x4f0] sm:$0xff] }
 0x234   :  { %5207 = vmatpush.bf16.msra.mxu3 %v8199_v17  ;;  %v8274_v17 = vld [vmem:[#allocation7 + $0x630] sm:$0xff] }
 0x235   :  { %5272 = vmatpush.bf16.msrb.mxu0 %v8239_v19  ;;  %v8282_v19 = vld [vmem:[#allocation7 + $0x670] sm:$0xff] }
 0x236   :  { %5285 = vmatpush.bf16.msrb.mxu1 %v8247_v21  ;;  %v8225_v21 = vld [vmem:[#allocation7 + $0x4a8] sm:$0xff] }
 0x237   :  { %5195 = vmatpush.bf16.msra.mxu2 %v8190_v22  ;;  %v8233_v22 = vld [vmem:[#allocation7 + $0x4e8] sm:$0xff] }
 0x238   :  { %5208 = vmatpush.bf16.msra.mxu3 %v8198_v24  ;;  %v8273_v24 = vld [vmem:[#allocation7 + $0x628] sm:$0xff] }
 0x239   :  { %5273 = vmatpush.bf16.msrb.mxu0 %v8238_v27  ;;  %v8281_v27 = vld [vmem:[#allocation7 + $0x668] sm:$0xff] }
 0x23a   :  { %5286 = vmatpush.bf16.msrb.mxu1 %v8246_v29  ;;  %v8232_v29 = vld [vmem:[#allocation7 + $0x4e0] sm:$0xff] }
 0x23b   :  { %5196 = vmatpush.bf16.msra.mxu2 %v8189_v28  ;;  %v8272_v28 = vld [vmem:[#allocation7 + $0x620] sm:$0xff] }
 0x23c   :  { %5209 = vmatpush.bf16.msra.mxu3 %v8197_v25  ;;  %v8280_v25 = vld [vmem:[#allocation7 + $0x660] sm:$0xff] }
 0x23d   :  { %5274 = vmatpush.bf16.msrb.mxu0 %v8237_v39  ;;  %v8223_v39 = vld [vmem:[#allocation7 + $0x498] sm:$0xff] }
 0x23e   :  { %5287 = vmatpush.bf16.msrb.mxu1 %v8245_v40  ;;  %v8231_v40 = vld [vmem:[#allocation7 + $0x4d8] sm:$0xff] }
 0x23f   :  { %5197 = vmatpush.bf16.msra.mxu2 %v8188_v42  ;;  %v8271_v42 = vld [vmem:[#allocation7 + $0x618] sm:$0xff] }
 0x240   :  { %5210 = vmatpush.bf16.msra.mxu3 %v8196_v44  ;;  %v8230_v44 = vld [vmem:[#allocation7 + $0x4d0] sm:$0xff] }
 0x241   :  { %5275 = vmatpush.bf16.msrb.mxu0 %v8236_v7  ;;  %v8270_v7 = vld [vmem:[#allocation7 + $0x610] sm:$0xff] }
 0x242   :  { %5288 = vmatpush.bf16.msrb.mxu1 %v8244_v48  ;;  %5198 = vmatmul.bf16.vlgmr.msra.gmra.mxu2 %v625_v60  ;;  %v8221_v48 = vld [vmem:[#allocation7 + $0x488] sm:$0xff]  ;;  %v8220_v60 = vld [vmem:[#allocation7 + $0x480] sm:$0xff] }
 0x243   :  { %5242 = vmatpush.bf16.msrb.mxu2 %v8227_v3  ;;  %5211 = vmatmul.bf16.vlgmr.msra.gmra.mxu3 %v630_v14  ;;  %v8279_v3 = vld [vmem:[#allocation7 + $0x658] sm:$0xff]  ;;  %v8268_v14 = vld [vmem:[#allocation7 + $0x600] sm:$0xff] }
 0x244   :  { %5255 = vmatpush.bf16.msrb.mxu3 %v8235_v57  ;;  %5276 = vmatmul.bf16.vlgmr.msrb.gmra.mxu0 %v661_v15  ;;  %v8269_v57 = vld [vmem:[#allocation7 + $0x608] sm:$0xff] }
 0x245   :  { %5320 = vmatpush.bf16.msra.mxu0 %v8275_v58  ;;  %5289 = vmatmul.bf16.vlgmr.msrb.gmra.mxu1 %v666_v31  ;;  %v648_v58 = vrot.slane %v9026_v55, 2  ;;  %v8276_v31 = vld [vmem:[#allocation7 + $0x640] sm:$0xff] }
 0x246   :  { %5333 = vmatpush.bf16.msra.mxu1 %v8283_v61  ;;  %v649_v61 = vrot.slane %v9028_v62, 1 }
 0x247   :  { %5243 = vmatpush.bf16.msrb.mxu2 %v8226_v2  ;;  %v8259_v2 = vld [vmem:[#allocation7 + $0x5b8] sm:$0xff] }
 0x248   :  { %5256 = vmatpush.bf16.msrb.mxu3 %v8234_v16  ;;  %v650_v15 = vsel %vm548_vm4, %v649_v61, %v648_v58  ;;  %v654_v16 = vrot.slane %v9028_v62, 2  ;;  %v8258_v62 = vld [vmem:[#allocation7 + $0x5b0] sm:$0xff]  ;;  %v8256_v58 = vld [vmem:[#allocation7 + $0x5a0] sm:$0xff] }
 0x249   :  { %5321 = vmatpush.bf16.msra.mxu0 %v8274_v17  ;;  %v690_v17 = vrot.slane %v9058_v53, 1 }
 0x24a   :  { %5334 = vmatpush.bf16.msra.mxu1 %v8282_v19  ;;  %v686_v19 = vrot.slane %v9056_v52, 7  ;;  %v655_v55 = vsel %vm548_vm4, %v654_v16, %v653_v1  ;;  %v8312_v1 = vld [vmem:[#allocation7 + $0x760] sm:$0xff]  ;;  %v8263_v16 = vld [vmem:[#allocation7 + $0x5d8] sm:$0xff] }
 0x24b   :  { %5244 = vmatpush.bf16.msrb.mxu2 %v8225_v21  ;;  %v8267_v21 = vld [vmem:[#allocation7 + $0x5f8] sm:$0xff] }
 0x24c   :  { %5257 = vmatpush.bf16.msrb.mxu3 %v8233_v22  ;;  %v8307_v22 = vld [vmem:[#allocation7 + $0x738] sm:$0xff] }
 0x24d   :  { %5322 = vmatpush.bf16.msra.mxu0 %v8273_v24  ;;  %v651_v24 = vpack.c.b16 %v650_v15, %v650_v15 }
 0x24e   :  { %5335 = vmatpush.bf16.msra.mxu1 %v8281_v27  ;;  %v8315_v27 = vld [vmem:[#allocation7 + $0x778] sm:$0xff] }
 0x24f   :  { %5245 = vmatpush.bf16.msrb.mxu2 %v8224_v50  ;;  %v687_v50 = vsel %vm548_vm4, %v686_v19, %v9058_v53  ;;  %v8311_v19 = vld [vmem:[#allocation7 + $0x758] sm:$0xff] }
 0x250   :  { %5258 = vmatpush.bf16.msrb.mxu3 %v8232_v29  ;;  %v691_v29 = vsel %vm548_vm4, %v9056_v52, %v690_v17  ;;  %v8303_v17 = vld [vmem:[#allocation7 + $0x718] sm:$0xff] }
 0x251   :  { %5323 = vmatpush.bf16.msra.mxu0 %v8272_v28  ;;  %v656_v28 = vpack.c.b16 %v655_v55, %v655_v55  ;;  %v8262_v55 = vld [vmem:[#allocation7 + $0x5d0] sm:$0xff] }
 0x252   :  { %5336 = vmatpush.bf16.msra.mxu1 %v8280_v25  ;;  %v688_v25 = vpack.c.b16 %v687_v50, %v687_v50  ;;  %v8310_v50 = vld [vmem:[#allocation7 + $0x750] sm:$0xff] }
 0x253   :  { %5246 = vmatpush.bf16.msrb.mxu2 %v8223_v39  ;;  %v8266_v39 = vld [vmem:[#allocation7 + $0x5f0] sm:$0xff] }
 0x254   :  { %5259 = vmatpush.bf16.msrb.mxu3 %v8231_v40  ;;  %v8306_v40 = vld [vmem:[#allocation7 + $0x730] sm:$0xff] }
 0x255   :  { %5324 = vmatpush.bf16.msra.mxu0 %v8271_v42  ;;  %v692_v42 = vpack.c.b16 %v691_v29, %v691_v29 }
 0x256   :  { %5337 = vmatpush.bf16.msra.mxu1 %v8279_v3  ;;  %v8314_v3 = vld [vmem:[#allocation7 + $0x770] sm:$0xff] }
 0x257   :  { %5247 = vmatpush.bf16.msrb.mxu2 %v8222_v43  ;;  %v8257_v43 = vld [vmem:[#allocation7 + $0x5a8] sm:$0xff] }
 0x258   :  { %5260 = vmatpush.bf16.msrb.mxu3 %v8230_v44  ;;  %v8265_v44 = vld [vmem:[#allocation7 + $0x5e8] sm:$0xff] }
 0x259   :  { %5325 = vmatpush.bf16.msra.mxu0 %v8270_v7  ;;  %v8305_v7 = vld [vmem:[#allocation7 + $0x728] sm:$0xff] }
 0x25a   :  { %5338 = vmatpush.bf16.msra.mxu1 %v8278_v11 }
 0x25b   :  { %5248 = vmatpush.bf16.msrb.mxu2 %v8221_v48  ;;  %v8313_v48 = vld [vmem:[#allocation7 + $0x768] sm:$0xff] }
 0x25c   :  { %5261 = vmatpush.bf16.msrb.mxu3 %v8229_v56 }
 0x25d   :  { %5326 = vmatpush.bf16.msra.mxu0 %v8269_v57  ;;  %v8623_v57 = vld [vmem:[#allocation8] ss:$0 sm:$0xff] }
 0x25e   :  { %5339 = vmatpush.bf16.msra.mxu1 %v8277_v59  ;;  %v8264_v59 = vld [vmem:[#allocation7 + $0x5e0] sm:$0xff] }
 0x25f   :  { %5249 = vmatpush.bf16.msrb.mxu2 %v8220_v60  ;;  %v8304_v60 = vld [vmem:[#allocation7 + $0x720] sm:$0xff] }
 0x260   :  { %5262 = vmatpush.bf16.msrb.mxu3 %v8228_v37  ;;  %v9217_v11 = vpop.f32.mrf.mxu0  ;;  %v8255_v37 = vld [vmem:[#allocation7 + $0x598] sm:$0xff] }
 0x261   :  { %5327 = vmatpush.bf16.msra.mxu0 %v8268_v14  ;;  %v9219_v56 = vpop.f32.mrf.mxu1 }
 0x262   :  { %5340 = vmatpush.bf16.msra.mxu1 %v8276_v31  ;;  %5250 = vmatmul.bf16.vlgmr.msrb.gmra.mxu2 %v651_v24  ;;  %v8302_v24 = vld [vmem:[#allocation7 + $0x710] sm:$0xff] }
 0x263   :  { %5294 = vmatpush.bf16.msra.mxu2 %v8259_v2  ;;  %5263 = vmatmul.bf16.vlgmr.msrb.gmra.mxu3 %v656_v28  ;;  %v8261_v28 = vld [vmem:[#allocation7 + $0x5c8] sm:$0xff] }
 0x264   :  { %5307 = vmatpush.bf16.msra.mxu3 %v8267_v21  ;;  %5328 = vmatmul.bf16.vlgmr.msra.gmra.mxu0 %v688_v25  ;;  %v5017_v61 = vpop.f32.mrf.mxu2  ;;  %v8301_v25 = vld [vmem:[#allocation7 + $0x708] sm:$0xff] }
 0x265   :  { %5372 = vmatpush.bf16.msrb.mxu0 %v8307_v22  ;;  %5341 = vmatmul.bf16.vlgmr.msra.gmra.mxu1 %v692_v42  ;;  %v5018_v2 = vadd.f32 %v8623_v57, %v5017_v61  ;;  %v8254_v22 = vld [vmem:[#allocation7 + $0x590] sm:$0xff]  ;;  %v709_v57 = vrot.slane %v9058_v53, 5 }
 0x266   :  { %5385 = vmatpush.bf16.msrb.mxu1 %v8315_v27  ;;  %v5030_v14 = vpop.f32.mrf.mxu3 }
 0x267   :  { %5295 = vmatpush.bf16.msra.mxu2 %v8258_v62  ;;  %v5031_v15 = vadd.f32 %v5030_v14, %v5018_v2  ;;  %v8253_v62 = vld [vmem:[#allocation7 + $0x588] sm:$0xff]  ;;  %v8339_v2 = vld [vmem:[#allocation7 + $0x838] sm:$0xff]  ;;  %v710_v14 = vrot.slane %v9056_v52, 4 }
 0x268   :  { %5308 = vmatpush.bf16.msra.mxu3 %v8266_v39  ;;  %v5071_v31 = vpop.f32.mrf.mxu0  ;;  %v8309_v39 = vld [vmem:[#allocation7 + $0x748] sm:$0xff] }
 0x269   :  { %5373 = vmatpush.bf16.msrb.mxu0 %v8306_v40  ;;  %v5084_v21 = vpop.f32.mrf.mxu1 }
 0x26a   :  { %5386 = vmatpush.bf16.msrb.mxu1 %v8314_v3  ;;  %v8252_v3 = vld [vmem:[#allocation7 + $0x580] sm:$0xff]  ;;  %v8290_v21 = vld [vmem:[#allocation7 + $0x6b0] sm:$0xff] }
 0x26b   :  { %5296 = vmatpush.bf16.msra.mxu2 %v8257_v43  ;;  %v8291_v43 = vld [vmem:[#allocation7 + $0x6b8] sm:$0xff] }
 0x26c   :  { %5309 = vmatpush.bf16.msra.mxu3 %v8265_v44  ;;  %v5019_v27 = vpop.f32.mrf.mxu2  ;;  %v704_v44 = vrot.slane %v9058_v53, 4 }
 0x26d   :  { %5374 = vmatpush.bf16.msrb.mxu0 %v8305_v7  ;;  %v8260_v7 = vld [vmem:[#allocation7 + $0x5c0] sm:$0xff] }
 0x26e   :  { %5387 = vmatpush.bf16.msrb.mxu1 %v8313_v48  ;;  %v5032_v29 = vpop.f32.mrf.mxu3  ;;  %v8300_v48 = vld [vmem:[#allocation7 + $0x700] sm:$0xff] }
 0x26f   :  { %5297 = vmatpush.bf16.msra.mxu2 %v8256_v58  ;;  %v8308_v58 = vld [vmem:[#allocation7 + $0x740] sm:$0xff] }
 0x270   :  { %5310 = vmatpush.bf16.msra.mxu3 %v8264_v59 }
 0x271   :  { %5375 = vmatpush.bf16.msrb.mxu0 %v8304_v60  ;;  %v9221_v40 = vpop.f32.mrf.mxu0  ;;  %v705_v60 = vrot.slane %v9056_v52, 3 }
 0x272   :  { %5388 = vmatpush.bf16.msrb.mxu1 %v8312_v1  ;;  %v9223_v42 = vpop.f32.mrf.mxu1  ;;  %v8299_v1 = vld [vmem:[#allocation7 + $0x6f8] sm:$0xff] }
 0x273   :  { %5298 = vmatpush.bf16.msra.mxu2 %v8255_v37  ;;  %v706_v31 = vsel %vm548_vm4, %v705_v60, %v704_v44  ;;  %v8345_v44 = vld [vmem:[#allocation7 + $0x868] sm:$0xff]  ;;  %v8287_v60 = vld [vmem:[#allocation7 + $0x698] sm:$0xff] }
 0x274   :  { %5311 = vmatpush.bf16.msra.mxu3 %v8263_v16  ;;  %v671_v16 = vpack.c.b16 %v9043_v30, %v9043_v30  ;;  %v707_v30 = vpack.c.b16 %v706_v31, %v706_v31 }
 0x275   :  { %5376 = vmatpush.bf16.msrb.mxu0 %v8303_v17  ;;  %v5043_v59 = vpop.f32.mrf.mxu2  ;;  %v8347_v17 = vld [vmem:[#allocation7 + $0x878] sm:$0xff] }
 0x276   :  { %5389 = vmatpush.bf16.msrb.mxu1 %v8311_v19  ;;  %v5044_v61 = vadd.f32 %v5043_v59, %v5031_v15  ;;  %v5056_v37 = vpop.f32.mrf.mxu3  ;;  %v676_v15 = vpack.c.b16 %v9048_v32, %v9048_v32  ;;  %v8336_v59 = vld [vmem:[#allocation7 + $0x820] sm:$0xff] }
 0x277   :  { %5299 = vmatpush.bf16.msra.mxu2 %v8254_v22  ;;  %v711_v22 = vsel %vm548_vm4, %v710_v14, %v709_v57  ;;  %v8343_v14 = vld [vmem:[#allocation7 + $0x858] sm:$0xff] }
 0x278   :  { %5312 = vmatpush.bf16.msra.mxu3 %v8262_v55  ;;  %v5057_v19 = vadd.f32 %v5056_v37, %v5044_v61  ;;  %v712_v29 = vpack.c.b16 %v711_v22, %v711_v22  ;;  %v8294_v22 = vld [vmem:[#allocation7 + $0x6d0] sm:$0xff] }
 0x279   :  { %5377 = vmatpush.bf16.msrb.mxu0 %v8302_v24  ;;  %v5123_v55 = vpop.f32.mrf.mxu0 }
 0x27a   :  { %5390 = vmatpush.bf16.msrb.mxu1 %v8310_v50  ;;  %v5070_v24 = vadd.f32 %v9217_v11, %v5057_v19  ;;  %v5136_v27 = vpop.f32.mrf.mxu1  ;;  %v8298_v50 = vld [vmem:[#allocation7 + $0x6f0] sm:$0xff] }
 0x27b   :  { %5300 = vmatpush.bf16.msra.mxu2 %v8253_v62  ;;  %v8338_v62 = vld [vmem:[#allocation7 + $0x830] sm:$0xff] }
 0x27c   :  { %5313 = vmatpush.bf16.msra.mxu3 %v8261_v28  ;;  %v8346_v28 = vld [vmem:[#allocation7 + $0x870] sm:$0xff] }
 0x27d   :  { %5378 = vmatpush.bf16.msrb.mxu0 %v8301_v25  ;;  %v8289_v25 = vld [vmem:[#allocation7 + $0x6a8] sm:$0xff]  ;;  %v5045_v32 = vpop.f32.mrf.mxu2 }
 0x27e   :  { %5391 = vmatpush.bf16.msrb.mxu1 %v8309_v39  ;;  %v5083_v39 = vadd.f32 %v9219_v56, %v5070_v24  ;;  %v5058_v11 = vpop.f32.mrf.mxu3  ;;  %v8344_v56 = vld [vmem:[#allocation7 + $0x860] sm:$0xff]  ;;  %v8342_v24 = vld [vmem:[#allocation7 + $0x850] sm:$0xff] }
 0x27f   :  { %5301 = vmatpush.bf16.msra.mxu2 %v8252_v3  ;;  %v8297_v3 = vld [vmem:[#allocation7 + $0x6e8] sm:$0xff]  ;;  %v8284_v32 = vld [vmem:[#allocation7 + $0x680] sm:$0xff] }
 0x280   :  { %5314 = vmatpush.bf16.msra.mxu3 %v8260_v7  ;;  %v8288_v7 = vld [vmem:[#allocation7 + $0x6a0] sm:$0xff] }
 0x281   :  { %5379 = vmatpush.bf16.msrb.mxu0 %v8300_v48  ;;  %v9237_v48 = vpop.f32.mrf.mxu0  ;;  %v8332_v11 = vld [vmem:[#allocation7 + $0x800] sm:$0xff] }
 0x282   :  { %5392 = vmatpush.bf16.msrb.mxu1 %v8308_v58  ;;  %5302 = vmatmul.bf16.vlgmr.msra.gmra.mxu2 %v671_v16  ;;  %v9239_v57 = vpop.f32.mrf.mxu1  ;;  %v8296_v58 = vld [vmem:[#allocation7 + $0x6e0] sm:$0xff] }
 0x283   :  { %5346 = vmatpush.bf16.msrb.mxu2 %v8291_v43  ;;  %5315 = vmatmul.bf16.vlgmr.msra.gmra.mxu3 %v676_v15  ;;  %v8337_v43 = vld [vmem:[#allocation7 + $0x828] sm:$0xff]  ;;  %v8334_v15 = vld [vmem:[#allocation7 + $0x810] sm:$0xff] }
 0x284   :  { %5359 = vmatpush.bf16.msrb.mxu3 %v8299_v1  ;;  %5380 = vmatmul.bf16.vlgmr.msrb.gmra.mxu0 %v707_v30  ;;  %v8295_v1 = vld [vmem:[#allocation7 + $0x6d8] sm:$0xff]  ;;  %v8285_v30 = vld [vmem:[#allocation7 + $0x688] sm:$0xff] }
 0x285   :  { %5424 = vmatpush.bf16.msra.mxu0 %v8339_v2  ;;  %5393 = vmatmul.bf16.vlgmr.msrb.gmra.mxu1 %v712_v29  ;;  %v5095_v61 = vpop.f32.mrf.mxu2  ;;  %v8335_v2 = vld [vmem:[#allocation7 + $0x818] sm:$0xff]  ;;  %v8333_v29 = vld [vmem:[#allocation7 + $0x808] sm:$0xff] }
 0x286   :  { %5437 = vmatpush.bf16.msra.mxu1 %v8347_v17  ;;  %v5096_v37 = vadd.f32 %v5095_v61, %v5083_v39  ;;  %v5108_v16 = vpop.f32.mrf.mxu3  ;;  %v8286_v17 = vld [vmem:[#allocation7 + $0x690] sm:$0xff] }
 0x287   :  { %5347 = vmatpush.bf16.msrb.mxu2 %v8290_v21 }
 0x288   :  { %5360 = vmatpush.bf16.msrb.mxu3 %v8298_v50  ;;  %v5109_v31 = vadd.f32 %v5108_v16, %v5096_v37  ;;  %v8330_v37 = vld [vmem:[#allocation7 + $0x7f0] sm:$0xff]  ;;  %v738_v16 = vpack.c.b16 %v9069_v9, %v9069_v9  ;;  %v8328_v9 = vld [vmem:[#allocation7 + $0x7e0] sm:$0xff] }
 0x289   :  { %5425 = vmatpush.bf16.msra.mxu0 %v8338_v62  ;;  %v5175_v19 = vpop.f32.mrf.mxu0  ;;  %v8293_v62 = vld [vmem:[#allocation7 + $0x6c8] sm:$0xff] }
 0x28a   :  { %5438 = vmatpush.bf16.msra.mxu1 %v8346_v28  ;;  %v5188_v21 = vpop.f32.mrf.mxu1  ;;  %v5122_v55 = vadd.f32 %v9221_v40, %v5109_v31  ;;  %v694_v28 = vrot.slane %v9058_v53, 2  ;;  %v695_v40 = vrot.slane %v9056_v52, 1  ;;  %v8321_v31 = vld [vmem:[#allocation7 + $0x7a8] sm:$0xff] }
 0x28b   :  { %5348 = vmatpush.bf16.msrb.mxu2 %v8289_v25  ;;  %v8341_v25 = vld [vmem:[#allocation7 + $0x848] sm:$0xff] }
 0x28c   :  { %5361 = vmatpush.bf16.msrb.mxu3 %v8297_v3  ;;  %v9243_v27 = vadd.f32 %v9223_v42, %v5122_v55  ;;  %v699_v3 = vrot.slane %v9058_v53, 3  ;;  %v8292_v42 = vld [vmem:[#allocation7 + $0x6c0] sm:$0xff]  ;;  %v8322_v53 = vld [vmem:[#allocation7 + $0x7b0] sm:$0xff]  ;;  %v8329_v19 = vld [vmem:[#allocation7 + $0x7e8] sm:$0xff] }
 0x28d   :  { %5426 = vmatpush.bf16.msra.mxu0 %v8337_v43  ;;  %v5097_v50 = vpop.f32.mrf.mxu2  ;;  %v8323_v43 = vld [vmem:[#allocation7 + $0x7b8] sm:$0xff]  ;;  %v8369_v21 = vld [vmem:[#allocation7 + $0x928] sm:$0xff] }
 0x28e   :  { %5439 = vmatpush.bf16.msra.mxu1 %v8345_v44  ;;  %v5110_v39 = vpop.f32.mrf.mxu3  ;;  %v696_v44 = vsel %vm548_vm4, %v695_v40, %v694_v28  ;;  %v8319_v50 = vld [vmem:[#allocation7 + $0x798] sm:$0xff] }
 0x28f   :  { %5349 = vmatpush.bf16.msrb.mxu2 %v8288_v7  ;;  %v700_v7 = vrot.slane %v9056_v52, 2  ;;  %v697_v61 = vpack.c.b16 %v696_v44, %v696_v44  ;;  %v734_v52 = vpack.c.b16 %v9065_v4, %v9065_v4  ;;  %v8320_v4 = vld [vmem:[#allocation7 + $0x7a0] sm:$0xff]  ;;  %v8327_v28 = vld [vmem:[#allocation7 + $0x7d8] sm:$0xff]  ;;  %v8326_v44 = vld [vmem:[#allocation7 + $0x7d0] sm:$0xff] }
 0x290   :  { %5362 = vmatpush.bf16.msrb.mxu3 %v8296_v58  ;;  %v8340_v58 = vld [vmem:[#allocation7 + $0x840] sm:$0xff] }
 0x291   :  { %5427 = vmatpush.bf16.msra.mxu0 %v8336_v59  ;;  %v8331_v59 = vld [vmem:[#allocation7 + $0x7f8] sm:$0xff] }
 0x292   :  { %5440 = vmatpush.bf16.msra.mxu1 %v8344_v56  ;;  %v8371_v56 = vld [vmem:[#allocation7 + $0x938] sm:$0xff] }
 0x293   :  { %5350 = vmatpush.bf16.msrb.mxu2 %v8287_v60  ;;  %v701_v60 = vsel %vm548_vm4, %v700_v7, %v699_v3  ;;  %v8318_v3 = vld [vmem:[#allocation7 + $0x790] sm:$0xff] }
 0x294   :  { %5363 = vmatpush.bf16.msrb.mxu3 %v8295_v1  ;;  %v8379_v1 = vld [vmem:[#allocation7 + $0x978] sm:$0xff]  ;;  %v8366_v7 = vld [vmem:[#allocation7 + $0x910] sm:$0xff] }
 0x295   :  { %5428 = vmatpush.bf16.msra.mxu0 %v8335_v2  ;;  %v702_v2 = vpack.c.b16 %v701_v60, %v701_v60  ;;  %v8325_v60 = vld [vmem:[#allocation7 + $0x7c8] sm:$0xff] }
 0x296   :  { %5441 = vmatpush.bf16.msra.mxu1 %v8343_v14  ;;  %v8370_v14 = vld [vmem:[#allocation7 + $0x930] sm:$0xff] }
 0x297   :  { %5351 = vmatpush.bf16.msrb.mxu2 %v8286_v17  ;;  %v8378_v17 = vld [vmem:[#allocation7 + $0x970] sm:$0xff] }
 0x298   :  { %5364 = vmatpush.bf16.msrb.mxu3 %v8294_v22  ;;  %v8377_v22 = vld [vmem:[#allocation7 + $0x968] sm:$0xff] }
 0x299   :  { %5429 = vmatpush.bf16.msra.mxu0 %v8334_v15 }
 0x29a   :  { %5442 = vmatpush.bf16.msra.mxu1 %v8342_v24  ;;  %v8368_v24 = vld [vmem:[#allocation7 + $0x920] sm:$0xff] }
 0x29b   :  { %5352 = vmatpush.bf16.msrb.mxu2 %v8285_v30  ;;  %v8376_v30 = vld [vmem:[#allocation7 + $0x960] sm:$0xff] }
 0x29c   :  { %5365 = vmatpush.bf16.msrb.mxu3 %v8293_v62 }
 0x29d   :  { %5430 = vmatpush.bf16.msra.mxu0 %v8333_v29 }
 0x29e   :  { %5443 = vmatpush.bf16.msra.mxu1 %v8341_v25  ;;  %v8367_v25 = vld [vmem:[#allocation7 + $0x918] sm:$0xff] }
 0x29f   :  { %5353 = vmatpush.bf16.msrb.mxu2 %v8284_v32  ;;  %v8375_v32 = vld [vmem:[#allocation7 + $0x958] sm:$0xff] }
 0x2a0   :  { %5366 = vmatpush.bf16.msrb.mxu3 %v8292_v42 }
 0x2a1   :  { %5431 = vmatpush.bf16.msra.mxu0 %v8332_v11  ;;  %v9255_v15 = vpop.f32.mrf.mxu0 }
 0x2a2   :  { %5444 = vmatpush.bf16.msra.mxu1 %v8340_v58  ;;  %5354 = vmatmul.bf16.vlgmr.msrb.gmra.mxu2 %v697_v61  ;;  %v9257_v55 = vpop.f32.mrf.mxu1  ;;  %v8365_v61 = vld [vmem:[#allocation7 + $0x908] sm:$0xff] }
 0x2a3   :  { %5398 = vmatpush.bf16.msra.mxu2 %v8323_v43  ;;  %5367 = vmatmul.bf16.vlgmr.msrb.gmra.mxu3 %v702_v2  ;;  %v8355_v2 = vld [vmem:[#allocation7 + $0x8b8] sm:$0xff] }
 0x2a4   :  { %5411 = vmatpush.bf16.msra.mxu3 %v8331_v59  ;;  %5432 = vmatmul.bf16.vlgmr.msra.gmra.mxu0 %v734_v52  ;;  %v8317_v59 = vld [vmem:[#allocation7 + $0x788] sm:$0xff]  ;;  %v8324_v52 = vld [vmem:[#allocation7 + $0x7c0] sm:$0xff] }
 0x2a5   :  { %5476 = vmatpush.bf16.msrb.mxu0 %v8371_v56  ;;  %5445 = vmatmul.bf16.vlgmr.msra.gmra.mxu1 %v738_v16  ;;  %v5147_v62 = vpop.f32.mrf.mxu2  ;;  %v8403_v16 = vld [vmem:[#allocation7 + $0xa38] sm:$0xff] }
 0x2a6   :  { %5489 = vmatpush.bf16.msrb.mxu1 %v8379_v1  ;;  %v5148_v29 = vadd.f32 %v5147_v62, %v9243_v27  ;;  %v5160_v39 = vpop.f32.mrf.mxu3  ;;  %v8374_v27 = vld [vmem:[#allocation7 + $0x950] sm:$0xff]  ;;  %v8409_v62 = vld [vmem:[#allocation7 + $0xa68] sm:$0xff] }
 0x2a7   :  { %5399 = vmatpush.bf16.msra.mxu2 %v8322_v53  ;;  %v8316_v53 = vld [vmem:[#allocation7 + $0x780] sm:$0xff] }
 0x2a8   :  { %5412 = vmatpush.bf16.msra.mxu3 %v8330_v37  ;;  %v5161_v40 = vadd.f32 %v5160_v39, %v5148_v29  ;;  %v8364_v37 = vld [vmem:[#allocation7 + $0x900] sm:$0xff] }
 0x2a9   :  { %5477 = vmatpush.bf16.msrb.mxu0 %v8370_v14  ;;  %v5227_v42 = vpop.f32.mrf.mxu0  ;;  %v8363_v14 = vld [vmem:[#allocation7 + $0x8f8] sm:$0xff]  ;;  %v8408_v39 = vld [vmem:[#allocation7 + $0xa60] sm:$0xff] }
 0x2aa   :  { %5490 = vmatpush.bf16.msrb.mxu1 %v8378_v17  ;;  %v5174_v43 = vadd.f32 %v9237_v48, %v5161_v40  ;;  %v5240_v11 = vpop.f32.mrf.mxu1  ;;  %v8373_v48 = vld [vmem:[#allocation7 + $0x948] sm:$0xff]  ;;  %v717_v17 = vpack.c.b16 %v9077_v20, %v9077_v20  ;;  %v758_v20 = vpack.c.b16 %v9090_v38, %v9090_v38  ;;  %v8360_v38 = vld [vmem:[#allocation7 + $0x8e0] sm:$0xff]  ;;  %v8399_v42 = vld [vmem:[#allocation7 + $0xa18] sm:$0xff] }
 0x2ab   :  { %5400 = vmatpush.bf16.msra.mxu2 %v8321_v31  ;;  %v8411_v31 = vld [vmem:[#allocation7 + $0xa78] sm:$0xff] }
 0x2ac   :  { %5413 = vmatpush.bf16.msra.mxu3 %v8329_v19  ;;  %v9262_v58 = vadd.f32 %v9239_v57, %v5174_v43  ;;  %v8372_v57 = vld [vmem:[#allocation7 + $0x940] sm:$0xff]  ;;  %v8354_v19 = vld [vmem:[#allocation7 + $0x8b0] sm:$0xff]  ;;  %v8359_v43 = vld [vmem:[#allocation7 + $0x8d8] sm:$0xff] }
 0x2ad   :  { %5478 = vmatpush.bf16.msrb.mxu0 %v8369_v21  ;;  %v5149_v56 = vpop.f32.mrf.mxu2  ;;  %v722_v21 = vpack.c.b16 %v9082_v26, %v9082_v26  ;;  %v8361_v26 = vld [vmem:[#allocation7 + $0x8e8] sm:$0xff] }
 0x2ae   :  { %5491 = vmatpush.bf16.msrb.mxu1 %v8377_v22  ;;  %v5162_v1 = vpop.f32.mrf.mxu3  ;;  %v753_v22 = vpack.c.b16 %v9086_v33, %v9086_v33  ;;  %v8352_v33 = vld [vmem:[#allocation7 + $0x8a0] sm:$0xff] }
 0x2af   :  { %5401 = vmatpush.bf16.msra.mxu2 %v8320_v4  ;;  %v8362_v4 = vld [vmem:[#allocation7 + $0x8f0] sm:$0xff] }
 0x2b0   :  { %5414 = vmatpush.bf16.msra.mxu3 %v8328_v9  ;;  %v8402_v9 = vld [vmem:[#allocation7 + $0xa30] sm:$0xff] }
 0x2b1   :  { %5479 = vmatpush.bf16.msrb.mxu0 %v8368_v24  ;;  %v8410_v24 = vld [vmem:[#allocation7 + $0xa70] sm:$0xff] }
 0x2b2   :  { %5492 = vmatpush.bf16.msrb.mxu1 %v8376_v30  ;;  %v8353_v30 = vld [vmem:[#allocation7 + $0x8a8] sm:$0xff]  ;;  %v8398_v1 = vld [vmem:[#allocation7 + $0xa10] sm:$0xff] }
 0x2b3   :  { %5402 = vmatpush.bf16.msra.mxu2 %v8319_v50  ;;  %v8401_v50 = vld [vmem:[#allocation7 + $0xa28] sm:$0xff] }
 0x2b4   :  { %5415 = vmatpush.bf16.msra.mxu3 %v8327_v28 }
 0x2b5   :  { %5480 = vmatpush.bf16.msrb.mxu0 %v8367_v25  ;;  %v8400_v25 = vld [vmem:[#allocation7 + $0xa20] sm:$0xff] }
 0x2b6   :  { %5493 = vmatpush.bf16.msrb.mxu1 %v8375_v32  ;;  %v8351_v32 = vld [vmem:[#allocation7 + $0x898] sm:$0xff] }
 0x2b7   :  { %5403 = vmatpush.bf16.msra.mxu2 %v8318_v3 }
 0x2b8   :  { %5416 = vmatpush.bf16.msra.mxu3 %v8326_v44  ;;  %v8407_v44 = vld [vmem:[#allocation7 + $0xa58] sm:$0xff] }
 0x2b9   :  { %5481 = vmatpush.bf16.msrb.mxu0 %v8366_v7 }
 0x2ba   :  { %5494 = vmatpush.bf16.msrb.mxu1 %v8374_v27  ;;  %v8350_v27 = vld [vmem:[#allocation7 + $0x890] sm:$0xff] }
 0x2bb   :  { %5404 = vmatpush.bf16.msra.mxu2 %v8317_v59 }
 0x2bc   :  { %5417 = vmatpush.bf16.msra.mxu3 %v8325_v60 }
 0x2bd   :  { %5482 = vmatpush.bf16.msrb.mxu0 %v8365_v61  ;;  %v8358_v61 = vld [vmem:[#allocation7 + $0x8d0] sm:$0xff] }
 0x2be   :  { %5495 = vmatpush.bf16.msrb.mxu1 %v8373_v48 }
 0x2bf   :  { %5405 = vmatpush.bf16.msra.mxu2 %v8316_v53  ;;  %v8349_v53 = vld [vmem:[#allocation7 + $0x888] sm:$0xff] }
 0x2c0   :  { %5418 = vmatpush.bf16.msra.mxu3 %v8324_v52  ;;  %v8357_v52 = vld [vmem:[#allocation7 + $0x8c8] sm:$0xff] }
 0x2c1   :  { %5483 = vmatpush.bf16.msrb.mxu0 %v8364_v37  ;;  %v9272_v29 = vpop.f32.mrf.mxu0  ;;  %v8397_v37 = vld [vmem:[#allocation7 + $0xa08] sm:$0xff] }
 0x2c2   :  { %5496 = vmatpush.bf16.msrb.mxu1 %v8372_v57  ;;  %5406 = vmatmul.bf16.vlgmr.msra.gmra.mxu2 %v717_v17  ;;  %v9274_v28 = vpop.f32.mrf.mxu1  ;;  %v8356_v17 = vld [vmem:[#allocation7 + $0x8c0] sm:$0xff] }
 0x2c3   :  { %5450 = vmatpush.bf16.msrb.mxu2 %v8355_v2  ;;  %5419 = vmatmul.bf16.vlgmr.msra.gmra.mxu3 %v722_v21  ;;  %v778_v21 = vrot.slane %v9117_v34, 7 }
 0x2c4   :  { %5463 = vmatpush.bf16.msrb.mxu3 %v8363_v14  ;;  %5484 = vmatmul.bf16.vlgmr.msrb.gmra.mxu0 %v753_v22  ;;  %v8348_v14 = vld [vmem:[#allocation7 + $0x880] sm:$0xff]  ;;  %v8395_v22 = vld [vmem:[#allocation7 + $0x9f8] sm:$0xff] }
 0x2c5   :  { %5528 = vmatpush.bf16.msra.mxu0 %v8403_v16  ;;  %5497 = vmatmul.bf16.vlgmr.msrb.gmra.mxu1 %v758_v20  ;;  %v5199_v40 = vpop.f32.mrf.mxu2  ;;  %v8387_v16 = vld [vmem:[#allocation7 + $0x9b8] sm:$0xff] }
 0x2c6   :  { %5541 = vmatpush.bf16.msra.mxu1 %v8411_v31  ;;  %v5200_v3 = vadd.f32 %v5199_v40, %v9262_v58  ;;  %v5212_v11 = vpop.f32.mrf.mxu3  ;;  %v8406_v58 = vld [vmem:[#allocation7 + $0xa50] sm:$0xff]  ;;  %v8396_v31 = vld [vmem:[#allocation7 + $0xa00] sm:$0xff]  ;;  %v8443_v20 = vld [vmem:[#allocation7 + $0xb78] sm:$0xff] }
 0x2c7   :  { %5451 = vmatpush.bf16.msrb.mxu2 %v8354_v19  ;;  %v8404_v19 = vld [vmem:[#allocation7 + $0xa40] sm:$0xff]  ;;  %v8433_v40 = vld [vmem:[#allocation7 + $0xb28] sm:$0xff] }
 0x2c8   :  { %5464 = vmatpush.bf16.msrb.mxu3 %v8362_v4  ;;  %v5213_v7 = vadd.f32 %v5212_v11, %v5200_v3  ;;  %v8435_v4 = vld [vmem:[#allocation7 + $0xb38] sm:$0xff]  ;;  %v8441_v3 = vld [vmem:[#allocation7 + $0xb68] sm:$0xff]  ;;  %v8392_v11 = vld [vmem:[#allocation7 + $0x9e0] sm:$0xff] }
 0x2c9   :  { %5529 = vmatpush.bf16.msra.mxu0 %v8402_v9  ;;  %v5279_v56 = vpop.f32.mrf.mxu0  ;;  %v743_v9 = vpack.c.b16 %v9096_v47, %v9096_v47  ;;  %v8434_v47 = vld [vmem:[#allocation7 + $0xb30] sm:$0xff] }
 0x2ca   :  { %5542 = vmatpush.bf16.msra.mxu1 %v8410_v24  ;;  %v5226_v59 = vadd.f32 %v9255_v15, %v5213_v7  ;;  %v5292_v60 = vpop.f32.mrf.mxu1  ;;  %v8405_v15 = vld [vmem:[#allocation7 + $0xa48] sm:$0xff]  ;;  %v779_v24 = vsel %vm548_vm4, %v778_v21, %v9115_v13  ;;  %v8440_v7 = vld [vmem:[#allocation7 + $0xb60] sm:$0xff] }
 0x2cb   :  { %5452 = vmatpush.bf16.msrb.mxu2 %v8353_v30  ;;  %v8386_v30 = vld [vmem:[#allocation7 + $0x9b0] sm:$0xff]  ;;  %v8391_v60 = vld [vmem:[#allocation7 + $0x9d8] sm:$0xff] }
 0x2cc   :  { %5465 = vmatpush.bf16.msrb.mxu3 %v8361_v26  ;;  %v9279_v48 = vadd.f32 %v9257_v55, %v5226_v59  ;;  %v782_v55 = vrot.slane %v9115_v13, 1 }
 0x2cd   :  { %5530 = vmatpush.bf16.msra.mxu0 %v8401_v50  ;;  %v5201_v2 = vpop.f32.mrf.mxu2  ;;  %v748_v50 = vpack.c.b16 %v9099_v54, %v9099_v54  ;;  %v8384_v54 = vld [vmem:[#allocation7 + $0x9a0] sm:$0xff] }
 0x2ce   :  { %5543 = vmatpush.bf16.msra.mxu1 %v8409_v62  ;;  %v5214_v57 = vpop.f32.mrf.mxu3  ;;  %v783_v26 = vsel %vm548_vm4, %v9117_v34, %v782_v55  ;;  %v780_v62 = vpack.c.b16 %v779_v24, %v779_v24  ;;  %v8382_v2 = vld [vmem:[#allocation7 + $0x990] sm:$0xff]  ;;  %v8389_v55 = vld [vmem:[#allocation7 + $0x9c8] sm:$0xff]  ;;  %v801_v24 = vrot.slane %v9115_v13, 5 }
 0x2cf   :  { %5453 = vmatpush.bf16.msrb.mxu2 %v8352_v33  ;;  %v8394_v33 = vld [vmem:[#allocation7 + $0x9f0] sm:$0xff] }
 0x2d0   :  { %5466 = vmatpush.bf16.msrb.mxu3 %v8360_v38  ;;  %v784_v38 = vpack.c.b16 %v783_v26, %v783_v26  ;;  %v797_v26 = vrot.slane %v9117_v34, 3 }
 0x2d1   :  { %5531 = vmatpush.bf16.msra.mxu0 %v8400_v25  ;;  %v8442_v25 = vld [vmem:[#allocation7 + $0xb70] sm:$0xff] }
 0x2d2   :  { %5544 = vmatpush.bf16.msra.mxu1 %v8408_v39  ;;  %v8385_v39 = vld [vmem:[#allocation7 + $0x9a8] sm:$0xff] }
 0x2d3   :  { %5454 = vmatpush.bf16.msrb.mxu2 %v8351_v32  ;;  %v8393_v32 = vld [vmem:[#allocation7 + $0x9e8] sm:$0xff] }
 0x2d4   :  { %5467 = vmatpush.bf16.msrb.mxu3 %v8359_v43 }
 0x2d5   :  { %5532 = vmatpush.bf16.msra.mxu0 %v8399_v42 }
 0x2d6   :  { %5545 = vmatpush.bf16.msra.mxu1 %v8407_v44  ;;  %v8432_v44 = vld [vmem:[#allocation7 + $0xb20] sm:$0xff] }
 0x2d7   :  { %5455 = vmatpush.bf16.msrb.mxu2 %v8350_v27  ;;  %v8383_v27 = vld [vmem:[#allocation7 + $0x998] sm:$0xff] }
 0x2d8   :  { %5468 = vmatpush.bf16.msrb.mxu3 %v8358_v61  ;;  %v8431_v61 = vld [vmem:[#allocation7 + $0xb18] sm:$0xff] }
 0x2d9   :  { %5533 = vmatpush.bf16.msra.mxu0 %v8398_v1 }
 0x2da   :  { %5546 = vmatpush.bf16.msra.mxu1 %v8406_v58  ;;  %v8439_v58 = vld [vmem:[#allocation7 + $0xb58] sm:$0xff] }
 0x2db   :  { %5456 = vmatpush.bf16.msrb.mxu2 %v8349_v53 }
 0x2dc   :  { %5469 = vmatpush.bf16.msrb.mxu3 %v8357_v52 }
 0x2dd   :  { %5534 = vmatpush.bf16.msra.mxu0 %v8397_v37 }
 0x2de   :  { %5547 = vmatpush.bf16.msra.mxu1 %v8405_v15  ;;  %v8390_v15 = vld [vmem:[#allocation7 + $0x9d0] sm:$0xff] }
 0x2df   :  { %5457 = vmatpush.bf16.msrb.mxu2 %v8348_v14  ;;  %v8430_v14 = vld [vmem:[#allocation7 + $0xb10] sm:$0xff] }
 0x2e0   :  { %5470 = vmatpush.bf16.msrb.mxu3 %v8356_v17  ;;  %v8381_v17 = vld [vmem:[#allocation7 + $0x988] sm:$0xff] }
 0x2e1   :  { %5535 = vmatpush.bf16.msra.mxu0 %v8396_v31  ;;  %v9291_v43 = vpop.f32.mrf.mxu0 }
 0x2e2   :  { %5548 = vmatpush.bf16.msra.mxu1 %v8404_v19  ;;  %5458 = vmatmul.bf16.vlgmr.msrb.gmra.mxu2 %v743_v9  ;;  %v9293_v42 = vpop.f32.mrf.mxu1  ;;  %v8429_v19 = vld [vmem:[#allocation7 + $0xb08] sm:$0xff]  ;;  %v796_v9 = vrot.slane %v9115_v13, 4 }
 0x2e3   :  { %5502 = vmatpush.bf16.msra.mxu2 %v8387_v16  ;;  %5471 = vmatmul.bf16.vlgmr.msrb.gmra.mxu3 %v748_v50  ;;  %v8427_v50 = vld [vmem:[#allocation7 + $0xaf8] sm:$0xff] }
 0x2e4   :  { %5515 = vmatpush.bf16.msra.mxu3 %v8395_v22  ;;  %5536 = vmatmul.bf16.vlgmr.msra.gmra.mxu0 %v780_v62  ;;  %v8380_v22 = vld [vmem:[#allocation7 + $0x980] sm:$0xff]  ;;  %v8467_v62 = vld [vmem:[#allocation7 + $0xc38] sm:$0xff] }
 0x2e5   :  { %5580 = vmatpush.bf16.msrb.mxu0 %v8435_v4  ;;  %5549 = vmatmul.bf16.vlgmr.msra.gmra.mxu1 %v784_v38  ;;  %v5251_v59 = vpop.f32.mrf.mxu2  ;;  %v8419_v4 = vld [vmem:[#allocation7 + $0xab8] sm:$0xff] }
 0x2e6   :  { %5593 = vmatpush.bf16.msrb.mxu1 %v8443_v20  ;;  %v5252_v56 = vadd.f32 %v5251_v59, %v9279_v48  ;;  %v5264_v1 = vpop.f32.mrf.mxu3  ;;  %v8438_v48 = vld [vmem:[#allocation7 + $0xb50] sm:$0xff]  ;;  %v8388_v20 = vld [vmem:[#allocation7 + $0x9c0] sm:$0xff]  ;;  %v8475_v38 = vld [vmem:[#allocation7 + $0xc78] sm:$0xff] }
 0x2e7   :  { %5503 = vmatpush.bf16.msra.mxu2 %v8386_v30  ;;  %v8436_v30 = vld [vmem:[#allocation7 + $0xb40] sm:$0xff]  ;;  %v8465_v59 = vld [vmem:[#allocation7 + $0xc28] sm:$0xff] }
 0x2e8   :  { %5516 = vmatpush.bf16.msra.mxu3 %v8394_v33  ;;  %v5265_v53 = vadd.f32 %v5264_v1, %v5252_v56  ;;  %v802_v33 = vrot.slane %v9117_v34, 4  ;;  %v8473_v56 = vld [vmem:[#allocation7 + $0xc68] sm:$0xff]  ;;  %v8424_v1 = vld [vmem:[#allocation7 + $0xae0] sm:$0xff] }
 0x2e9   :  { %5581 = vmatpush.bf16.msrb.mxu0 %v8434_v47  ;;  %v5331_v37 = vpop.f32.mrf.mxu0  ;;  %v763_v47 = vpack.c.b16 %v9108_v51, %v9108_v51 }
 0x2ea   :  { %5594 = vmatpush.bf16.msrb.mxu1 %v8442_v25  ;;  %v5278_v52 = vadd.f32 %v9272_v29, %v5265_v53  ;;  %v5344_v57 = vpop.f32.mrf.mxu1  ;;  %v8437_v29 = vld [vmem:[#allocation7 + $0xb48] sm:$0xff]  ;;  %v798_v25 = vsel %vm548_vm4, %v797_v26, %v796_v9  ;;  %v8472_v53 = vld [vmem:[#allocation7 + $0xc60] sm:$0xff] }
 0x2eb   :  { %5504 = vmatpush.bf16.msra.mxu2 %v8385_v39  ;;  %v8418_v39 = vld [vmem:[#allocation7 + $0xab0] sm:$0xff]  ;;  %v8423_v57 = vld [vmem:[#allocation7 + $0xad8] sm:$0xff]  ;;  %v8413_v9 = vld [vmem:[#allocation7 + $0xa88] sm:$0xff] }
 0x2ec   :  { %5517 = vmatpush.bf16.msra.mxu3 %v8393_v32  ;;  %v9298_v16 = vadd.f32 %v9274_v28, %v5278_v52  ;;  %v8428_v28 = vld [vmem:[#allocation7 + $0xb00] sm:$0xff]  ;;  %v803_v32 = vsel %vm548_vm4, %v802_v33, %v801_v24  ;;  %v8461_v24 = vld [vmem:[#allocation7 + $0xc08] sm:$0xff]  ;;  %v791_v33 = vrot.slane %v9115_v13, 3 }
 0x2ed   :  { %5582 = vmatpush.bf16.msrb.mxu0 %v8433_v40  ;;  %v5253_v31 = vpop.f32.mrf.mxu2  ;;  %v768_v40 = vpack.c.b16 %v9113_v12, %v9113_v12  ;;  %v804_v51 = vpack.c.b16 %v803_v32, %v803_v32  ;;  %v8416_v12 = vld [vmem:[#allocation7 + $0xaa0] sm:$0xff]  ;;  %v8469_v26 = vld [vmem:[#allocation7 + $0xc48] sm:$0xff] }
 0x2ee   :  { %5595 = vmatpush.bf16.msrb.mxu1 %v8441_v3  ;;  %v5266_v21 = vpop.f32.mrf.mxu3  ;;  %v799_v3 = vpack.c.b16 %v798_v25, %v798_v25  ;;  %v8414_v31 = vld [vmem:[#allocation7 + $0xa90] sm:$0xff]  ;;  %v8468_v32 = vld [vmem:[#allocation7 + $0xc40] sm:$0xff] }
 0x2ef   :  { %5505 = vmatpush.bf16.msra.mxu2 %v8384_v54  ;;  %v8426_v54 = vld [vmem:[#allocation7 + $0xaf0] sm:$0xff] }
 0x2f0   :  { %5518 = vmatpush.bf16.msra.mxu3 %v8392_v11  ;;  %v8466_v11 = vld [vmem:[#allocation7 + $0xc30] sm:$0xff] }
 0x2f1   :  { %5583 = vmatpush.bf16.msrb.mxu0 %v8432_v44  ;;  %v8474_v44 = vld [vmem:[#allocation7 + $0xc70] sm:$0xff] }
 0x2f2   :  { %5596 = vmatpush.bf16.msrb.mxu1 %v8440_v7  ;;  %v8417_v7 = vld [vmem:[#allocation7 + $0xaa8] sm:$0xff] }
 0x2f3   :  { %5506 = vmatpush.bf16.msra.mxu2 %v8383_v27  ;;  %v8425_v27 = vld [vmem:[#allocation7 + $0xae8] sm:$0xff] }
 0x2f4   :  { %5519 = vmatpush.bf16.msra.mxu3 %v8391_v60 }
 0x2f5   :  { %5584 = vmatpush.bf16.msrb.mxu0 %v8431_v61 }
 0x2f6   :  { %5597 = vmatpush.bf16.msrb.mxu1 %v8439_v58  ;;  %v8464_v58 = vld [vmem:[#allocation7 + $0xc20] sm:$0xff] }
 0x2f7   :  { %5507 = vmatpush.bf16.msra.mxu2 %v8382_v2  ;;  %v8415_v2 = vld [vmem:[#allocation7 + $0xa98] sm:$0xff] }
 0x2f8   :  { %5520 = vmatpush.bf16.msra.mxu3 %v8390_v15  ;;  %v8463_v15 = vld [vmem:[#allocation7 + $0xc18] sm:$0xff] }
 0x2f9   :  { %5585 = vmatpush.bf16.msrb.mxu0 %v8430_v14 }
 0x2fa   :  { %5598 = vmatpush.bf16.msrb.mxu1 %v8438_v48  ;;  %v8471_v48 = vld [vmem:[#allocation7 + $0xc58] sm:$0xff] }
 0x2fb   :  { %5508 = vmatpush.bf16.msra.mxu2 %v8381_v17 }
 0x2fc   :  { %5521 = vmatpush.bf16.msra.mxu3 %v8389_v55 }
 0x2fd   :  { %5586 = vmatpush.bf16.msrb.mxu0 %v8429_v19 }
 0x2fe   :  { %5599 = vmatpush.bf16.msrb.mxu1 %v8437_v29  ;;  %v8422_v29 = vld [vmem:[#allocation7 + $0xad0] sm:$0xff] }
 0x2ff   :  { %5509 = vmatpush.bf16.msra.mxu2 %v8380_v22  ;;  %v8462_v22 = vld [vmem:[#allocation7 + $0xc10] sm:$0xff] }
 0x300   :  { %5522 = vmatpush.bf16.msra.mxu3 %v8388_v20 }
 0x301   :  { %5587 = vmatpush.bf16.msrb.mxu0 %v8428_v28  ;;  %v9310_v60 = vpop.f32.mrf.mxu0  ;;  %v8421_v28 = vld [vmem:[#allocation7 + $0xac8] sm:$0xff] }
 0x302   :  { %5600 = vmatpush.bf16.msrb.mxu1 %v8436_v30  ;;  %5510 = vmatmul.bf16.vlgmr.msra.gmra.mxu2 %v763_v47  ;;  %v9312_v61 = vpop.f32.mrf.mxu1  ;;  %v8420_v47 = vld [vmem:[#allocation7 + $0xac0] sm:$0xff] }
 0x303   :  { %5554 = vmatpush.bf16.msrb.mxu2 %v8419_v4  ;;  %5523 = vmatmul.bf16.vlgmr.msra.gmra.mxu3 %v768_v40  ;;  %v8459_v40 = vld [vmem:[#allocation7 + $0xbf8] sm:$0xff] }
 0x304   :  { %5567 = vmatpush.bf16.msrb.mxu3 %v8427_v50  ;;  %5588 = vmatmul.bf16.vlgmr.msrb.gmra.mxu0 %v799_v3  ;;  %v8412_v50 = vld [vmem:[#allocation7 + $0xa80] sm:$0xff]  ;;  %v8499_v3 = vld [vmem:[#allocation7 + $0xd38] sm:$0xff] }
 0x305   :  { %5632 = vmatpush.bf16.msra.mxu0 %v8467_v62  ;;  %5601 = vmatmul.bf16.vlgmr.msrb.gmra.mxu1 %v804_v51  ;;  %v5303_v52 = vpop.f32.mrf.mxu2  ;;  %v787_v62 = vrot.slane %v9117_v34, 1  ;;  %v8507_v51 = vld [vmem:[#allocation7 + $0xd78] sm:$0xff] }
 0x306   :  { %5645 = vmatpush.bf16.msra.mxu1 %v8475_v38  ;;  %v5304_v37 = vadd.f32 %v5303_v52, %v9298_v16  ;;  %v5316_v14 = vpop.f32.mrf.mxu3  ;;  %v8470_v16 = vld [vmem:[#allocation7 + $0xc50] sm:$0xff]  ;;  %v8460_v38 = vld [vmem:[#allocation7 + $0xc00] sm:$0xff] }
 0x307   :  { %5555 = vmatpush.bf16.msrb.mxu2 %v8418_v39  ;;  %v792_v39 = vrot.slane %v9117_v34, 2  ;;  %v826_v34 = vpack.c.b16 %v9128_v36, %v9128_v36  ;;  %v8448_v36 = vld [vmem:[#allocation7 + $0xba0] sm:$0xff] }
 0x308   :  { %5568 = vmatpush.bf16.msrb.mxu3 %v8426_v54  ;;  %v5317_v17 = vadd.f32 %v5316_v14, %v5304_v37  ;;  %v8496_v37 = vld [vmem:[#allocation7 + $0xd20] sm:$0xff] }
 0x309   :  { %5633 = vmatpush.bf16.msra.mxu0 %v8466_v11  ;;  %v5383_v19 = vpop.f32.mrf.mxu0  ;;  %v793_v54 = vsel %vm548_vm4, %v792_v39, %v791_v33  ;;  %v8444_v33 = vld [vmem:[#allocation7 + $0xb80] sm:$0xff]  ;;  %v8531_v39 = vld [vmem:[#allocation7 + $0xe38] sm:$0xff] }
 0x30a   :  { %5646 = vmatpush.bf16.msra.mxu1 %v8474_v44  ;;  %v5330_v55 = vadd.f32 %v9291_v43, %v5317_v17  ;;  %v5396_v21 = vpop.f32.mrf.mxu1  ;;  %v786_v43 = vrot.slane %v9115_v13, 2  ;;  %v8450_v13 = vld [vmem:[#allocation7 + $0xbb0] sm:$0xff]  ;;  %v794_v44 = vpack.c.b16 %v793_v54, %v793_v54  ;;  %v8455_v17 = vld [vmem:[#allocation7 + $0xbd8] sm:$0xff]  ;;  %v814_v54 = vpack.c.b16 %v9148_v63, %v9148_v63  ;;  %v8489_v63 = vld [vmem:[#allocation7 + $0xce8] sm:$0xff] }
 0x30b   :  { %5556 = vmatpush.bf16.msrb.mxu2 %v8417_v7  ;;  %v8458_v7 = vld [vmem:[#allocation7 + $0xbf0] sm:$0xff]  ;;  %v8503_v19 = vld [vmem:[#allocation7 + $0xd58] sm:$0xff] }
 0x30c   :  { %5569 = vmatpush.bf16.msrb.mxu3 %v8425_v27  ;;  %v9317_v4 = vadd.f32 %v9293_v42, %v5330_v55  ;;  %v8451_v42 = vld [vmem:[#allocation7 + $0xbb8] sm:$0xff]  ;;  %v788_v25 = vsel %vm548_vm4, %v787_v62, %v786_v43  ;;  %v8498_v27 = vld [vmem:[#allocation7 + $0xd30] sm:$0xff] }
 0x30d   :  { %5634 = vmatpush.bf16.msra.mxu0 %v8465_v59  ;;  %v5305_v20 = vpop.f32.mrf.mxu2  ;;  %v789_v11 = vpack.c.b16 %v788_v25, %v788_v25  ;;  %v830_v59 = vpack.c.b16 %v9133_v6, %v9133_v6  ;;  %v8456_v6 = vld [vmem:[#allocation7 + $0xbe0] sm:$0xff]  ;;  %v8491_v25 = vld [vmem:[#allocation7 + $0xcf8] sm:$0xff] }
 0x30e   :  { %5647 = vmatpush.bf16.msra.mxu1 %v8473_v56  ;;  %v5318_v30 = vpop.f32.mrf.mxu3  ;;  %v8506_v56 = vld [vmem:[#allocation7 + $0xd70] sm:$0xff] }
 0x30f   :  { %5557 = vmatpush.bf16.msrb.mxu2 %v8416_v12  ;;  %v8449_v12 = vld [vmem:[#allocation7 + $0xba8] sm:$0xff]  ;;  %v8454_v20 = vld [vmem:[#allocation7 + $0xbd0] sm:$0xff] }
 0x310   :  { %5570 = vmatpush.bf16.msrb.mxu3 %v8424_v1  ;;  %v8457_v1 = vld [vmem:[#allocation7 + $0xbe8] sm:$0xff] }
 0x311   :  { %5635 = vmatpush.bf16.msra.mxu0 %v8464_v58  ;;  %v8497_v58 = vld [vmem:[#allocation7 + $0xd28] sm:$0xff] }
 0x312   :  { %5648 = vmatpush.bf16.msra.mxu1 %v8472_v53  ;;  %v8505_v53 = vld [vmem:[#allocation7 + $0xd68] sm:$0xff] }
 0x313   :  { %5558 = vmatpush.bf16.msrb.mxu2 %v8415_v2  ;;  %v8445_v30 = vld [vmem:[#allocation7 + $0xb88] sm:$0xff] }
 0x314   :  { %5571 = vmatpush.bf16.msrb.mxu3 %v8423_v57  ;;  %v8504_v57 = vld [vmem:[#allocation7 + $0xd60] sm:$0xff] }
 0x315   :  { %5636 = vmatpush.bf16.msra.mxu0 %v8463_v15  ;;  %v8447_v15 = vld [vmem:[#allocation7 + $0xb98] sm:$0xff] }
 0x316   :  { %5649 = vmatpush.bf16.msra.mxu1 %v8471_v48 }
 0x317   :  { %5559 = vmatpush.bf16.msrb.mxu2 %v8414_v31  ;;  %v8495_v31 = vld [vmem:[#allocation7 + $0xd18] sm:$0xff] }
 0x318   :  { %5572 = vmatpush.bf16.msrb.mxu3 %v8422_v29  ;;  %v8446_v29 = vld [vmem:[#allocation7 + $0xb90] sm:$0xff] }
 0x319   :  { %5637 = vmatpush.bf16.msra.mxu0 %v8462_v22 }
 0x31a   :  { %5650 = vmatpush.bf16.msra.mxu1 %v8470_v16 }
 0x31b   :  { %5560 = vmatpush.bf16.msrb.mxu2 %v8413_v9 }
 0x31c   :  { %5573 = vmatpush.bf16.msrb.mxu3 %v8421_v28  ;;  %v8494_v28 = vld [vmem:[#allocation7 + $0xd10] sm:$0xff] }
 0x31d   :  { %5638 = vmatpush.bf16.msra.mxu0 %v8461_v24 }
 0x31e   :  { %5651 = vmatpush.bf16.msra.mxu1 %v8469_v26  ;;  %v8453_v26 = vld [vmem:[#allocation7 + $0xbc8] sm:$0xff] }
 0x31f   :  { %5561 = vmatpush.bf16.msrb.mxu2 %v8412_v50  ;;  %v8493_v50 = vld [vmem:[#allocation7 + $0xd08] sm:$0xff] }
 0x320   :  { %5574 = vmatpush.bf16.msrb.mxu3 %v8420_v47  ;;  %v8452_v47 = vld [vmem:[#allocation7 + $0xbc0] sm:$0xff] }
 0x321   :  { %5639 = vmatpush.bf16.msra.mxu0 %v8460_v38  ;;  %v9329_v2 = vpop.f32.mrf.mxu0  ;;  %v8492_v38 = vld [vmem:[#allocation7 + $0xd00] sm:$0xff] }
 0x322   :  { %5652 = vmatpush.bf16.msra.mxu1 %v8468_v32  ;;  %5562 = vmatmul.bf16.vlgmr.msrb.gmra.mxu2 %v789_v11  ;;  %v9331_v52 = vpop.f32.mrf.mxu1  ;;  %v809_v32 = vpack.c.b16 %v9141_v49, %v9141_v49  ;;  %v845_v11 = vpack.c.b16 %v9151_v0, %v9151_v0  ;;  %v850_v49 = vpack.c.b16 %v9156_v10, %v9156_v10  ;;  %v8480_v0 = vld [vmem:[#allocation7 + $0xca0] sm:$0xff] }
 0x323   :  { %5606 = vmatpush.bf16.msra.mxu2 %v8451_v42  ;;  %5575 = vmatmul.bf16.vlgmr.msrb.gmra.mxu3 %v794_v44  ;;  %v8483_v42 = vld [vmem:[#allocation7 + $0xcb8] sm:$0xff]  ;;  %v8538_v44 = vld [vmem:[#allocation7 + $0xe70] sm:$0xff]  ;;  %v8488_v10 = vld [vmem:[#allocation7 + $0xce0] sm:$0xff] }
 0x324   :  { %5619 = vmatpush.bf16.msra.mxu3 %v8459_v40  ;;  %5640 = vmatmul.bf16.vlgmr.msra.gmra.mxu0 %v826_v34  ;;  %v8539_v40 = vld [vmem:[#allocation7 + $0xe78] sm:$0xff]  ;;  %v8481_v34 = vld [vmem:[#allocation7 + $0xca8] sm:$0xff] }
 0x325   :  { %5684 = vmatpush.bf16.msrb.mxu0 %v8499_v3  ;;  %5653 = vmatmul.bf16.vlgmr.msra.gmra.mxu1 %v830_v59  ;;  %v5355_v14 = vpop.f32.mrf.mxu2  ;;  %v8482_v3 = vld [vmem:[#allocation7 + $0xcb0] sm:$0xff] }
 0x326   :  { %5697 = vmatpush.bf16.msrb.mxu1 %v8507_v51  ;;  %v5356_v48 = vadd.f32 %v5355_v14, %v9317_v4  ;;  %v5368_v55 = vpop.f32.mrf.mxu3  ;;  %v8502_v4 = vld [vmem:[#allocation7 + $0xd50] sm:$0xff] }
 0x327   :  { %5607 = vmatpush.bf16.msra.mxu2 %v8450_v13  ;;  %v8490_v51 = vld [vmem:[#allocation7 + $0xcf0] sm:$0xff] }
 0x328   :  { %5620 = vmatpush.bf16.msra.mxu3 %v8458_v7  ;;  %v5369_v21 = vadd.f32 %v5368_v55, %v5356_v48  ;;  %v8530_v13 = vld [vmem:[#allocation7 + $0xe30] sm:$0xff]  ;;  %v8529_v7 = vld [vmem:[#allocation7 + $0xe28] sm:$0xff] }
 0x329   :  { %5685 = vmatpush.bf16.msrb.mxu0 %v8498_v27  ;;  %v5435_v16 = vpop.f32.mrf.mxu0  ;;  %v8537_v27 = vld [vmem:[#allocation7 + $0xe68] sm:$0xff]  ;;  %v8478_v48 = vld [vmem:[#allocation7 + $0xc90] sm:$0xff] }
 0x32a   :  { %5698 = vmatpush.bf16.msrb.mxu1 %v8506_v56  ;;  %v5382_v22 = vadd.f32 %v9310_v60, %v5369_v21  ;;  %v5448_v9 = vpop.f32.mrf.mxu1  ;;  %v8501_v60 = vld [vmem:[#allocation7 + $0xd48] sm:$0xff]  ;;  %v8526_v21 = vld [vmem:[#allocation7 + $0xe10] sm:$0xff] }
 0x32b   :  { %5608 = vmatpush.bf16.msra.mxu2 %v8449_v12  ;;  %v8528_v12 = vld [vmem:[#allocation7 + $0xe20] sm:$0xff]  ;;  %v8477_v16 = vld [vmem:[#allocation7 + $0xc88] sm:$0xff] }
 0x32c   :  { %5621 = vmatpush.bf16.msra.mxu3 %v8457_v1  ;;  %v9336_v24 = vadd.f32 %v9312_v61, %v5382_v22  ;;  %v8500_v61 = vld [vmem:[#allocation7 + $0xd40] sm:$0xff] }
 0x32d   :  { %5686 = vmatpush.bf16.msrb.mxu0 %v8497_v58  ;;  %v5357_v43 = vpop.f32.mrf.mxu2  ;;  %v8536_v1 = vld [vmem:[#allocation7 + $0xe60] sm:$0xff]  ;;  %v8479_v58 = vld [vmem:[#allocation7 + $0xc98] sm:$0xff] }
 0x32e   :  { %5699 = vmatpush.bf16.msrb.mxu1 %v8505_v53  ;;  %v5370_v62 = vpop.f32.mrf.mxu3  ;;  %v8484_v43 = vld [vmem:[#allocation7 + $0xcc0] sm:$0xff] }
 0x32f   :  { %5609 = vmatpush.bf16.msra.mxu2 %v8448_v36  ;;  %v870_v62 = vrot.slane %v9177_v35, 7 }
 0x330   :  { %5622 = vmatpush.bf16.msra.mxu3 %v8456_v6  ;;  %v8487_v6 = vld [vmem:[#allocation7 + $0xcd8] sm:$0xff] }
 0x331   :  { %5687 = vmatpush.bf16.msrb.mxu0 %v8496_v37  ;;  %v8527_v37 = vld [vmem:[#allocation7 + $0xe18] sm:$0xff] }
 0x332   :  { %5700 = vmatpush.bf16.msrb.mxu1 %v8504_v57 }
 0x333   :  { %5610 = vmatpush.bf16.msra.mxu2 %v8447_v15  ;;  %v8535_v15 = vld [vmem:[#allocation7 + $0xe58] sm:$0xff] }
 0x334   :  { %5623 = vmatpush.bf16.msra.mxu3 %v8455_v17 }
 0x335   :  { %5688 = vmatpush.bf16.msrb.mxu0 %v8495_v31 }
 0x336   :  { %5701 = vmatpush.bf16.msrb.mxu1 %v8503_v19  ;;  %v8486_v19 = vld [vmem:[#allocation7 + $0xcd0] sm:$0xff] }
 0x337   :  { %5611 = vmatpush.bf16.msra.mxu2 %v8446_v29  ;;  %v8534_v29 = vld [vmem:[#allocation7 + $0xe50] sm:$0xff] }
 0x338   :  { %5624 = vmatpush.bf16.msra.mxu3 %v8454_v20  ;;  %v8485_v20 = vld [vmem:[#allocation7 + $0xcc8] sm:$0xff] }
 0x339   :  { %5689 = vmatpush.bf16.msrb.mxu0 %v8494_v28  ;;  %v8525_v28 = vld [vmem:[#allocation7 + $0xe08] sm:$0xff] }
 0x33a   :  { %5702 = vmatpush.bf16.msrb.mxu1 %v8502_v4 }
 0x33b   :  { %5612 = vmatpush.bf16.msra.mxu2 %v8445_v30  ;;  %v8515_v30 = vld [vmem:[#allocation7 + $0xdb8] sm:$0xff] }
 0x33c   :  { %5625 = vmatpush.bf16.msra.mxu3 %v8453_v26  ;;  %v8524_v26 = vld [vmem:[#allocation7 + $0xe00] sm:$0xff] }
 0x33d   :  { %5690 = vmatpush.bf16.msrb.mxu0 %v8493_v50  ;;  %v8532_v50 = vld [vmem:[#allocation7 + $0xe40] sm:$0xff] }
 0x33e   :  { %5703 = vmatpush.bf16.msrb.mxu1 %v8501_v60  ;;  %v8523_v60 = vld [vmem:[#allocation7 + $0xdf8] sm:$0xff] }
 0x33f   :  { %5613 = vmatpush.bf16.msra.mxu2 %v8444_v33  ;;  %v8563_v33 = vld [vmem:[#allocation7 + $0xf38] sm:$0xff] }
 0x340   :  { %5626 = vmatpush.bf16.msra.mxu3 %v8452_v47  ;;  %v8571_v47 = vld [vmem:[#allocation7 + $0xf78] sm:$0xff] }
 0x341   :  { %5691 = vmatpush.bf16.msrb.mxu0 %v8492_v38  ;;  %v9346_v59 = vpop.f32.mrf.mxu0  ;;  %v871_v38 = vsel %vm548_vm4, %v870_v62, %v9175_v41 }
 0x342   :  { %5704 = vmatpush.bf16.msrb.mxu1 %v8500_v61  ;;  %5614 = vmatmul.bf16.vlgmr.msra.gmra.mxu2 %v809_v32  ;;  %v9348_v56 = vpop.f32.mrf.mxu1  ;;  %v8514_v61 = vld [vmem:[#allocation7 + $0xdb0] sm:$0xff]  ;;  %v872_v32 = vpack.c.b16 %v871_v38, %v871_v38 }
 0x343   :  { %5658 = vmatpush.bf16.msrb.mxu2 %v8483_v42  ;;  %5627 = vmatmul.bf16.vlgmr.msra.gmra.mxu3 %v814_v54  ;;  %v835_v42 = vpack.c.b16 %v9161_v18, %v9161_v18  ;;  %v8562_v18 = vld [vmem:[#allocation7 + $0xf30] sm:$0xff] }
 0x344   :  { %5671 = vmatpush.bf16.msrb.mxu3 %v8491_v25  ;;  %5692 = vmatmul.bf16.vlgmr.msrb.gmra.mxu0 %v845_v11  ;;  %v8570_v54 = vld [vmem:[#allocation7 + $0xf70] sm:$0xff]  ;;  %v8513_v11 = vld [vmem:[#allocation7 + $0xda8] sm:$0xff] }
 0x345   :  { %5736 = vmatpush.bf16.msra.mxu0 %v8531_v39  ;;  %5705 = vmatmul.bf16.vlgmr.msrb.gmra.mxu1 %v850_v49  ;;  %v5407_v53 = vpop.f32.mrf.mxu2  ;;  %v840_v39 = vpack.c.b16 %v9170_v23, %v9170_v23  ;;  %v8569_v49 = vld [vmem:[#allocation7 + $0xf68] sm:$0xff]  ;;  %v8512_v23 = vld [vmem:[#allocation7 + $0xda0] sm:$0xff]  ;;  %v8554_v38 = vld [vmem:[#allocation7 + $0xef0] sm:$0xff] }
 0x346   :  { %5749 = vmatpush.bf16.msra.mxu1 %v8539_v40  ;;  %v5408_v36 = vadd.f32 %v5407_v53, %v9336_v24  ;;  %v5420_v57 = vpop.f32.mrf.mxu3  ;;  %v8476_v24 = vld [vmem:[#allocation7 + $0xc80] sm:$0xff]  ;;  %v8522_v40 = vld [vmem:[#allocation7 + $0xdf0] sm:$0xff] }
 0x347   :  { %5659 = vmatpush.bf16.msrb.mxu2 %v8482_v3 }
 0x348   :  { %5672 = vmatpush.bf16.msrb.mxu3 %v8490_v51  ;;  %v5421_v14 = vadd.f32 %v5420_v57, %v5408_v36  ;;  %v8521_v51 = vld [vmem:[#allocation7 + $0xde8] sm:$0xff]  ;;  %v8567_v36 = vld [vmem:[#allocation7 + $0xf58] sm:$0xff] }
 0x349   :  { %5737 = vmatpush.bf16.msra.mxu0 %v8530_v13  ;;  %v5487_v31 = vpop.f32.mrf.mxu0  ;;  %v8561_v13 = vld [vmem:[#allocation7 + $0xf28] sm:$0xff] }
 0x34a   :  { %5750 = vmatpush.bf16.msra.mxu1 %v8538_v44  ;;  %v5434_v17 = vadd.f32 %v9329_v2, %v5421_v14  ;;  %v5500_v55 = vpop.f32.mrf.mxu1  ;;  %v8533_v2 = vld [vmem:[#allocation7 + $0xe48] sm:$0xff]  ;;  %v8566_v31 = vld [vmem:[#allocation7 + $0xf50] sm:$0xff] }
 0x34b   :  { %5660 = vmatpush.bf16.msrb.mxu2 %v8481_v34 }
 0x34c   :  { %5673 = vmatpush.bf16.msrb.mxu3 %v8489_v63  ;;  %v9353_v22 = vadd.f32 %v9331_v52, %v5434_v17  ;;  %v874_v52 = vrot.slane %v9175_v41, 1  ;;  %v8520_v63 = vld [vmem:[#allocation7 + $0xde0] sm:$0xff]  ;;  %v8558_v17 = vld [vmem:[#allocation7 + $0xf10] sm:$0xff] }
 0x34d   :  { %5738 = vmatpush.bf16.msra.mxu0 %v8529_v7  ;;  %v5409_v9 = vpop.f32.mrf.mxu2  ;;  %v8560_v7 = vld [vmem:[#allocation7 + $0xf20] sm:$0xff] }
 0x34e   :  { %5751 = vmatpush.bf16.msra.mxu1 %v8537_v27  ;;  %v5422_v4 = vpop.f32.mrf.mxu3  ;;  %v875_v25 = vsel %vm548_vm4, %v9177_v35, %v874_v52  ;;  %v8568_v27 = vld [vmem:[#allocation7 + $0xf60] sm:$0xff]  ;;  %v855_v52 = vpack.c.b16 %v9180_v45, %v9180_v45  ;;  %v8553_v45 = vld [vmem:[#allocation7 + $0xee8] sm:$0xff] }
 0x34f   :  { %5661 = vmatpush.bf16.msrb.mxu2 %v8480_v0  ;;  %v876_v3 = vpack.c.b16 %v875_v25, %v875_v25  ;;  %v8511_v0 = vld [vmem:[#allocation7 + $0xd98] sm:$0xff]  ;;  %v8508_v9 = vld [vmem:[#allocation7 + $0xd80] sm:$0xff]  ;;  %v893_v4 = vrot.slane %v9175_v41, 5 }
 0x350   :  { %5674 = vmatpush.bf16.msrb.mxu3 %v8488_v10  ;;  %v8544_v25 = vld [vmem:[#allocation7 + $0xea0] sm:$0xff] }
 0x351   :  { %5739 = vmatpush.bf16.msra.mxu0 %v8528_v12 }
 0x352   :  { %5752 = vmatpush.bf16.msra.mxu1 %v8536_v1  ;;  %v8519_v1 = vld [vmem:[#allocation7 + $0xdd8] sm:$0xff] }
 0x353   :  { %5662 = vmatpush.bf16.msrb.mxu2 %v8479_v58  ;;  %v8559_v58 = vld [vmem:[#allocation7 + $0xf18] sm:$0xff] }
 0x354   :  { %5675 = vmatpush.bf16.msrb.mxu3 %v8487_v6 }
 0x355   :  { %5740 = vmatpush.bf16.msra.mxu0 %v8527_v37  ;;  %v8510_v37 = vld [vmem:[#allocation7 + $0xd90] sm:$0xff] }
 0x356   :  { %5753 = vmatpush.bf16.msra.mxu1 %v8535_v15 }
 0x357   :  { %5663 = vmatpush.bf16.msrb.mxu2 %v8478_v48  ;;  %v8518_v48 = vld [vmem:[#allocation7 + $0xdd0] sm:$0xff] }
 0x358   :  { %5676 = vmatpush.bf16.msrb.mxu3 %v8486_v19  ;;  %v8509_v19 = vld [vmem:[#allocation7 + $0xd88] sm:$0xff] }
 0x359   :  { %5741 = vmatpush.bf16.msra.mxu0 %v8526_v21 }
 0x35a   :  { %5754 = vmatpush.bf16.msra.mxu1 %v8534_v29  ;;  %v8517_v29 = vld [vmem:[#allocation7 + $0xdc8] sm:$0xff] }
 0x35b   :  { %5664 = vmatpush.bf16.msrb.mxu2 %v8477_v16 }
 0x35c   :  { %5677 = vmatpush.bf16.msrb.mxu3 %v8485_v20  ;;  %v8547_v20 = vld [vmem:[#allocation7 + $0xeb8] sm:$0xff] }
 0x35d   :  { %5742 = vmatpush.bf16.msra.mxu0 %v8525_v28  ;;  %v888_v28 = vrot.slane %v9175_v41, 4 }
 0x35e   :  { %5755 = vmatpush.bf16.msra.mxu1 %v8533_v2  ;;  %v8556_v2 = vld [vmem:[#allocation7 + $0xf00] sm:$0xff] }
 0x35f   :  { %5665 = vmatpush.bf16.msrb.mxu2 %v8476_v24  ;;  %v8564_v24 = vld [vmem:[#allocation7 + $0xf40] sm:$0xff] }
 0x360   :  { %5678 = vmatpush.bf16.msrb.mxu3 %v8484_v43  ;;  %v894_v43 = vrot.slane %v9177_v35, 4 }
 0x361   :  { %5743 = vmatpush.bf16.msra.mxu0 %v8524_v26  ;;  %v9365_v44 = vpop.f32.mrf.mxu0  ;;  %v8555_v26 = vld [vmem:[#allocation7 + $0xef8] sm:$0xff] }
 0x362   :  { %5756 = vmatpush.bf16.msra.mxu1 %v8532_v50  ;;  %5666 = vmatmul.bf16.vlgmr.msrb.gmra.mxu2 %v835_v42  ;;  %v9367_v34 = vpop.f32.mrf.mxu1  ;;  %v8546_v50 = vld [vmem:[#allocation7 + $0xeb0] sm:$0xff] }
 0x363   :  { %5710 = vmatpush.bf16.msra.mxu2 %v8515_v30  ;;  %5679 = vmatmul.bf16.vlgmr.msrb.gmra.mxu3 %v840_v39  ;;  %v889_v30 = vrot.slane %v9177_v35, 3 }
 0x364   :  { %5723 = vmatpush.bf16.msra.mxu3 %v8523_v60  ;;  %5744 = vmatmul.bf16.vlgmr.msra.gmra.mxu0 %v872_v32  ;;  %v895_v60 = vsel %vm548_vm4, %v894_v43, %v893_v4  ;;  %v8574_v4 = vld [vmem:[#allocation7 + $0xf90] sm:$0xff] }
 0x365   :  { %5788 = vmatpush.bf16.msrb.mxu0 %v8563_v33  ;;  %5757 = vmatmul.bf16.vlgmr.msra.gmra.mxu1 %v876_v3  ;;  %v5459_v10 = vpop.f32.mrf.mxu2  ;;  %v890_v62 = vsel %vm548_vm4, %v889_v30, %v888_v28  ;;  %v860_v33 = vpack.c.b16 %v9183_v46, %v9183_v46  ;;  %v8543_v46 = vld [vmem:[#allocation7 + $0xe98] sm:$0xff]  ;;  %v8582_v30 = vld [vmem:[#allocation7 + $0xfd0] sm:$0xff] }
 0x366   :  { %5801 = vmatpush.bf16.msrb.mxu1 %v8571_v47  ;;  %v5460_v12 = vadd.f32 %v5459_v10, %v9353_v22  ;;  %v5472_v53 = vpop.f32.mrf.mxu3  ;;  %v8557_v22 = vld [vmem:[#allocation7 + $0xf08] sm:$0xff]  ;;  %v891_v42 = vpack.c.b16 %v890_v62, %v890_v62  ;;  %v896_v47 = vpack.c.b16 %v895_v60, %v895_v60 }
 0x367   :  { %5711 = vmatpush.bf16.msra.mxu2 %v8514_v61  ;;  %v8545_v61 = vld [vmem:[#allocation7 + $0xea8] sm:$0xff] }
 0x368   :  { %5724 = vmatpush.bf16.msra.mxu3 %v8522_v40  ;;  %v5473_v6 = vadd.f32 %v5472_v53, %v5460_v12  ;;  %v8552_v40 = vld [vmem:[#allocation7 + $0xee0] sm:$0xff]  ;;  %v878_v12 = vrot.slane %v9175_v41, 2  ;;  %v8581_v62 = vld [vmem:[#allocation7 + $0xfc8] sm:$0xff] }
 0x369   :  { %5789 = vmatpush.bf16.msrb.mxu0 %v8562_v18  ;;  %v5539_v15 = vpop.f32.mrf.mxu0  ;;  %v8540_v53 = vld [vmem:[#allocation7 + $0xe80] sm:$0xff] }
 0x36a   :  { %5802 = vmatpush.bf16.msrb.mxu1 %v8570_v54  ;;  %v5486_v57 = vadd.f32 %v9346_v59, %v5473_v6  ;;  %v5552_v14 = vpop.f32.mrf.mxu1  ;;  %v8565_v59 = vld [vmem:[#allocation7 + $0xf48] sm:$0xff]  ;;  %v8551_v54 = vld [vmem:[#allocation7 + $0xed8] sm:$0xff]  ;;  %v884_v15 = vrot.slane %v9177_v35, 2 }
 0x36b   :  { %5712 = vmatpush.bf16.msra.mxu2 %v8513_v11  ;;  %v8579_v6 = vld [vmem:[#allocation7 + $0xfb8] sm:$0xff] }
 0x36c   :  { %5725 = vmatpush.bf16.msra.mxu3 %v8521_v51  ;;  %v5499_v55 = vadd.f32 %v9348_v56, %v5486_v57  ;;  %v8516_v56 = vld [vmem:[#allocation7 + $0xdc0] sm:$0xff] }
 0x36d   :  { %5790 = vmatpush.bf16.msrb.mxu0 %v8561_v13  ;;  %v5461_v21 = vpop.f32.mrf.mxu2  ;;  %v8542_v13 = vld [vmem:[#allocation7 + $0xe90] sm:$0xff]  ;;  %v8548_v57 = vld [vmem:[#allocation7 + $0xec0] sm:$0xff] }
 0x36e   :  { %5803 = vmatpush.bf16.msrb.mxu1 %v8569_v49  ;;  %v5474_v16 = vpop.f32.mrf.mxu3  ;;  %v8576_v21 = vld [vmem:[#allocation7 + $0xfa0] sm:$0xff] }
 0x36f   :  { %5713 = vmatpush.bf16.msra.mxu2 %v8512_v23  ;;  %v8575_v16 = vld [vmem:[#allocation7 + $0xf98] sm:$0xff] }
 0x370   :  { %5726 = vmatpush.bf16.msra.mxu3 %v8520_v63 }
 0x371   :  { %5791 = vmatpush.bf16.msrb.mxu0 %v8560_v7  ;;  %v8550_v7 = vld [vmem:[#allocation7 + $0xed0] sm:$0xff] }
 0x372   :  { %5804 = vmatpush.bf16.msrb.mxu1 %v8568_v27  ;;  %v8541_v27 = vld [vmem:[#allocation7 + $0xe88] sm:$0xff] }
 0x373   :  { %5714 = vmatpush.bf16.msra.mxu2 %v8511_v0 }
 0x374   :  { %5727 = vmatpush.bf16.msra.mxu3 %v8519_v1  ;;  %v8549_v1 = vld [vmem:[#allocation7 + $0xec8] sm:$0xff] }
 0x375   :  { %5792 = vmatpush.bf16.msrb.mxu0 %v8559_v58 }
 0x376   :  { %5805 = vmatpush.bf16.msrb.mxu1 %v8567_v36  ;;  %v879_v36 = vrot.slane %v9177_v35, 1 }
 0x377   :  { %5715 = vmatpush.bf16.msra.mxu2 %v8510_v37 }
 0x378   :  { %5728 = vmatpush.bf16.msra.mxu3 %v8518_v48  ;;  %v880_v37 = vsel %vm548_vm4, %v879_v36, %v878_v12 }
 0x379   :  { %5793 = vmatpush.bf16.msrb.mxu0 %v8558_v17  ;;  %v881_v14 = vpack.c.b16 %v880_v37, %v880_v37  ;;  %v8578_v17 = vld [vmem:[#allocation7 + $0xfb0] sm:$0xff] }
 0x37a   :  { %5806 = vmatpush.bf16.msrb.mxu1 %v8566_v31 }
 0x37b   :  { %5716 = vmatpush.bf16.msra.mxu2 %v8509_v19  ;;  %v8585_v19 = vld [vmem:[#allocation7 + $0xfe8] sm:$0xff] }
 0x37c   :  { %5729 = vmatpush.bf16.msra.mxu3 %v8517_v29  ;;  %v8584_v29 = vld [vmem:[#allocation7 + $0xfe0] sm:$0xff] }
 0x37d   :  { %5794 = vmatpush.bf16.msrb.mxu0 %v8557_v22 }
 0x37e   :  { %5807 = vmatpush.bf16.msrb.mxu1 %v8565_v59 }
 0x37f   :  { %5717 = vmatpush.bf16.msra.mxu2 %v8508_v9 }
 0x380   :  { %5730 = vmatpush.bf16.msra.mxu3 %v8516_v56 }
 0x381   :  { %5795 = vmatpush.bf16.msrb.mxu0 %v8556_v2  ;;  %v9382_v39 = vpop.f32.mrf.mxu0 }
 0x382   :  { %5808 = vmatpush.bf16.msrb.mxu1 %v8564_v24  ;;  %5718 = vmatmul.bf16.vlgmr.msra.gmra.mxu2 %v855_v52  ;;  %v9384_v32 = vpop.f32.mrf.mxu1 }
 0x383   :  { %5762 = vmatpush.bf16.msrb.mxu2 %v8547_v20  ;;  %5731 = vmatmul.bf16.vlgmr.msra.gmra.mxu3 %v860_v33  ;;  %v8583_v20 = vld [vmem:[#allocation7 + $0xfd8] sm:$0xff]  ;;  %v8572_v33 = vld [vmem:[#allocation7 + $0xf80] sm:$0xff] }
 0x384   :  { %5775 = vmatpush.bf16.msrb.mxu3 %v8555_v26  ;;  %5796 = vmatmul.bf16.vlgmr.msrb.gmra.mxu0 %v891_v42  ;;  %v8573_v26 = vld [vmem:[#allocation7 + $0xf88] sm:$0xff]  ;;  %v8580_v42 = vld [vmem:[#allocation7 + $0xfc0] sm:$0xff] }
 0x385   :  { %5809 = vmatmul.bf16.vlgmr.msrb.gmra.mxu1 %v896_v47  ;;  %v5511_v18 = vpop.f32.mrf.mxu2  ;;  %v901_v47 = vpack.c.b16 %v9190_v5, %v9190_v5 }
 0x386   :  { %v5512_v3 = vadd.f32 %v5511_v18, %v5499_v55  ;;  %v5524_v11 = vpop.f32.mrf.mxu3  ;;  %v8586_v55 = vld [vmem:[#allocation7 + $0xff0] sm:$0xff] }
 0x387   :  { %5763 = vmatpush.bf16.msrb.mxu2 %v8546_v50 }
 0x388   :  { %5776 = vmatpush.bf16.msrb.mxu3 %v8554_v38  ;;  %v5525_v51 = vadd.f32 %v5524_v11, %v5512_v3  ;;  %v906_v38 = vpack.c.b16 %v9193_v8, %v9193_v8 }
 0x389   :  { %v5591_v23 = vpop.f32.mrf.mxu0 }
 0x38a   :  { %v5538_v49 = vadd.f32 %v9365_v44, %v5525_v51  ;;  %v5604_v63 = vpop.f32.mrf.mxu1  ;;  %v883_v44 = vrot.slane %v9175_v41, 3  ;;  %v8577_v41 = vld [vmem:[#allocation7 + $0xfa8] sm:$0xff] }
 0x38b   :  { %5764 = vmatpush.bf16.msrb.mxu2 %v8545_v61 }
 0x38c   :  { %5777 = vmatpush.bf16.msrb.mxu3 %v8553_v45  ;;  %v5551_v0 = vadd.f32 %v9367_v34, %v5538_v49  ;;  %v8587_v34 = vld [vmem:[#allocation7 + $0xff8] sm:$0xff]  ;;  %v885_v48 = vsel %vm548_vm4, %v884_v15, %v883_v44 }
 0x38d   :  { %v5513_v10 = vpop.f32.mrf.mxu2  ;;  %v886_v31 = vpack.c.b16 %v885_v48, %v885_v48 }
 0x38e   :  { %v5526_v58 = vpop.f32.mrf.mxu3 }
 0x38f   :  { %5765 = vmatpush.bf16.msrb.mxu2 %v8544_v25 }
 0x390   :  { %5778 = vmatpush.bf16.msrb.mxu3 %v8552_v40 }
 0x393   :  { %5766 = vmatpush.bf16.msrb.mxu2 %v8543_v46 }
 0x394   :  { %5779 = vmatpush.bf16.msrb.mxu3 %v8551_v54 }
 0x397   :  { %5767 = vmatpush.bf16.msrb.mxu2 %v8542_v13 }
 0x398   :  { %5780 = vmatpush.bf16.msrb.mxu3 %v8550_v7 }
 0x39b   :  { %5768 = vmatpush.bf16.msrb.mxu2 %v8541_v27 }
 0x39c   :  { %5781 = vmatpush.bf16.msrb.mxu3 %v8549_v1 }
 0x39f   :  { %5769 = vmatpush.bf16.msrb.mxu2 %v8540_v53 }
 0x3a0   :  { %5782 = vmatpush.bf16.msrb.mxu3 %v8548_v57  ;;  %v8595_v57 = vld [vmem:[#allocation10 + $0x38] sm:$0xff] }
 0x3a1   :  { %v5641_v35 = vpop.f32.mrf.mxu0  ;;  %5910 = vmatpush.bf16.msra.mxu0 %v8595_v57 }
 0x3a2   :  { %5770 = vmatmul.bf16.vlgmr.msrb.gmra.mxu2 %v881_v14  ;;  %v5654_v22 = vpop.f32.mrf.mxu1 }
 0x3a3   :  { %5814 = vmatpush.bf16.msra.mxu2 %v8579_v6  ;;  %5783 = vmatmul.bf16.vlgmr.msrb.gmra.mxu3 %v886_v31  ;;  %v8594_v31 = vld [vmem:[#allocation10 + $0x30] sm:$0xff] }
 0x3a4   :  { %5827 = vmatpush.bf16.msra.mxu3 %v8587_v34 }
 0x3a5   :  { %v5563_v59 = vpop.f32.mrf.mxu2  ;;  %5911 = vmatpush.bf16.msra.mxu0 %v8594_v31 }
 0x3a6   :  { %v5564_v9 = vadd.f32 %v5563_v59, %v5551_v0  ;;  %v5576_v28 = vpop.f32.mrf.mxu3  ;;  %v8588_v59 = vld [vmem:[#allocation10] sm:$0xff] }
 0x3a7   :  { %5815 = vmatpush.bf16.msra.mxu2 %v8578_v17 }
 0x3a8   :  { %5828 = vmatpush.bf16.msra.mxu3 %v8586_v55  ;;  %v5577_v56 = vadd.f32 %v5576_v28, %v5564_v9 }
 0x3a9   :  { %v5643_v24 = vpop.f32.mrf.mxu0 }
 0x3aa   :  { %v5590_v2 = vadd.f32 %v9382_v39, %v5577_v56  ;;  %v5656_v43 = vpop.f32.mrf.mxu1 }
 0x3ab   :  { %5816 = vmatpush.bf16.msra.mxu2 %v8577_v41  ;;  %v8593_v41 = vld [vmem:[#allocation10 + $0x28] sm:$0xff] }
 0x3ac   :  { %5829 = vmatpush.bf16.msra.mxu3 %v8585_v19  ;;  %v5603_v52 = vadd.f32 %v9384_v32, %v5590_v2  ;;  %5912 = vmatpush.bf16.msra.mxu0 %v8593_v41  ;;  %v8592_v19 = vld [vmem:[#allocation10 + $0x20] sm:$0xff] }
 0x3ad   :  { %v5565_v50 = vpop.f32.mrf.mxu2 }
 0x3ae   :  { %v5578_v60 = vpop.f32.mrf.mxu3 }
 0x3af   :  { %5817 = vmatpush.bf16.msra.mxu2 %v8576_v21  ;;  %v8591_v21 = vld [vmem:[#allocation10 + $0x18] sm:$0xff] }
 0x3b0   :  { %5830 = vmatpush.bf16.msra.mxu3 %v8584_v29  ;;  %5913 = vmatpush.bf16.msra.mxu0 %v8592_v19 }
 0x3b3   :  { %5818 = vmatpush.bf16.msra.mxu2 %v8575_v16  ;;  %v8589_v16 = vld [vmem:[#allocation10 + $0x8] sm:$0xff] }
 0x3b4   :  { %5831 = vmatpush.bf16.msra.mxu3 %v8583_v20  ;;  %5914 = vmatpush.bf16.msra.mxu0 %v8591_v21 }
 0x3b7   :  { %5819 = vmatpush.bf16.msra.mxu2 %v8574_v4 }
 0x3b8   :  { %5832 = vmatpush.bf16.msra.mxu3 %v8582_v30 }
 0x3bb   :  { %5820 = vmatpush.bf16.msra.mxu2 %v8573_v26 }
 0x3bc   :  { %5833 = vmatpush.bf16.msra.mxu3 %v8581_v62 }
 0x3bf   :  { %5821 = vmatpush.bf16.msra.mxu2 %v8572_v33  ;;  %v8624_v33 = vld [vmem:[#allocation11] ss:$0 sm:$0xff] }
 0x3c0   :  { %5834 = vmatpush.bf16.msra.mxu3 %v8580_v42 }
 0x3c1   :  { %v5693_v61 = vpop.f32.mrf.mxu0 }
 0x3c2   :  { %5822 = vmatmul.bf16.vlgmr.msra.gmra.mxu2 %v901_v47  ;;  %v5706_v45 = vpop.f32.mrf.mxu1 }
 0x3c3   :  { %5835 = vmatmul.bf16.vlgmr.msra.gmra.mxu3 %v906_v38 }
 0x3c5   :  { %v5615_v25 = vpop.f32.mrf.mxu2 }
 0x3c6   :  { %v5616_v39 = vadd.f32 %v5615_v25, %v5603_v52  ;;  %v5628_v32 = vpop.f32.mrf.mxu3 }
 0x3c8   :  { %v5629_v40 = vadd.f32 %v5628_v32, %v5616_v39 }
 0x3c9   :  { %v5695_v18 = vpop.f32.mrf.mxu0 }
 0x3ca   :  { %v5642_v46 = vadd.f32 %v5641_v35, %v5629_v40  ;;  %v5708_v3 = vpop.f32.mrf.mxu1  ;;  %v8590_v35 = vld [vmem:[#allocation10 + $0x10] sm:$0xff] }
 0x3cb   :  { %5915 = vmatpush.bf16.msra.mxu0 %v8590_v35 }
 0x3cc   :  { %v5655_v54 = vadd.f32 %v5654_v22, %v5642_v46 }
 0x3cd   :  { %v5617_v11 = vpop.f32.mrf.mxu2 }
 0x3ce   :  { %v5630_v51 = vpop.f32.mrf.mxu3 }
 0x3cf   :  { %5916 = vmatpush.bf16.msra.mxu0 %v8589_v16 }
 0x3d3   :  { %5917 = vmatpush.bf16.msra.mxu0 %v8588_v59 }
 0x3e1   :  { %v5745_v13 = vpop.f32.mrf.mxu0 }
 0x3e2   :  { %v5758_v5 = vpop.f32.mrf.mxu1 }
 0x3e5   :  { %v5667_v49 = vpop.f32.mrf.mxu2 }
 0x3e6   :  { %v5668_v23 = vadd.f32 %v5667_v49, %v5655_v54  ;;  %v5680_v63 = vpop.f32.mrf.mxu3 }
 0x3e8   :  { %v5681_v7 = vadd.f32 %v5680_v63, %v5668_v23 }
 0x3e9   :  { %v5747_v27 = vpop.f32.mrf.mxu0 }
 0x3ea   :  { %v5694_v8 = vadd.f32 %v5693_v61, %v5681_v7  ;;  %v5760_v0 = vpop.f32.mrf.mxu1 }
 0x3ec   :  { %v5707_v10 = vadd.f32 %v5706_v45, %v5694_v8 }
 0x3ed   :  { %v5669_v12 = vpop.f32.mrf.mxu2 }
 0x3ee   :  { %v5682_v1 = vpop.f32.mrf.mxu3 }
 0x401   :  { %v5797_v58 = vpop.f32.mrf.mxu0 }
 0x402   :  { %v5810_v53 = vpop.f32.mrf.mxu1 }
 0x405   :  { %v5719_v36 = vpop.f32.mrf.mxu2 }
 0x406   :  { %v5720_v6 = vadd.f32 %v5719_v36, %v5707_v10  ;;  %v5732_v44 = vpop.f32.mrf.mxu3 }
 0x408   :  { %v5733_v37 = vadd.f32 %v5732_v44, %v5720_v6 }
 0x409   :  { %v5799_v34 = vpop.f32.mrf.mxu0 }
 0x40a   :  { %v5746_v15 = vadd.f32 %v5745_v13, %v5733_v37  ;;  %v5812_v14 = vpop.f32.mrf.mxu1 }
 0x40c   :  { %v5759_v48 = vadd.f32 %v5758_v5, %v5746_v15 }
 0x40d   :  { %v5721_v17 = vpop.f32.mrf.mxu2 }
 0x40e   :  { %v5734_v55 = vpop.f32.mrf.mxu3 }
 0x425   :  { %v5771_v29 = vpop.f32.mrf.mxu2 }
 0x426   :  { %v5784_v22 = vpop.f32.mrf.mxu3  ;;  %v5772_v28 = vadd.f32 %v5771_v29, %v5759_v48 }
 0x428   :  { %v5785_v4 = vadd.f32 %v5784_v22, %v5772_v28 }
 0x42a   :  { %v5798_v56 = vadd.f32 %v5797_v58, %v5785_v4 }
 0x42c   :  { %v5811_v2 = vadd.f32 %v5810_v53, %v5798_v56 }
 0x42d   :  { %v5773_v9 = vpop.f32.mrf.mxu2 }
 0x42e   :  { %v5786_v20 = vpop.f32.mrf.mxu3 }
 0x445   :  { %v5823_v24 = vpop.f32.mrf.mxu2 }
 0x446   :  { %v5824_v30 = vadd.f32 %v5823_v24, %v5811_v2  ;;  %v5836_v43 = vpop.f32.mrf.mxu3 }
 0x448   :  { %v5837_v26 = vadd.f32 %v5836_v43, %v5824_v30 }
 0x44a   :  { %v5840_v52 = vmax.f32 %v5837_v26, 0.0 }
 0x44c   :  { %v5841_v50 = vpack.c.bf16 %v5840_v52, %v5840_v52 }
 0x44d   :  { %v5825_v62 = vpop.f32.mrf.mxu2 }
 0x44e   :  { %5918 = vmatmul.bf16.vlgmr.msra.gmra.mxu0 %v5841_v50  ;;  %v5838_v60 = vpop.f32.mrf.mxu3 }
 0x4cb   :  { %v5919_v42 = vpop.f32.mrf.mxu0 }
 0x4cc   :  { %v5920_v47 = vadd.f32 %v8624_v33, %v5919_v42 }
 0x4ce   :  { %5923 = vst [vmem:[#allocation13] sm:$0x3] %v5920_v47 }
 0x4cf   :  { %5934 = dma.vmem_to_hbm [thread:$0]  %s5930_s19, 32, %s5932_s3, [#allocation4]  }
 0x4d3   :  { %v5921_v38 = vpop.f32.mrf.mxu0 }
 0x4d4   :  { %8801 = dma.done.wait [#allocation4], 32  }
 0x4d5   :  { %8802 = vsyncadd [#allocation4], 4294967264 }
 0x4d6   :  { %5939 = vsyncpa [#allocation3], 1 }
 0x4d7   :  { %5940 = vsyncpa [#allocation6], 1 }
 0x4d8   :  { %5941 = vsyncpa [#allocation9], 1 }
 0x4d9   :  { %5942 = vsyncpa [#allocation12], 1 }
 0x4da   :  { %5943 = vsyncpa [#allocation4], 1 }

</bundles_post_ra>
